<compile_context>
chip_gen: v5e
topology: v5e:2x2
jax: 0.10.0
libtpu: 0.0.40
codegen_flags: <defaults>
</compile_context>

<pallas_src>
import math
from functools import partial

import jax
import jax.numpy as jnp
from jax.experimental import pallas as pl
from jax.experimental.pallas import tpu as pltpu

BN_EPS = 1e-5
EXPANSION = 4
LANE = 128
# Scoped VMEM budget: v7x has 64 MiB physical VMEM per TensorCore (v5e/v6e: 128 MiB).
_VMEM_LIMIT = 48 * 1024 * 1024


def _rup(x, m):
    return ((x + m - 1) // m) * m


# ---------------------------------------------------------------------------
# Kernel 1: fused matmul + bias + (optional) ReLU   (conv1 1x1 with folded BN)
#   A: (tm, K) bf16,  W: (K, N) bf16 (BN scale pre-folded),  b: (1, N) f32
#   out = relu(A @ W + b)  -- f32 accumulate, stored as out_dtype.
# ---------------------------------------------------------------------------
def _mm_bias_act_kernel(a_ref, w_ref, b_ref, o_ref, *, relu):
    acc = jnp.dot(a_ref[...], w_ref[...], preferred_element_type=jnp.float32)
    acc = acc + b_ref[...]
    if relu:
        acc = jnp.maximum(acc, 0.0)
    o_ref[...] = acc.astype(o_ref.dtype)


def matmul_bias_act(a, w, bias, *, relu, out_dtype=jnp.float32):
    m, k = a.shape
    n = w.shape[-1]
    # Keep the M tiling (8,128)-clean: pick 256/128 row tiles, pad ragged M.
    if m % 256 == 0:
        tm = 256
    elif m % 128 == 0:
        tm = 128
    else:
        tm = min(256, _rup(m, 8))
        a = jnp.pad(a, ((0, _rup(m, tm) - m), (0, 0)))
    mp = a.shape[0]
    bias = bias.reshape(1, n).astype(jnp.float32)

    out = pl.pallas_call(
        partial(_mm_bias_act_kernel, relu=relu),
        grid=(mp // tm,),
        in_specs=[
            pl.BlockSpec((tm, k), lambda i: (i, 0)),
            pl.BlockSpec((k, n), lambda i: (0, 0)),
            pl.BlockSpec((1, n), lambda i: (0, 0)),
        ],
        out_specs=pl.BlockSpec((tm, n), lambda i: (i, 0)),
        out_shape=jax.ShapeDtypeStruct((mp, n), out_dtype),
        compiler_params=pltpu.CompilerParams(
            dimension_semantics=("parallel",),
            vmem_limit_bytes=_VMEM_LIMIT),
        cost_estimate=pl.CostEstimate(
            flops=int(2 * mp * n * k),
            transcendentals=0,
            bytes_accessed=int(a.size * a.dtype.itemsize
                               + w.size * w.dtype.itemsize
                               + mp * n * jnp.dtype(out_dtype).itemsize)),
    )(a, w, bias)
    return out if mp == m else out[:m]


# ---------------------------------------------------------------------------
# Kernel 2: fused conv2(3x3) + BN + ReLU + conv3(1x1) + BN
#           + (downsample 1x1 conv + BN | identity) + residual add + ReLU.
# The 3x3 conv is a tap loop over a phase-split padded layout kept in VMEM
# (no im2col expansion in HBM).  All matmuls are bf16 -> f32.
# ---------------------------------------------------------------------------
def _tail_kernel(*refs, stride, ho, wo, downsample):
    if downsample:
        (xph_ref, w2_ref, b2_ref, w3_ref, b3_ref,
         xds_ref, wd_ref, bd_ref, o_ref) = refs
    else:
        (xph_ref, w2_ref, b2_ref, w3_ref, b3_ref, res_ref, o_ref) = refs

    c1p = xph_ref.shape[-1]
    m = ho * wo

    # conv2: nine tap matmuls accumulated in f32.
    acc = jnp.zeros((m, w2_ref.shape[-1]), jnp.float32)
    for i in range(3):
        for j in range(3):
            ph = (i % stride) * stride + (j % stride)
            di, dj = i // stride, j // stride
            win = xph_ref[ph, 0, di:di + ho, dj:dj + wo, :]     # (ho, wo, c1p)
            acc = acc + jnp.dot(win.reshape(m, c1p), w2_ref[i * 3 + j],
                                preferred_element_type=jnp.float32)
    h2 = jnp.maximum(acc + b2_ref[...], 0.0)                    # bn2 folded + relu

    # conv3 (1x1) + bn3 (folded).
    h3 = jnp.dot(h2.astype(jnp.bfloat16), w3_ref[...],
                 preferred_element_type=jnp.float32) + b3_ref[...]

    # residual branch.
    if downsample:
        res = jnp.dot(xds_ref[...], wd_ref[...],
                      preferred_element_type=jnp.float32) + bd_ref[...]
    else:
        res = res_ref[...].astype(jnp.float32)

    o_ref[...] = jnp.maximum(h3 + res, 0.0)


def bottleneck_tail(xph, w2, b2, w3, b3, resid, wd, bd, *, stride, ho, wo):
    nph, batch, hq, wq, c1p = xph.shape
    c2p = w2.shape[-1]
    c3p = w3.shape[-1]
    mb = ho * wo

    in_specs = [
        pl.BlockSpec((nph, 1, hq, wq, c1p), lambda i: (0, i, 0, 0, 0)),
        pl.BlockSpec((9, c1p, c2p), lambda i: (0, 0, 0)),
        pl.BlockSpec((1, c2p), lambda i: (0, 0)),
        pl.BlockSpec((c2p, c3p), lambda i: (0, 0)),
        pl.BlockSpec((1, c3p), lambda i: (0, 0)),
        pl.BlockSpec((mb, resid.shape[-1]), lambda i: (i, 0)),
    ]
    args = [xph, w2, b2.reshape(1, c2p), w3, b3.reshape(1, c3p), resid]
    flops = 2 * batch * mb * (9 * c1p * c2p + c2p * c3p)
    if wd is not None:
        in_specs += [pl.BlockSpec((wd.shape[0], c3p), lambda i: (0, 0)),
                     pl.BlockSpec((1, c3p), lambda i: (0, 0))]
        args += [wd, bd.reshape(1, c3p)]
        flops += 2 * batch * mb * wd.shape[0] * c3p

    bytes_accessed = int(sum(x.size * x.dtype.itemsize for x in args)
                         + batch * mb * c3p * 4)

    return pl.pallas_call(
        partial(_tail_kernel, stride=stride, ho=ho, wo=wo,
                downsample=wd is not None),
        grid=(batch,),
        in_specs=in_specs,
        out_specs=pl.BlockSpec((mb, c3p), lambda i: (i, 0)),
        out_shape=jax.ShapeDtypeStruct((batch * mb, c3p), jnp.float32),
        compiler_params=pltpu.CompilerParams(
            dimension_semantics=("parallel",),
            vmem_limit_bytes=_VMEM_LIMIT),
        cost_estimate=pl.CostEstimate(flops=int(flops), transcendentals=0,
                                      bytes_accessed=bytes_accessed),
    )(*args)


# ---------------------------------------------------------------------------
# Phase-split padded layout for the 3x3 conv: same total size as the padded
# input (no kh*kw im2col expansion).  Tap (i, j) of a stride-s conv is a
# static slice of phase ((i % s) * s + (j % s)).
# ---------------------------------------------------------------------------
def _phase_split(x, ksize, stride, pad):
    b, h, w, c = x.shape
    hp, wp = h + 2 * pad, w + 2 * pad
    ho = (hp - ksize) // stride + 1
    wo = (wp - ksize) // stride + 1
    hq, wq = _rup(hp, stride) // stride, _rup(wp, stride) // stride
    xpad = jnp.pad(x, ((0, 0),
                       (pad, hq * stride - h - pad),
                       (pad, wq * stride - w - pad),
                       (0, 0)))
    xph = xpad.reshape(b, hq, stride, wq, stride, c)
    xph = jnp.transpose(xph, (2, 4, 0, 1, 3, 5))       # (s, s, b, hq, wq, c)
    return xph.reshape(stride * stride, b, hq, wq, c), ho, wo


# ---------------------------------------------------------------------------
# Bottleneck forward (NCHW in / NCHW out, like the PyTorch module).
# ---------------------------------------------------------------------------
def bottleneck_forward(x_nchw, p, *, planes, stride):
    x = jnp.transpose(x_nchw, (0, 2, 3, 1)).astype(jnp.float32)   # NHWC
    b, h, w, cin = x.shape
    c3 = planes * EXPANSION
    c3p = p['w3'].shape[-1]

    # conv1 (1x1) + bn1 + relu: plain matmul over (B*H*W, Cin), bf16 in/out.
    a1 = matmul_bias_act(x.reshape(b * h * w, cin).astype(jnp.bfloat16),
                         p['w1'], p['b1'], relu=True, out_dtype=jnp.bfloat16)
    a1 = a1.reshape(b, h, w, -1)

    # phase-split zero-padded layout feeding the in-kernel 3x3 tap loop.
    xph, ho, wo = _phase_split(a1, 3, stride, 1)

    # residual operand.
    if p['wd'] is not None:
        resid = x[:, ::stride, ::stride, :].reshape(b * ho * wo, cin)
        resid = resid.astype(jnp.bfloat16)            # downsample matmul input
        wd, bd = p['wd'], p['bd']
    else:
        resid = x.reshape(b * h * w, cin)             # identity, added in f32
        if c3p != cin:
            resid = jnp.pad(resid, ((0, 0), (0, c3p - cin)))
        wd = bd = None

    out = bottleneck_tail(xph, p['w2'], p['b2'], p['w3'], p['b3'],
                          resid, wd, bd, stride=stride, ho=ho, wo=wo)
    out = out.reshape(b, ho, wo, c3p)
    if c3p != c3:
        out = out[..., :c3]
    return jnp.transpose(out, (0, 3, 1, 2))           # back to NCHW


# ---------------------------------------------------------------------------
# Parameters: deterministic synthetic weights, eval-mode BN folded in, channels
# zero-padded to multiples of 128 for lane-dense stores.
# ---------------------------------------------------------------------------
class _KeyGen:
    def __init__(self, key):
        self._key = key

    def __call__(self):
        self._key, k = jax.random.split(self._key)
        return k


def _conv_w(kg, kh, kw, cin, cout):
    std = math.sqrt(2.0 / (kh * kw * cout))
    return std * jax.random.normal(kg(), (kh, kw, cin, cout), jnp.float32)


def _rand_bn(kg, c):
    gamma = jax.random.uniform(kg(), (c,), jnp.float32, 0.5, 1.5)
    beta = 0.1 * jax.random.normal(kg(), (c,), jnp.float32)
    mean = 0.1 * jax.random.normal(kg(), (c,), jnp.float32)
    var = jax.random.uniform(kg(), (c,), jnp.float32, 0.5, 1.5)
    return gamma, beta, mean, var


def _fold_bn(w, gamma, beta, mean, var):
    scale = gamma / jnp.sqrt(var + BN_EPS)
    return w * scale, beta - mean * scale


def make_bottleneck_params(key, inplanes, planes, stride):
    # TODO(synk): BatchNorm reproduced in eval mode (folded running stats);
    # training-mode batch statistics are not modeled.
    kg = _KeyGen(key)
    c1 = c2 = planes
    c3 = planes * EXPANSION
    c1p, c2p, c3p = _rup(c1, LANE), _rup(c2, LANE), _rup(c3, LANE)

    w1, b1 = _fold_bn(_conv_w(kg, 1, 1, inplanes, c1)[0, 0], *_rand_bn(kg, c1))
    w2, b2 = _fold_bn(_conv_w(kg, 3, 3, c1, c2), *_rand_bn(kg, c2))
    w3, b3 = _fold_bn(_conv_w(kg, 1, 1, c2, c3)[0, 0], *_rand_bn(kg, c3))

    p = {
        'w1': jnp.pad(w1, ((0, 0), (0, c1p - c1))).astype(jnp.bfloat16),
        'b1': jnp.pad(b1, (0, c1p - c1)),
        'w2': jnp.pad(w2, ((0, 0), (0, 0), (0, c1p - c1), (0, c2p - c2))
                      ).reshape(9, c1p, c2p).astype(jnp.bfloat16),
        'b2': jnp.pad(b2, (0, c2p - c2)),
        'w3': jnp.pad(w3, ((0, c2p - c2), (0, c3p - c3))).astype(jnp.bfloat16),
        'b3': jnp.pad(b3, (0, c3p - c3)),
        'wd': None,
        'bd': None,
    }
    if stride != 1 or inplanes != c3:
        wd, bd = _fold_bn(_conv_w(kg, 1, 1, inplanes, c3)[0, 0],
                          *_rand_bn(kg, c3))
        p['wd'] = jnp.pad(wd, ((0, 0), (0, c3p - c3))).astype(jnp.bfloat16)
        p['bd'] = jnp.pad(bd, (0, c3p - c3))
    return p


if __name__ == "__main__":
    key = jax.random.PRNGKey(0)
    kp1, kp2, kx = jax.random.split(key, 3)

    # Block with downsample (stride 2): (2, 64, 16, 16) -> (2, 256, 8, 8)
    p_ds = make_bottleneck_params(kp1, inplanes=64, planes=64, stride=2)
    # Identity-residual block:          (2, 256, 8, 8) -> (2, 256, 8, 8)
    p_id = make_bottleneck_params(kp2, inplanes=256, planes=64, stride=1)

    x = jax.random.normal(kx, (2, 64, 16, 16), jnp.float32)

    @jax.jit
    def run(x, pa, pb):
        y = bottleneck_forward(x, pa, planes=64, stride=2)
        return bottleneck_forward(y, pb, planes=64, stride=1)

    out = jax.block_until_ready(run(x, p_ds, p_id))
    assert out.shape == (2, 256, 8, 8), out.shape
    assert bool(jnp.all(jnp.isfinite(out)))
    print("KERNEL_OK")
</pallas_src>

<mosaic_0001>
module attributes {stable_mosaic.version = 11 : i64} {
  func.func @_mm_bias_act_kernel(%arg0: i32, %arg1: memref<256x64xbf16, #tpu.memory_space<vmem>>, %arg2: memref<64x128xbf16, #tpu.memory_space<vmem>>, %arg3: memref<1x128xf32, #tpu.memory_space<vmem>>, %arg4: memref<256x128xbf16, #tpu.memory_space<vmem>>) attributes {dimension_semantics = [#tpu.dimension_semantics<parallel>], iteration_bounds = array<i64: 2>, scalar_prefetch = 0 : i64, scratch_operands = 0 : i64, tpu.core_type = #tpu.core_type<tc>, window_params = [{transform_indices = @transform_0, window_bounds = array<i64: 256, 64>}, {pipeline_mode = #tpu.pipeline_mode<synchronous>, transform_indices = @transform_1, window_bounds = array<i64: 64, 128>}, {pipeline_mode = #tpu.pipeline_mode<synchronous>, transform_indices = @transform_2, window_bounds = array<i64: 1, 128>}, {transform_indices = @transform_3, window_bounds = array<i64: 256, 128>}]} {
    %c0 = arith.constant 0 : index
    %c0_0 = arith.constant 0 : index
    %0 = vector.load %arg1[%c0, %c0_0] : memref<256x64xbf16, #tpu.memory_space<vmem>>, vector<256x64xbf16>
    %c0_1 = arith.constant 0 : index
    %c0_2 = arith.constant 0 : index
    %1 = vector.load %arg2[%c0_1, %c0_2] : memref<64x128xbf16, #tpu.memory_space<vmem>>, vector<64x128xbf16>
    %cst = arith.constant dense<0.000000e+00> : vector<256x128xf32>
    %2 = tpu.matmul %0, %1, %cst {dimension_numbers = #tpu.dot_dimension_numbers<[1], [0], [0], [1], [0, 0, 1, 1], [], []>} : vector<256x64xbf16>, vector<64x128xbf16>, vector<256x128xf32> -> vector<256x128xf32>
    %c0_3 = arith.constant 0 : index
    %c0_4 = arith.constant 0 : index
    %3 = vector.load %arg3[%c0_3, %c0_4] : memref<1x128xf32, #tpu.memory_space<vmem>>, vector<1x128xf32>
    %4 = vector.broadcast %3 : vector<1x128xf32> to vector<256x128xf32>
    %5 = arith.addf %2, %4 : vector<256x128xf32>
    %cst_5 = arith.constant 0.000000e+00 : f32
    %6 = vector.broadcast %cst_5 : f32 to vector<256x128xf32>
    %7 = arith.maximumf %5, %6 : vector<256x128xf32>
    %8 = arith.truncf %7 : vector<256x128xf32> to vector<256x128xbf16>
    %c0_6 = arith.constant 0 : index
    %c0_7 = arith.constant 0 : index
    %9 = vector.load %arg4[%c0_6, %c0_7] : memref<256x128xbf16, #tpu.memory_space<vmem>>, vector<256x128xbf16>
    tpu.vector_store %arg4[%c0_6, %c0_7], %8 {strides = array<i32>} : memref<256x128xbf16, #tpu.memory_space<vmem>>, vector<256x128xbf16>,
    return
  }
  func.func @transform_0(%arg0: i32) -> (i32, i32) {
    %c0_i32 = arith.constant 0 : i32
    %c0_i32_0 = arith.constant 0 : i32
    return %arg0, %c0_i32 : i32, i32
  }
  func.func @transform_1(%arg0: i32) -> (i32, i32) {
    %c0_i32 = arith.constant 0 : i32
    %c0_i32_0 = arith.constant 0 : i32
    %c0_i32_1 = arith.constant 0 : i32
    return %c0_i32, %c0_i32_0 : i32, i32
  }
  func.func @transform_2(%arg0: i32) -> (i32, i32) {
    %c0_i32 = arith.constant 0 : i32
    %c0_i32_0 = arith.constant 0 : i32
    %c0_i32_1 = arith.constant 0 : i32
    return %c0_i32, %c0_i32_0 : i32, i32
  }
  func.func @transform_3(%arg0: i32) -> (i32, i32) {
    %c0_i32 = arith.constant 0 : i32
    %c0_i32_0 = arith.constant 0 : i32
    return %arg0, %c0_i32 : i32, i32
  }
}

module attributes {stable_mosaic.version = 11 : i64} {
  func.func @_tail_kernel(%arg0: i32, %arg1: memref<4x1x9x9x128xbf16, #tpu.memory_space<vmem>>, %arg2: memref<9x128x128xbf16, #tpu.memory_space<vmem>>, %arg3: memref<1x128xf32, #tpu.memory_space<vmem>>, %arg4: memref<128x256xbf16, #tpu.memory_space<vmem>>, %arg5: memref<1x256xf32, #tpu.memory_space<vmem>>, %arg6: memref<64x64xbf16, #tpu.memory_space<vmem>>, %arg7: memref<64x256xbf16, #tpu.memory_space<vmem>>, %arg8: memref<1x256xf32, #tpu.memory_space<vmem>>, %arg9: memref<64x256xf32, #tpu.memory_space<vmem>>) attributes {dimension_semantics = [#tpu.dimension_semantics<parallel>], iteration_bounds = array<i64: 2>, scalar_prefetch = 0 : i64, scratch_operands = 0 : i64, tpu.core_type = #tpu.core_type<tc>, window_params = [{transform_indices = @transform_0, window_bounds = array<i64: 4, 1, 9, 9, 128>}, {pipeline_mode = #tpu.pipeline_mode<synchronous>, transform_indices = @transform_1, window_bounds = array<i64: 9, 128, 128>}, {pipeline_mode = #tpu.pipeline_mode<synchronous>, transform_indices = @transform_2, window_bounds = array<i64: 1, 128>}, {pipeline_mode = #tpu.pipeline_mode<synchronous>, transform_indices = @transform_3, window_bounds = array<i64: 128, 256>}, {pipeline_mode = #tpu.pipeline_mode<synchronous>, transform_indices = @transform_4, window_bounds = array<i64: 1, 256>}, {transform_indices = @transform_5, window_bounds = array<i64: 64, 64>}, {pipeline_mode = #tpu.pipeline_mode<synchronous>, transform_indices = @transform_6, window_bounds = array<i64: 64, 256>}, {pipeline_mode = #tpu.pipeline_mode<synchronous>, transform_indices = @transform_7, window_bounds = array<i64: 1, 256>}, {transform_indices = @transform_8, window_bounds = array<i64: 64, 256>}]} {
    %cst = arith.constant 0.000000e+00 : f32
    %0 = vector.broadcast %cst : f32 to vector<64x128xf32>
    %c0 = arith.constant 0 : index
    %c0_0 = arith.constant 0 : index
    %c0_1 = arith.constant 0 : index
    %c0_2 = arith.constant 0 : index
    %c0_3 = arith.constant 0 : index
    %1 = vector.load %arg1[%c0, %c0_0, %c0_1, %c0_2, %c0_3] : memref<4x1x9x9x128xbf16, #tpu.memory_space<vmem>>, vector<1x1x8x8x128xbf16>
    %2 = vector.shape_cast %1 : vector<1x1x8x8x128xbf16> to vector<8x8x128xbf16>
    %3 = vector.shape_cast %2 : vector<8x8x128xbf16> to vector<64x128xbf16>
    %c0_4 = arith.constant 0 : index
    %c0_5 = arith.constant 0 : index
    %c0_6 = arith.constant 0 : index
    %4 = vector.load %arg2[%c0_4, %c0_5, %c0_6] : memref<9x128x128xbf16, #tpu.memory_space<vmem>>, vector<1x128x128xbf16>
    %5 = vector.shape_cast %4 : vector<1x128x128xbf16> to vector<128x128xbf16>
    %cst_7 = arith.constant dense<0.000000e+00> : vector<64x128xf32>
    %6 = tpu.matmul %3, %5, %cst_7 {dimension_numbers = #tpu.dot_dimension_numbers<[1], [0], [0], [1], [0, 0, 1, 1], [], []>} : vector<64x128xbf16>, vector<128x128xbf16>, vector<64x128xf32> -> vector<64x128xf32>
    %7 = arith.addf %0, %6 : vector<64x128xf32>
    %c1 = arith.constant 1 : index
    %c0_8 = arith.constant 0 : index
    %c0_9 = arith.constant 0 : index
    %c0_10 = arith.constant 0 : index
    %c0_11 = arith.constant 0 : index
    %8 = vector.load %arg1[%c1, %c0_8, %c0_9, %c0_10, %c0_11] : memref<4x1x9x9x128xbf16, #tpu.memory_space<vmem>>, vector<1x1x8x8x128xbf16>
    %9 = vector.shape_cast %8 : vector<1x1x8x8x128xbf16> to vector<8x8x128xbf16>
    %10 = vector.shape_cast %9 : vector<8x8x128xbf16> to vector<64x128xbf16>
    %c1_12 = arith.constant 1 : index
    %c0_13 = arith.constant 0 : index
    %c0_14 = arith.constant 0 : index
    %11 = vector.load %arg2[%c1_12, %c0_13, %c0_14] : memref<9x128x128xbf16, #tpu.memory_space<vmem>>, vector<1x128x128xbf16>
    %12 = vector.shape_cast %11 : vector<1x128x128xbf16> to vector<128x128xbf16>
    %cst_15 = arith.constant dense<0.000000e+00> : vector<64x128xf32>
    %13 = tpu.matmul %10, %12, %cst_15 {dimension_numbers = #tpu.dot_dimension_numbers<[1], [0], [0], [1], [0, 0, 1, 1], [], []>} : vector<64x128xbf16>, vector<128x128xbf16>, vector<64x128xf32> -> vector<64x128xf32>
    %14 = arith.addf %7, %13 : vector<64x128xf32>
    %c0_16 = arith.constant 0 : index
    %c0_17 = arith.constant 0 : index
    %c0_18 = arith.constant 0 : index
    %c1_19 = arith.constant 1 : index
    %c0_20 = arith.constant 0 : index
    %15 = vector.load %arg1[%c0_16, %c0_17, %c0_18, %c1_19, %c0_20] : memref<4x1x9x9x128xbf16, #tpu.memory_space<vmem>>, vector<1x1x8x8x128xbf16>
    %16 = vector.shape_cast %15 : vector<1x1x8x8x128xbf16> to vector<8x8x128xbf16>
    %17 = vector.shape_cast %16 : vector<8x8x128xbf16> to vector<64x128xbf16>
    %c2 = arith.constant 2 : index
    %c0_21 = arith.constant 0 : index
    %c0_22 = arith.constant 0 : index
    %18 = vector.load %arg2[%c2, %c0_21, %c0_22] : memref<9x128x128xbf16, #tpu.memory_space<vmem>>, vector<1x128x128xbf16>
    %19 = vector.shape_cast %18 : vector<1x128x128xbf16> to vector<128x128xbf16>
    %cst_23 = arith.constant dense<0.000000e+00> : vector<64x128xf32>
    %20 = tpu.matmul %17, %19, %cst_23 {dimension_numbers = #tpu.dot_dimension_numbers<[1], [0], [0], [1], [0, 0, 1, 1], [], []>} : vector<64x128xbf16>, vector<128x128xbf16>, vector<64x128xf32> -> vector<64x128xf32>
    %21 = arith.addf %14, %20 : vector<64x128xf32>
    %c2_24 = arith.constant 2 : index
    %c0_25 = arith.constant 0 : index
    %c0_26 = arith.constant 0 : index
    %c0_27 = arith.constant 0 : index
    %c0_28 = arith.constant 0 : index
    %22 = vector.load %arg1[%c2_24, %c0_25, %c0_26, %c0_27, %c0_28] : memref<4x1x9x9x128xbf16, #tpu.memory_space<vmem>>, vector<1x1x8x8x128xbf16>
    %23 = vector.shape_cast %22 : vector<1x1x8x8x128xbf16> to vector<8x8x128xbf16>
    %24 = vector.shape_cast %23 : vector<8x8x128xbf16> to vector<64x128xbf16>
    %c3 = arith.constant 3 : index
    %c0_29 = arith.constant 0 : index
    %c0_30 = arith.constant 0 : index
    %25 = vector.load %arg2[%c3, %c0_29, %c0_30] : memref<9x128x128xbf16, #tpu.memory_space<vmem>>, vector<1x128x128xbf16>
    %26 = vector.shape_cast %25 : vector<1x128x128xbf16> to vector<128x128xbf16>
    %cst_31 = arith.constant dense<0.000000e+00> : vector<64x128xf32>
    %27 = tpu.matmul %24, %26, %cst_31 {dimension_numbers = #tpu.dot_dimension_numbers<[1], [0], [0], [1], [0, 0, 1, 1], [], []>} : vector<64x128xbf16>, vector<128x128xbf16>, vector<64x128xf32> -> vector<64x128xf32>
    %28 = arith.addf %21, %27 : vector<64x128xf32>
    %c3_32 = arith.constant 3 : index
    %c0_33 = arith.constant 0 : index
    %c0_34 = arith.constant 0 : index
    %c0_35 = arith.constant 0 : index
    %c0_36 = arith.constant 0 : index
    %29 = vector.load %arg1[%c3_32, %c0_33, %c0_34, %c0_35, %c0_36] : memref<4x1x9x9x128xbf16, #tpu.memory_space<vmem>>, vector<1x1x8x8x128xbf16>
    %30 = vector.shape_cast %29 : vector<1x1x8x8x128xbf16> to vector<8x8x128xbf16>
    %31 = vector.shape_cast %30 : vector<8x8x128xbf16> to vector<64x128xbf16>
    %c4 = arith.constant 4 : index
    %c0_37 = arith.constant 0 : index
    %c0_38 = arith.constant 0 : index
    %32 = vector.load %arg2[%c4, %c0_37, %c0_38] : memref<9x128x128xbf16, #tpu.memory_space<vmem>>, vector<1x128x128xbf16>
    %33 = vector.shape_cast %32 : vector<1x128x128xbf16> to vector<128x128xbf16>
    %cst_39 = arith.constant dense<0.000000e+00> : vector<64x128xf32>
    %34 = tpu.matmul %31, %33, %cst_39 {dimension_numbers = #tpu.dot_dimension_numbers<[1], [0], [0], [1], [0, 0, 1, 1], [], []>} : vector<64x128xbf16>, vector<128x128xbf16>, vector<64x128xf32> -> vector<64x128xf32>
    %35 = arith.addf %28, %34 : vector<64x128xf32>
    %c2_40 = arith.constant 2 : index
    %c0_41 = arith.constant 0 : index
    %c0_42 = arith.constant 0 : index
    %c1_43 = arith.constant 1 : index
    %c0_44 = arith.constant 0 : index
    %36 = vector.load %arg1[%c2_40, %c0_41, %c0_42, %c1_43, %c0_44] : memref<4x1x9x9x128xbf16, #tpu.memory_space<vmem>>, vector<1x1x8x8x128xbf16>
    %37 = vector.shape_cast %36 : vector<1x1x8x8x128xbf16> to vector<8x8x128xbf16>
    %38 = vector.shape_cast %37 : vector<8x8x128xbf16> to vector<64x128xbf16>
    %c5 = arith.constant 5 : index
    %c0_45 = arith.constant 0 : index
    %c0_46 = arith.constant 0 : index
    %39 = vector.load %arg2[%c5, %c0_45, %c0_46] : memref<9x128x128xbf16, #tpu.memory_space<vmem>>, vector<1x128x128xbf16>
    %40 = vector.shape_cast %39 : vector<1x128x128xbf16> to vector<128x128xbf16>
    %cst_47 = arith.constant dense<0.000000e+00> : vector<64x128xf32>
    %41 = tpu.matmul %38, %40, %cst_47 {dimension_numbers = #tpu.dot_dimension_numbers<[1], [0], [0], [1], [0, 0, 1, 1], [], []>} : vector<64x128xbf16>, vector<128x128xbf16>, vector<64x128xf32> -> vector<64x128xf32>
    %42 = arith.addf %35, %41 : vector<64x128xf32>
    %c0_48 = arith.constant 0 : index
    %c0_49 = arith.constant 0 : index
    %c1_50 = arith.constant 1 : index
    %c0_51 = arith.constant 0 : index
    %c0_52 = arith.constant 0 : index
    %43 = vector.load %arg1[%c0_48, %c0_49, %c1_50, %c0_51, %c0_52] : memref<4x1x9x9x128xbf16, #tpu.memory_space<vmem>>, vector<1x1x8x8x128xbf16>
    %44 = vector.shape_cast %43 : vector<1x1x8x8x128xbf16> to vector<8x8x128xbf16>
    %45 = vector.shape_cast %44 : vector<8x8x128xbf16> to vector<64x128xbf16>
    %c6 = arith.constant 6 : index
    %c0_53 = arith.constant 0 : index
    %c0_54 = arith.constant 0 : index
    %46 = vector.load %arg2[%c6, %c0_53, %c0_54] : memref<9x128x128xbf16, #tpu.memory_space<vmem>>, vector<1x128x128xbf16>
    %47 = vector.shape_cast %46 : vector<1x128x128xbf16> to vector<128x128xbf16>
    %cst_55 = arith.constant dense<0.000000e+00> : vector<64x128xf32>
    %48 = tpu.matmul %45, %47, %cst_55 {dimension_numbers = #tpu.dot_dimension_numbers<[1], [0], [0], [1], [0, 0, 1, 1], [], []>} : vector<64x128xbf16>, vector<128x128xbf16>, vector<64x128xf32> -> vector<64x128xf32>
    %49 = arith.addf %42, %48 : vector<64x128xf32>
    %c1_56 = arith.constant 1 : index
    %c0_57 = arith.constant 0 : index
    %c1_58 = arith.constant 1 : index
    %c0_59 = arith.constant 0 : index
    %c0_60 = arith.constant 0 : index
    %50 = vector.load %arg1[%c1_56, %c0_57, %c1_58, %c0_59, %c0_60] : memref<4x1x9x9x128xbf16, #tpu.memory_space<vmem>>, vector<1x1x8x8x128xbf16>
    %51 = vector.shape_cast %50 : vector<1x1x8x8x128xbf16> to vector<8x8x128xbf16>
    %52 = vector.shape_cast %51 : vector<8x8x128xbf16> to vector<64x128xbf16>
    %c7 = arith.constant 7 : index
    %c0_61 = arith.constant 0 : index
    %c0_62 = arith.constant 0 : index
    %53 = vector.load %arg2[%c7, %c0_61, %c0_62] : memref<9x128x128xbf16, #tpu.memory_space<vmem>>, vector<1x128x128xbf16>
    %54 = vector.shape_cast %53 : vector<1x128x128xbf16> to vector<128x128xbf16>
    %cst_63 = arith.constant dense<0.000000e+00> : vector<64x128xf32>
    %55 = tpu.matmul %52, %54, %cst_63 {dimension_numbers = #tpu.dot_dimension_numbers<[1], [0], [0], [1], [0, 0, 1, 1], [], []>} : vector<64x128xbf16>, vector<128x128xbf16>, vector<64x128xf32> -> vector<64x128xf32>
    %56 = arith.addf %49, %55 : vector<64x128xf32>
    %c0_64 = arith.constant 0 : index
    %c0_65 = arith.constant 0 : index
    %c1_66 = arith.constant 1 : index
    %c1_67 = arith.constant 1 : index
    %c0_68 = arith.constant 0 : index
    %57 = vector.load %arg1[%c0_64, %c0_65, %c1_66, %c1_67, %c0_68] : memref<4x1x9x9x128xbf16, #tpu.memory_space<vmem>>, vector<1x1x8x8x128xbf16>
    %58 = vector.shape_cast %57 : vector<1x1x8x8x128xbf16> to vector<8x8x128xbf16>
    %59 = vector.shape_cast %58 : vector<8x8x128xbf16> to vector<64x128xbf16>
    %c8 = arith.constant 8 : index
    %c0_69 = arith.constant 0 : index
    %c0_70 = arith.constant 0 : index
    %60 = vector.load %arg2[%c8, %c0_69, %c0_70] : memref<9x128x128xbf16, #tpu.memory_space<vmem>>, vector<1x128x128xbf16>
    %61 = vector.shape_cast %60 : vector<1x128x128xbf16> to vector<128x128xbf16>
    %cst_71 = arith.constant dense<0.000000e+00> : vector<64x128xf32>
    %62 = tpu.matmul %59, %61, %cst_71 {dimension_numbers = #tpu.dot_dimension_numbers<[1], [0], [0], [1], [0, 0, 1, 1], [], []>} : vector<64x128xbf16>, vector<128x128xbf16>, vector<64x128xf32> -> vector<64x128xf32>
    %63 = arith.addf %56, %62 : vector<64x128xf32>
    %c0_72 = arith.constant 0 : index
    %c0_73 = arith.constant 0 : index
    %64 = vector.load %arg3[%c0_72, %c0_73] : memref<1x128xf32, #tpu.memory_space<vmem>>, vector<1x128xf32>
    %65 = vector.broadcast %64 : vector<1x128xf32> to vector<64x128xf32>
    %66 = arith.addf %63, %65 : vector<64x128xf32>
    %cst_74 = arith.constant 0.000000e+00 : f32
    %67 = vector.broadcast %cst_74 : f32 to vector<64x128xf32>
    %68 = arith.maximumf %66, %67 : vector<64x128xf32>
    %69 = arith.truncf %68 : vector<64x128xf32> to vector<64x128xbf16>
    %c0_75 = arith.constant 0 : index
    %c0_76 = arith.constant 0 : index
    %70 = vector.load %arg4[%c0_75, %c0_76] : memref<128x256xbf16, #tpu.memory_space<vmem>>, vector<128x256xbf16>
    %cst_77 = arith.constant dense<0.000000e+00> : vector<64x256xf32>
    %71 = tpu.matmul %69, %70, %cst_77 {dimension_numbers = #tpu.dot_dimension_numbers<[1], [0], [0], [1], [0, 0, 1, 1], [], []>} : vector<64x128xbf16>, vector<128x256xbf16>, vector<64x256xf32> -> vector<64x256xf32>
    %c0_78 = arith.constant 0 : index
    %c0_79 = arith.constant 0 : index
    %72 = vector.load %arg5[%c0_78, %c0_79] : memref<1x256xf32, #tpu.memory_space<vmem>>, vector<1x256xf32>
    %73 = vector.broadcast %72 : vector<1x256xf32> to vector<64x256xf32>
    %74 = arith.addf %71, %73 : vector<64x256xf32>
    %c0_80 = arith.constant 0 : index
    %c0_81 = arith.constant 0 : index
    %75 = vector.load %arg6[%c0_80, %c0_81] : memref<64x64xbf16, #tpu.memory_space<vmem>>, vector<64x64xbf16>
    %c0_82 = arith.constant 0 : index
    %c0_83 = arith.constant 0 : index
    %76 = vector.load %arg7[%c0_82, %c0_83] : memref<64x256xbf16, #tpu.memory_space<vmem>>, vector<64x256xbf16>
    %cst_84 = arith.constant dense<0.000000e+00> : vector<64x256xf32>
    %77 = tpu.matmul %75, %76, %cst_84 {dimension_numbers = #tpu.dot_dimension_numbers<[1], [0], [0], [1], [0, 0, 1, 1], [], []>} : vector<64x64xbf16>, vector<64x256xbf16>, vector<64x256xf32> -> vector<64x256xf32>
    %c0_85 = arith.constant 0 : index
    %c0_86 = arith.constant 0 : index
    %78 = vector.load %arg8[%c0_85, %c0_86] : memref<1x256xf32, #tpu.memory_space<vmem>>, vector<1x256xf32>
    %79 = vector.broadcast %78 : vector<1x256xf32> to vector<64x256xf32>
    %80 = arith.addf %77, %79 : vector<64x256xf32>
    %81 = arith.addf %74, %80 : vector<64x256xf32>
    %cst_87 = arith.constant 0.000000e+00 : f32
    %82 = vector.broadcast %cst_87 : f32 to vector<64x256xf32>
    %83 = arith.maximumf %81, %82 : vector<64x256xf32>
    %c0_88 = arith.constant 0 : index
    %c0_89 = arith.constant 0 : index
    %84 = vector.load %arg9[%c0_88, %c0_89] : memref<64x256xf32, #tpu.memory_space<vmem>>, vector<64x256xf32>
    tpu.vector_store %arg9[%c0_88, %c0_89], %83 {strides = array<i32>} : memref<64x256xf32, #tpu.memory_space<vmem>>, vector<64x256xf32>,
    return
  }
  func.func @transform_0(%arg0: i32) -> (i32, i32, i32, i32, i32) {
    %c0_i32 = arith.constant 0 : i32
    %c0_i32_0 = arith.constant 0 : i32
    %c0_i32_1 = arith.constant 0 : i32
    %c0_i32_2 = arith.constant 0 : i32
    %c0_i32_3 = arith.constant 0 : i32
    return %c0_i32, %arg0, %c0_i32_0, %c0_i32_1, %c0_i32_2 : i32, i32, i32, i32, i32
  }
  func.func @transform_1(%arg0: i32) -> (i32, i32, i32) {
    %c0_i32 = arith.constant 0 : i32
    %c0_i32_0 = arith.constant 0 : i32
    %c0_i32_1 = arith.constant 0 : i32
    %c0_i32_2 = arith.constant 0 : i32
    return %c0_i32, %c0_i32_0, %c0_i32_1 : i32, i32, i32
  }
  func.func @transform_2(%arg0: i32) -> (i32, i32) {
    %c0_i32 = arith.constant 0 : i32
    %c0_i32_0 = arith.constant 0 : i32
    %c0_i32_1 = arith.constant 0 : i32
    return %c0_i32, %c0_i32_0 : i32, i32
  }
  func.func @transform_3(%arg0: i32) -> (i32, i32) {
    %c0_i32 = arith.constant 0 : i32
    %c0_i32_0 = arith.constant 0 : i32
    %c0_i32_1 = arith.constant 0 : i32
    return %c0_i32, %c0_i32_0 : i32, i32
  }
  func.func @transform_4(%arg0: i32) -> (i32, i32) {
    %c0_i32 = arith.constant 0 : i32
    %c0_i32_0 = arith.constant 0 : i32
    %c0_i32_1 = arith.constant 0 : i32
    return %c0_i32, %c0_i32_0 : i32, i32
  }
  func.func @transform_5(%arg0: i32) -> (i32, i32) {
    %c0_i32 = arith.constant 0 : i32
    %c0_i32_0 = arith.constant 0 : i32
    return %arg0, %c0_i32 : i32, i32
  }
  func.func @transform_6(%arg0: i32) -> (i32, i32) {
    %c0_i32 = arith.constant 0 : i32
    %c0_i32_0 = arith.constant 0 : i32
    %c0_i32_1 = arith.constant 0 : i32
    return %c0_i32, %c0_i32_0 : i32, i32
  }
  func.func @transform_7(%arg0: i32) -> (i32, i32) {
    %c0_i32 = arith.constant 0 : i32
    %c0_i32_0 = arith.constant 0 : i32
    %c0_i32_1 = arith.constant 0 : i32
    return %c0_i32, %c0_i32_0 : i32, i32
  }
  func.func @transform_8(%arg0: i32) -> (i32, i32) {
    %c0_i32 = arith.constant 0 : i32
    %c0_i32_0 = arith.constant 0 : i32
    return %arg0, %c0_i32 : i32, i32
  }
}

module attributes {stable_mosaic.version = 11 : i64} {
  func.func @_mm_bias_act_kernel(%arg0: i32, %arg1: memref<128x256xbf16, #tpu.memory_space<vmem>>, %arg2: memref<256x128xbf16, #tpu.memory_space<vmem>>, %arg3: memref<1x128xf32, #tpu.memory_space<vmem>>, %arg4: memref<128x128xbf16, #tpu.memory_space<vmem>>) attributes {dimension_semantics = [#tpu.dimension_semantics<parallel>], iteration_bounds = array<i64: 1>, scalar_prefetch = 0 : i64, scratch_operands = 0 : i64, tpu.core_type = #tpu.core_type<tc>, window_params = [{transform_indices = @transform_0, window_bounds = array<i64: 128, 256>}, {pipeline_mode = #tpu.pipeline_mode<synchronous>, transform_indices = @transform_1, window_bounds = array<i64: 256, 128>}, {pipeline_mode = #tpu.pipeline_mode<synchronous>, transform_indices = @transform_2, window_bounds = array<i64: 1, 128>}, {transform_indices = @transform_3, window_bounds = array<i64: 128, 128>}]} {
    %c0 = arith.constant 0 : index
    %c0_0 = arith.constant 0 : index
    %0 = vector.load %arg1[%c0, %c0_0] : memref<128x256xbf16, #tpu.memory_space<vmem>>, vector<128x256xbf16>
    %c0_1 = arith.constant 0 : index
    %c0_2 = arith.constant 0 : index
    %1 = vector.load %arg2[%c0_1, %c0_2] : memref<256x128xbf16, #tpu.memory_space<vmem>>, vector<256x128xbf16>
    %cst = arith.constant dense<0.000000e+00> : vector<128x128xf32>
    %2 = tpu.matmul %0, %1, %cst {dimension_numbers = #tpu.dot_dimension_numbers<[1], [0], [0], [1], [0, 0, 1, 1], [], []>} : vector<128x256xbf16>, vector<256x128xbf16>, vector<128x128xf32> -> vector<128x128xf32>
    %c0_3 = arith.constant 0 : index
    %c0_4 = arith.constant 0 : index
    %3 = vector.load %arg3[%c0_3, %c0_4] : memref<1x128xf32, #tpu.memory_space<vmem>>, vector<1x128xf32>
    %4 = vector.broadcast %3 : vector<1x128xf32> to vector<128x128xf32>
    %5 = arith.addf %2, %4 : vector<128x128xf32>
    %cst_5 = arith.constant 0.000000e+00 : f32
    %6 = vector.broadcast %cst_5 : f32 to vector<128x128xf32>
    %7 = arith.maximumf %5, %6 : vector<128x128xf32>
    %8 = arith.truncf %7 : vector<128x128xf32> to vector<128x128xbf16>
    %c0_6 = arith.constant 0 : index
    %c0_7 = arith.constant 0 : index
    %9 = vector.load %arg4[%c0_6, %c0_7] : memref<128x128xbf16, #tpu.memory_space<vmem>>, vector<128x128xbf16>
    tpu.vector_store %arg4[%c0_6, %c0_7], %8 {strides = array<i32>} : memref<128x128xbf16, #tpu.memory_space<vmem>>, vector<128x128xbf16>,
    return
  }
  func.func @transform_0(%arg0: i32) -> (i32, i32) {
    %c0_i32 = arith.constant 0 : i32
    %c0_i32_0 = arith.constant 0 : i32
    return %arg0, %c0_i32 : i32, i32
  }
  func.func @transform_1(%arg0: i32) -> (i32, i32) {
    %c0_i32 = arith.constant 0 : i32
    %c0_i32_0 = arith.constant 0 : i32
    %c0_i32_1 = arith.constant 0 : i32
    return %c0_i32, %c0_i32_0 : i32, i32
  }
  func.func @transform_2(%arg0: i32) -> (i32, i32) {
    %c0_i32 = arith.constant 0 : i32
    %c0_i32_0 = arith.constant 0 : i32
    %c0_i32_1 = arith.constant 0 : i32
    return %c0_i32, %c0_i32_0 : i32, i32
  }
  func.func @transform_3(%arg0: i32) -> (i32, i32) {
    %c0_i32 = arith.constant 0 : i32
    %c0_i32_0 = arith.constant 0 : i32
    return %arg0, %c0_i32 : i32, i32
  }
}

module attributes {stable_mosaic.version = 11 : i64} {
  func.func @_tail_kernel(%arg0: i32, %arg1: memref<1x1x10x10x128xbf16, #tpu.memory_space<vmem>>, %arg2: memref<9x128x128xbf16, #tpu.memory_space<vmem>>, %arg3: memref<1x128xf32, #tpu.memory_space<vmem>>, %arg4: memref<128x256xbf16, #tpu.memory_space<vmem>>, %arg5: memref<1x256xf32, #tpu.memory_space<vmem>>, %arg6: memref<64x256xf32, #tpu.memory_space<vmem>>, %arg7: memref<64x256xf32, #tpu.memory_space<vmem>>) attributes {dimension_semantics = [#tpu.dimension_semantics<parallel>], iteration_bounds = array<i64: 2>, scalar_prefetch = 0 : i64, scratch_operands = 0 : i64, tpu.core_type = #tpu.core_type<tc>, window_params = [{transform_indices = @transform_0, window_bounds = array<i64: 1, 1, 10, 10, 128>}, {pipeline_mode = #tpu.pipeline_mode<synchronous>, transform_indices = @transform_1, window_bounds = array<i64: 9, 128, 128>}, {pipeline_mode = #tpu.pipeline_mode<synchronous>, transform_indices = @transform_2, window_bounds = array<i64: 1, 128>}, {pipeline_mode = #tpu.pipeline_mode<synchronous>, transform_indices = @transform_3, window_bounds = array<i64: 128, 256>}, {pipeline_mode = #tpu.pipeline_mode<synchronous>, transform_indices = @transform_4, window_bounds = array<i64: 1, 256>}, {transform_indices = @transform_5, window_bounds = array<i64: 64, 256>}, {transform_indices = @transform_6, window_bounds = array<i64: 64, 256>}]} {
    %cst = arith.constant 0.000000e+00 : f32
    %0 = vector.broadcast %cst : f32 to vector<64x128xf32>
    %c0 = arith.constant 0 : index
    %c0_0 = arith.constant 0 : index
    %c0_1 = arith.constant 0 : index
    %c0_2 = arith.constant 0 : index
    %c0_3 = arith.constant 0 : index
    %1 = vector.load %arg1[%c0, %c0_0, %c0_1, %c0_2, %c0_3] : memref<1x1x10x10x128xbf16, #tpu.memory_space<vmem>>, vector<1x1x8x8x128xbf16>
    %2 = vector.shape_cast %1 : vector<1x1x8x8x128xbf16> to vector<8x8x128xbf16>
    %3 = vector.shape_cast %2 : vector<8x8x128xbf16> to vector<64x128xbf16>
    %c0_4 = arith.constant 0 : index
    %c0_5 = arith.constant 0 : index
    %c0_6 = arith.constant 0 : index
    %4 = vector.load %arg2[%c0_4, %c0_5, %c0_6] : memref<9x128x128xbf16, #tpu.memory_space<vmem>>, vector<1x128x128xbf16>
    %5 = vector.shape_cast %4 : vector<1x128x128xbf16> to vector<128x128xbf16>
    %cst_7 = arith.constant dense<0.000000e+00> : vector<64x128xf32>
    %6 = tpu.matmul %3, %5, %cst_7 {dimension_numbers = #tpu.dot_dimension_numbers<[1], [0], [0], [1], [0, 0, 1, 1], [], []>} : vector<64x128xbf16>, vector<128x128xbf16>, vector<64x128xf32> -> vector<64x128xf32>
    %7 = arith.addf %0, %6 : vector<64x128xf32>
    %c0_8 = arith.constant 0 : index
    %c0_9 = arith.constant 0 : index
    %c0_10 = arith.constant 0 : index
    %c1 = arith.constant 1 : index
    %c0_11 = arith.constant 0 : index
    %8 = vector.load %arg1[%c0_8, %c0_9, %c0_10, %c1, %c0_11] : memref<1x1x10x10x128xbf16, #tpu.memory_space<vmem>>, vector<1x1x8x8x128xbf16>
    %9 = vector.shape_cast %8 : vector<1x1x8x8x128xbf16> to vector<8x8x128xbf16>
    %10 = vector.shape_cast %9 : vector<8x8x128xbf16> to vector<64x128xbf16>
    %c1_12 = arith.constant 1 : index
    %c0_13 = arith.constant 0 : index
    %c0_14 = arith.constant 0 : index
    %11 = vector.load %arg2[%c1_12, %c0_13, %c0_14] : memref<9x128x128xbf16, #tpu.memory_space<vmem>>, vector<1x128x128xbf16>
    %12 = vector.shape_cast %11 : vector<1x128x128xbf16> to vector<128x128xbf16>
    %cst_15 = arith.constant dense<0.000000e+00> : vector<64x128xf32>
    %13 = tpu.matmul %10, %12, %cst_15 {dimension_numbers = #tpu.dot_dimension_numbers<[1], [0], [0], [1], [0, 0, 1, 1], [], []>} : vector<64x128xbf16>, vector<128x128xbf16>, vector<64x128xf32> -> vector<64x128xf32>
    %14 = arith.addf %7, %13 : vector<64x128xf32>
    %c0_16 = arith.constant 0 : index
    %c0_17 = arith.constant 0 : index
    %c0_18 = arith.constant 0 : index
    %c2 = arith.constant 2 : index
    %c0_19 = arith.constant 0 : index
    %15 = vector.load %arg1[%c0_16, %c0_17, %c0_18, %c2, %c0_19] : memref<1x1x10x10x128xbf16, #tpu.memory_space<vmem>>, vector<1x1x8x8x128xbf16>
    %16 = vector.shape_cast %15 : vector<1x1x8x8x128xbf16> to vector<8x8x128xbf16>
    %17 = vector.shape_cast %16 : vector<8x8x128xbf16> to vector<64x128xbf16>
    %c2_20 = arith.constant 2 : index
    %c0_21 = arith.constant 0 : index
    %c0_22 = arith.constant 0 : index
    %18 = vector.load %arg2[%c2_20, %c0_21, %c0_22] : memref<9x128x128xbf16, #tpu.memory_space<vmem>>, vector<1x128x128xbf16>
    %19 = vector.shape_cast %18 : vector<1x128x128xbf16> to vector<128x128xbf16>
    %cst_23 = arith.constant dense<0.000000e+00> : vector<64x128xf32>
    %20 = tpu.matmul %17, %19, %cst_23 {dimension_numbers = #tpu.dot_dimension_numbers<[1], [0], [0], [1], [0, 0, 1, 1], [], []>} : vector<64x128xbf16>, vector<128x128xbf16>, vector<64x128xf32> -> vector<64x128xf32>
    %21 = arith.addf %14, %20 : vector<64x128xf32>
    %c0_24 = arith.constant 0 : index
    %c0_25 = arith.constant 0 : index
    %c1_26 = arith.constant 1 : index
    %c0_27 = arith.constant 0 : index
    %c0_28 = arith.constant 0 : index
    %22 = vector.load %arg1[%c0_24, %c0_25, %c1_26, %c0_27, %c0_28] : memref<1x1x10x10x128xbf16, #tpu.memory_space<vmem>>, vector<1x1x8x8x128xbf16>
    %23 = vector.shape_cast %22 : vector<1x1x8x8x128xbf16> to vector<8x8x128xbf16>
    %24 = vector.shape_cast %23 : vector<8x8x128xbf16> to vector<64x128xbf16>
    %c3 = arith.constant 3 : index
    %c0_29 = arith.constant 0 : index
    %c0_30 = arith.constant 0 : index
    %25 = vector.load %arg2[%c3, %c0_29, %c0_30] : memref<9x128x128xbf16, #tpu.memory_space<vmem>>, vector<1x128x128xbf16>
    %26 = vector.shape_cast %25 : vector<1x128x128xbf16> to vector<128x128xbf16>
    %cst_31 = arith.constant dense<0.000000e+00> : vector<64x128xf32>
    %27 = tpu.matmul %24, %26, %cst_31 {dimension_numbers = #tpu.dot_dimension_numbers<[1], [0], [0], [1], [0, 0, 1, 1], [], []>} : vector<64x128xbf16>, vector<128x128xbf16>, vector<64x128xf32> -> vector<64x128xf32>
    %28 = arith.addf %21, %27 : vector<64x128xf32>
    %c0_32 = arith.constant 0 : index
    %c0_33 = arith.constant 0 : index
    %c1_34 = arith.constant 1 : index
    %c1_35 = arith.constant 1 : index
    %c0_36 = arith.constant 0 : index
    %29 = vector.load %arg1[%c0_32, %c0_33, %c1_34, %c1_35, %c0_36] : memref<1x1x10x10x128xbf16, #tpu.memory_space<vmem>>, vector<1x1x8x8x128xbf16>
    %30 = vector.shape_cast %29 : vector<1x1x8x8x128xbf16> to vector<8x8x128xbf16>
    %31 = vector.shape_cast %30 : vector<8x8x128xbf16> to vector<64x128xbf16>
    %c4 = arith.constant 4 : index
    %c0_37 = arith.constant 0 : index
    %c0_38 = arith.constant 0 : index
    %32 = vector.load %arg2[%c4, %c0_37, %c0_38] : memref<9x128x128xbf16, #tpu.memory_space<vmem>>, vector<1x128x128xbf16>
    %33 = vector.shape_cast %32 : vector<1x128x128xbf16> to vector<128x128xbf16>
    %cst_39 = arith.constant dense<0.000000e+00> : vector<64x128xf32>
    %34 = tpu.matmul %31, %33, %cst_39 {dimension_numbers = #tpu.dot_dimension_numbers<[1], [0], [0], [1], [0, 0, 1, 1], [], []>} : vector<64x128xbf16>, vector<128x128xbf16>, vector<64x128xf32> -> vector<64x128xf32>
    %35 = arith.addf %28, %34 : vector<64x128xf32>
    %c0_40 = arith.constant 0 : index
    %c0_41 = arith.constant 0 : index
    %c1_42 = arith.constant 1 : index
    %c2_43 = arith.constant 2 : index
    %c0_44 = arith.constant 0 : index
    %36 = vector.load %arg1[%c0_40, %c0_41, %c1_42, %c2_43, %c0_44] : memref<1x1x10x10x128xbf16, #tpu.memory_space<vmem>>, vector<1x1x8x8x128xbf16>
    %37 = vector.shape_cast %36 : vector<1x1x8x8x128xbf16> to vector<8x8x128xbf16>
    %38 = vector.shape_cast %37 : vector<8x8x128xbf16> to vector<64x128xbf16>
    %c5 = arith.constant 5 : index
    %c0_45 = arith.constant 0 : index
    %c0_46 = arith.constant 0 : index
    %39 = vector.load %arg2[%c5, %c0_45, %c0_46] : memref<9x128x128xbf16, #tpu.memory_space<vmem>>, vector<1x128x128xbf16>
    %40 = vector.shape_cast %39 : vector<1x128x128xbf16> to vector<128x128xbf16>
    %cst_47 = arith.constant dense<0.000000e+00> : vector<64x128xf32>
    %41 = tpu.matmul %38, %40, %cst_47 {dimension_numbers = #tpu.dot_dimension_numbers<[1], [0], [0], [1], [0, 0, 1, 1], [], []>} : vector<64x128xbf16>, vector<128x128xbf16>, vector<64x128xf32> -> vector<64x128xf32>
    %42 = arith.addf %35, %41 : vector<64x128xf32>
    %c0_48 = arith.constant 0 : index
    %c0_49 = arith.constant 0 : index
    %c2_50 = arith.constant 2 : index
    %c0_51 = arith.constant 0 : index
    %c0_52 = arith.constant 0 : index
    %43 = vector.load %arg1[%c0_48, %c0_49, %c2_50, %c0_51, %c0_52] : memref<1x1x10x10x128xbf16, #tpu.memory_space<vmem>>, vector<1x1x8x8x128xbf16>
    %44 = vector.shape_cast %43 : vector<1x1x8x8x128xbf16> to vector<8x8x128xbf16>
    %45 = vector.shape_cast %44 : vector<8x8x128xbf16> to vector<64x128xbf16>
    %c6 = arith.constant 6 : index
    %c0_53 = arith.constant 0 : index
    %c0_54 = arith.constant 0 : index
    %46 = vector.load %arg2[%c6, %c0_53, %c0_54] : memref<9x128x128xbf16, #tpu.memory_space<vmem>>, vector<1x128x128xbf16>
    %47 = vector.shape_cast %46 : vector<1x128x128xbf16> to vector<128x128xbf16>
    %cst_55 = arith.constant dense<0.000000e+00> : vector<64x128xf32>
    %48 = tpu.matmul %45, %47, %cst_55 {dimension_numbers = #tpu.dot_dimension_numbers<[1], [0], [0], [1], [0, 0, 1, 1], [], []>} : vector<64x128xbf16>, vector<128x128xbf16>, vector<64x128xf32> -> vector<64x128xf32>
    %49 = arith.addf %42, %48 : vector<64x128xf32>
    %c0_56 = arith.constant 0 : index
    %c0_57 = arith.constant 0 : index
    %c2_58 = arith.constant 2 : index
    %c1_59 = arith.constant 1 : index
    %c0_60 = arith.constant 0 : index
    %50 = vector.load %arg1[%c0_56, %c0_57, %c2_58, %c1_59, %c0_60] : memref<1x1x10x10x128xbf16, #tpu.memory_space<vmem>>, vector<1x1x8x8x128xbf16>
    %51 = vector.shape_cast %50 : vector<1x1x8x8x128xbf16> to vector<8x8x128xbf16>
    %52 = vector.shape_cast %51 : vector<8x8x128xbf16> to vector<64x128xbf16>
    %c7 = arith.constant 7 : index
    %c0_61 = arith.constant 0 : index
    %c0_62 = arith.constant 0 : index
    %53 = vector.load %arg2[%c7, %c0_61, %c0_62] : memref<9x128x128xbf16, #tpu.memory_space<vmem>>, vector<1x128x128xbf16>
    %54 = vector.shape_cast %53 : vector<1x128x128xbf16> to vector<128x128xbf16>
    %cst_63 = arith.constant dense<0.000000e+00> : vector<64x128xf32>
    %55 = tpu.matmul %52, %54, %cst_63 {dimension_numbers = #tpu.dot_dimension_numbers<[1], [0], [0], [1], [0, 0, 1, 1], [], []>} : vector<64x128xbf16>, vector<128x128xbf16>, vector<64x128xf32> -> vector<64x128xf32>
    %56 = arith.addf %49, %55 : vector<64x128xf32>
    %c0_64 = arith.constant 0 : index
    %c0_65 = arith.constant 0 : index
    %c2_66 = arith.constant 2 : index
    %c2_67 = arith.constant 2 : index
    %c0_68 = arith.constant 0 : index
    %57 = vector.load %arg1[%c0_64, %c0_65, %c2_66, %c2_67, %c0_68] : memref<1x1x10x10x128xbf16, #tpu.memory_space<vmem>>, vector<1x1x8x8x128xbf16>
    %58 = vector.shape_cast %57 : vector<1x1x8x8x128xbf16> to vector<8x8x128xbf16>
    %59 = vector.shape_cast %58 : vector<8x8x128xbf16> to vector<64x128xbf16>
    %c8 = arith.constant 8 : index
    %c0_69 = arith.constant 0 : index
    %c0_70 = arith.constant 0 : index
    %60 = vector.load %arg2[%c8, %c0_69, %c0_70] : memref<9x128x128xbf16, #tpu.memory_space<vmem>>, vector<1x128x128xbf16>
    %61 = vector.shape_cast %60 : vector<1x128x128xbf16> to vector<128x128xbf16>
    %cst_71 = arith.constant dense<0.000000e+00> : vector<64x128xf32>
    %62 = tpu.matmul %59, %61, %cst_71 {dimension_numbers = #tpu.dot_dimension_numbers<[1], [0], [0], [1], [0, 0, 1, 1], [], []>} : vector<64x128xbf16>, vector<128x128xbf16>, vector<64x128xf32> -> vector<64x128xf32>
    %63 = arith.addf %56, %62 : vector<64x128xf32>
    %c0_72 = arith.constant 0 : index
    %c0_73 = arith.constant 0 : index
    %64 = vector.load %arg3[%c0_72, %c0_73] : memref<1x128xf32, #tpu.memory_space<vmem>>, vector<1x128xf32>
    %65 = vector.broadcast %64 : vector<1x128xf32> to vector<64x128xf32>
    %66 = arith.addf %63, %65 : vector<64x128xf32>
    %cst_74 = arith.constant 0.000000e+00 : f32
    %67 = vector.broadcast %cst_74 : f32 to vector<64x128xf32>
    %68 = arith.maximumf %66, %67 : vector<64x128xf32>
    %69 = arith.truncf %68 : vector<64x128xf32> to vector<64x128xbf16>
    %c0_75 = arith.constant 0 : index
    %c0_76 = arith.constant 0 : index
    %70 = vector.load %arg4[%c0_75, %c0_76] : memref<128x256xbf16, #tpu.memory_space<vmem>>, vector<128x256xbf16>
    %cst_77 = arith.constant dense<0.000000e+00> : vector<64x256xf32>
    %71 = tpu.matmul %69, %70, %cst_77 {dimension_numbers = #tpu.dot_dimension_numbers<[1], [0], [0], [1], [0, 0, 1, 1], [], []>} : vector<64x128xbf16>, vector<128x256xbf16>, vector<64x256xf32> -> vector<64x256xf32>
    %c0_78 = arith.constant 0 : index
    %c0_79 = arith.constant 0 : index
    %72 = vector.load %arg5[%c0_78, %c0_79] : memref<1x256xf32, #tpu.memory_space<vmem>>, vector<1x256xf32>
    %73 = vector.broadcast %72 : vector<1x256xf32> to vector<64x256xf32>
    %74 = arith.addf %71, %73 : vector<64x256xf32>
    %c0_80 = arith.constant 0 : index
    %c0_81 = arith.constant 0 : index
    %75 = vector.load %arg6[%c0_80, %c0_81] : memref<64x256xf32, #tpu.memory_space<vmem>>, vector<64x256xf32>
    %76 = arith.addf %74, %75 : vector<64x256xf32>
    %cst_82 = arith.constant 0.000000e+00 : f32
    %77 = vector.broadcast %cst_82 : f32 to vector<64x256xf32>
    %78 = arith.maximumf %76, %77 : vector<64x256xf32>
    %c0_83 = arith.constant 0 : index
    %c0_84 = arith.constant 0 : index
    %79 = vector.load %arg7[%c0_83, %c0_84] : memref<64x256xf32, #tpu.memory_space<vmem>>, vector<64x256xf32>
    tpu.vector_store %arg7[%c0_83, %c0_84], %78 {strides = array<i32>} : memref<64x256xf32, #tpu.memory_space<vmem>>, vector<64x256xf32>,
    return
  }
  func.func @transform_0(%arg0: i32) -> (i32, i32, i32, i32, i32) {
    %c0_i32 = arith.constant 0 : i32
    %c0_i32_0 = arith.constant 0 : i32
    %c0_i32_1 = arith.constant 0 : i32
    %c0_i32_2 = arith.constant 0 : i32
    %c0_i32_3 = arith.constant 0 : i32
    return %c0_i32, %arg0, %c0_i32_0, %c0_i32_1, %c0_i32_2 : i32, i32, i32, i32, i32
  }
  func.func @transform_1(%arg0: i32) -> (i32, i32, i32) {
    %c0_i32 = arith.constant 0 : i32
    %c0_i32_0 = arith.constant 0 : i32
    %c0_i32_1 = arith.constant 0 : i32
    %c0_i32_2 = arith.constant 0 : i32
    return %c0_i32, %c0_i32_0, %c0_i32_1 : i32, i32, i32
  }
  func.func @transform_2(%arg0: i32) -> (i32, i32) {
    %c0_i32 = arith.constant 0 : i32
    %c0_i32_0 = arith.constant 0 : i32
    %c0_i32_1 = arith.constant 0 : i32
    return %c0_i32, %c0_i32_0 : i32, i32
  }
  func.func @transform_3(%arg0: i32) -> (i32, i32) {
    %c0_i32 = arith.constant 0 : i32
    %c0_i32_0 = arith.constant 0 : i32
    %c0_i32_1 = arith.constant 0 : i32
    return %c0_i32, %c0_i32_0 : i32, i32
  }
  func.func @transform_4(%arg0: i32) -> (i32, i32) {
    %c0_i32 = arith.constant 0 : i32
    %c0_i32_0 = arith.constant 0 : i32
    %c0_i32_1 = arith.constant 0 : i32
    return %c0_i32, %c0_i32_0 : i32, i32
  }
  func.func @transform_5(%arg0: i32) -> (i32, i32) {
    %c0_i32 = arith.constant 0 : i32
    %c0_i32_0 = arith.constant 0 : i32
    return %arg0, %c0_i32 : i32, i32
  }
  func.func @transform_6(%arg0: i32) -> (i32, i32) {
    %c0_i32 = arith.constant 0 : i32
    %c0_i32_0 = arith.constant 0 : i32
    return %arg0, %c0_i32 : i32, i32
  }
}

</mosaic_0001>

<bundles_post_ra>
// kernel: run.4
= control target key start
LH: loop header
LB: loop body
LE: loop exit
PB: predicated region body
PF: predicated region fallthrough
CT: control target
= control target key end

     0   :  { %s884_s12 = smov 0   ;;  %s1009_s0 = inlined_call_operand.vmem [shape: bf16[512,64], index: 0, kind: input, shape index: {}]   ;;  %s1010_s1 = inlined_call_operand.vmem [shape: bf16[64,128], index: 1, kind: input, shape index: {}]   ;;  %s1011_s2 = inlined_call_operand.vmem [shape: f32[1,128], index: 2, kind: input, shape index: {}]   ;;  %s1012_s3 = inlined_call_operand.vmem [shape: bf16[512,128], index: 3, kind: output, shape index: {}]  }
   0x1 LB: > { %s613_s13 = sadd.s32 4294967295, %s862_s12   ;;  %p617_p0 = scmp.ge.s32.totalorder %s862_s12, 1  ;;  %s862_s12 = sphi %s884_s12, %s13_s12  }
   0x2   : > { %p138_p1 = scmp.lt.s32.totalorder %s862_s12, 3 }
   0x4   : > { %p139_p2 = pnand %p617_p0, %p138_p1 }
   0x5   : > { %s618_s16 = sshll.u32 (!%p139_p2), %s613_s13, 5 }
   0x6   : > { %142 = sbr.rel (%p139_p2) target bundleno = 224 (0xe0), region = 32  ;;  %p163_p3 = scmp.lt.s32.totalorder (!%p139_p2), %s618_s16, 63 }
   0xb   : > { %v739_v0 = vld [vmem:[%s1010_s1 + $0x18] sm:$0xff]  ;;  %v738_v1 = vld [vmem:[%s1010_s1 + $0x10] sm:$0xff]  ;;  %s1014_s16 = smov (!%p163_p3, %s618_s16), 63  ;;  %v737_v2 = vld [vmem:[%s1010_s1 + $0x8] sm:$0xff]  ;;  %vm323_vm0 = vcmask 523264  }
   0xc   : > { %376 = vmatpush.bf16.msra.mxu0 %v739_v0  ;;  %835 = vmatpush.bf16.msra.mxu1 %v739_v0  ;;  %s619_s21 = sshll.u32 %s1014_s16, 2  ;;  %v736_v3 = vld [vmem:[%s1010_s1] sm:$0xff] }
   0xd   : > { %836 = vmatpush.bf16.msra.mxu2 %v739_v0  ;;  %837 = vmatpush.bf16.msra.mxu3 %v739_v0  ;;  %s912_s26 = scalar_lea.vmem %s1009_s0, %s619_s21  ;;  %v949_v22 = vld [vmem:[%s1011_s2] ss:$0 sm:$0xff]  ;;  %s960_s4 = scalar_lea.vmem %s1012_s3, %s619_s21 }
   0xe   : > { %v720_v4 = vld [vmem:[%s912_s26] sm:$0xff]  ;;  %v721_v8 = vld [vmem:[%s912_s26 + $0x8] sm:$0xff]  ;;  %v722_v12 = vld [vmem:[%s912_s26 + $0x10] sm:$0xff] }
   0xf   : > { %v724_v5 = vld [vmem:[%s912_s26 + $0x20] sm:$0xff]  ;;  %v725_v9 = vld [vmem:[%s912_s26 + $0x28] sm:$0xff]  ;;  %v726_v13 = vld [vmem:[%s912_s26 + $0x30] sm:$0xff] }
  0x10   : > { %377 = vmatpush.bf16.msra.mxu0 %v738_v1  ;;  %838 = vmatpush.bf16.msra.mxu1 %v738_v1  ;;  %v728_v6 = vld [vmem:[%s912_s26 + $0x40] sm:$0xff]  ;;  %v729_v10 = vld [vmem:[%s912_s26 + $0x48] sm:$0xff]  ;;  %v730_v14 = vld [vmem:[%s912_s26 + $0x50] sm:$0xff] }
  0x11   : > { %839 = vmatpush.bf16.msra.mxu2 %v738_v1  ;;  %840 = vmatpush.bf16.msra.mxu3 %v738_v1  ;;  %v732_v7 = vld [vmem:[%s912_s26 + $0x60] sm:$0xff]  ;;  %v733_v11 = vld [vmem:[%s912_s26 + $0x68] sm:$0xff]  ;;  %v734_v15 = vld [vmem:[%s912_s26 + $0x70] sm:$0xff] }
  0x12   : > { %v723_v16 = vld [vmem:[%s912_s26 + $0x18] sm:$0xff] }
  0x13   : > { %v727_v17 = vld [vmem:[%s912_s26 + $0x38] sm:$0xff] }
  0x14   : > { %378 = vmatpush.bf16.msra.mxu0 %v737_v2  ;;  %841 = vmatpush.bf16.msra.mxu1 %v737_v2  ;;  %v731_v18 = vld [vmem:[%s912_s26 + $0x58] sm:$0xff] }
  0x15   : > { %842 = vmatpush.bf16.msra.mxu2 %v737_v2  ;;  %843 = vmatpush.bf16.msra.mxu3 %v737_v2  ;;  %v735_v19 = vld [vmem:[%s912_s26 + $0x78] sm:$0xff] }
  0x18   : > { %379 = vmatpush.bf16.msra.mxu0 %v736_v3  ;;  %844 = vmatpush.bf16.msra.mxu1 %v736_v3 }
  0x19   : > { %845 = vmatpush.bf16.msra.mxu2 %v736_v3  ;;  %846 = vmatpush.bf16.msra.mxu3 %v736_v3 }
  0x1b   : > { %702 = vmatmul.msk.bf16.vlgmr.msra.gmra.mxu0 %vm323_vm0, %v720_v4  ;;  %706 = vmatmul.msk.bf16.vlgmr.msra.gmra.mxu1 %vm323_vm0, %v724_v5 }
  0x1c   : > { %710 = vmatmul.msk.bf16.vlgmr.msra.gmra.mxu2 %vm323_vm0, %v728_v6  ;;  %714 = vmatmul.msk.bf16.vlgmr.msra.gmra.mxu3 %vm323_vm0, %v732_v7 }
  0x2b   : > { %703 = vmatmul.msk.bf16.gmra.mxu0 %vm323_vm0, %v721_v8  ;;  %707 = vmatmul.msk.bf16.gmra.mxu1 %vm323_vm0, %v725_v9 }
  0x2c   : > { %711 = vmatmul.msk.bf16.gmra.mxu2 %vm323_vm0, %v729_v10  ;;  %715 = vmatmul.msk.bf16.gmra.mxu3 %vm323_vm0, %v733_v11 }
  0x3b   : > { %704 = vmatmul.msk.bf16.gmra.mxu0 %vm323_vm0, %v722_v12  ;;  %708 = vmatmul.msk.bf16.gmra.mxu1 %vm323_vm0, %v726_v13 }
  0x3c   : > { %712 = vmatmul.msk.bf16.gmra.mxu2 %vm323_vm0, %v730_v14  ;;  %716 = vmatmul.msk.bf16.gmra.mxu3 %vm323_vm0, %v734_v15 }
  0x4b   : > { %705 = vmatmul.msk.bf16.gmra.mxu0 %vm323_vm0, %v723_v16  ;;  %709 = vmatmul.msk.bf16.gmra.mxu1 %vm323_vm0, %v727_v17 }
  0x4c   : > { %713 = vmatmul.msk.bf16.gmra.mxu2 %vm323_vm0, %v731_v18  ;;  %717 = vmatmul.msk.bf16.gmra.mxu3 %vm323_vm0, %v735_v19 }
  0x98   : > { %v381_v20 = vpop.f32.mrf.mxu0  ;;  %v401_v21 = vpop.f32.mrf.mxu1 }
  0x99   : > { %v382_v23 = vadd.f32 %v949_v22, %v381_v20  ;;  %v402_v24 = vadd.f32 %v949_v22, %v401_v21 }
  0x9b   : > { %v461_v31 = vmax.f32 %v382_v23, 0.0  ;;  %v469_v32 = vmax.f32 %v402_v24, 0.0 }
  0x9f   : > { %v421_v25 = vpop.f32.mrf.mxu2  ;;  %v441_v26 = vpop.f32.mrf.mxu3 }
  0xa0   : > { %v383_v27 = vpop.f32.mrf.mxu0  ;;  %v403_v28 = vpop.f32.mrf.mxu1  ;;  %v422_v37 = vadd.f32 %v949_v22, %v421_v25  ;;  %v442_v38 = vadd.f32 %v949_v22, %v441_v26 }
  0xa1   : > { %v384_v29 = vadd.f32 %v949_v22, %v383_v27  ;;  %v404_v30 = vadd.f32 %v949_v22, %v403_v28 }
  0xa2   : > { %v477_v45 = vmax.f32 %v422_v37, 0.0  ;;  %v485_v46 = vmax.f32 %v442_v38, 0.0 }
  0xa3   : > { %v462_v33 = vmax.f32 %v384_v29, 0.0  ;;  %v470_v34 = vmax.f32 %v404_v30, 0.0 }
  0xa5   : > { %v743_v35 = vpack.c.bf16 %v462_v33, %v461_v31  ;;  %v763_v36 = vpack.c.bf16 %v470_v34, %v469_v32 }
  0xa7   : > { %744 = vst [vmem:[%s960_s4] sm:$0xff] %v743_v35   ;;  %v423_v39 = vpop.f32.mrf.mxu2  ;;  %v443_v40 = vpop.f32.mrf.mxu3 }
  0xa8   : > { %823 = vst [vmem:[%s960_s4 + $0x20] sm:$0xff] %v763_v36   ;;  %v424_v41 = vadd.f32 %v949_v22, %v423_v39  ;;  %v444_v42 = vadd.f32 %v949_v22, %v443_v40  ;;  %v386_v43 = vpop.f32.mrf.mxu0  ;;  %v406_v44 = vpop.f32.mrf.mxu1 }
  0xa9   : > { %v387_v51 = vadd.f32 %v949_v22, %v386_v43  ;;  %v407_v52 = vadd.f32 %v949_v22, %v406_v44 }
  0xaa   : > { %v478_v47 = vmax.f32 %v424_v41, 0.0  ;;  %v486_v48 = vmax.f32 %v444_v42, 0.0 }
  0xab   : > { %v463_v59 = vmax.f32 %v387_v51, 0.0  ;;  %v471_v60 = vmax.f32 %v407_v52, 0.0 }
  0xac   : > { %v783_v49 = vpack.c.bf16 %v478_v47, %v477_v45  ;;  %v803_v50 = vpack.c.bf16 %v486_v48, %v485_v46 }
  0xae   : > { %827 = vst [vmem:[%s960_s4 + $0x40] sm:$0xff] %v783_v49  }
  0xaf   : > { %831 = vst [vmem:[%s960_s4 + $0x60] sm:$0xff] %v803_v50   ;;  %v426_v53 = vpop.f32.mrf.mxu2  ;;  %v446_v54 = vpop.f32.mrf.mxu3 }
  0xb0   : > { %v388_v55 = vpop.f32.mrf.mxu0  ;;  %v408_v56 = vpop.f32.mrf.mxu1  ;;  %v427_v1 = vadd.f32 %v949_v22, %v426_v53  ;;  %v447_v2 = vadd.f32 %v949_v22, %v446_v54 }
  0xb1   : > { %v389_v57 = vadd.f32 %v949_v22, %v388_v55  ;;  %v409_v58 = vadd.f32 %v949_v22, %v408_v56 }
  0xb2   : > { %v479_v9 = vmax.f32 %v427_v1, 0.0  ;;  %v487_v10 = vmax.f32 %v447_v2, 0.0 }
  0xb3   : > { %v464_v61 = vmax.f32 %v389_v57, 0.0  ;;  %v472_v62 = vmax.f32 %v409_v58, 0.0 }
  0xb5   : > { %v748_v63 = vpack.c.bf16 %v464_v61, %v463_v59  ;;  %v768_v0 = vpack.c.bf16 %v472_v62, %v471_v60 }
  0xb7   : > { %820 = vst [vmem:[%s960_s4 + $0x8] sm:$0xff] %v748_v63   ;;  %v428_v3 = vpop.f32.mrf.mxu2  ;;  %v448_v4 = vpop.f32.mrf.mxu3 }
  0xb8   : > { %824 = vst [vmem:[%s960_s4 + $0x28] sm:$0xff] %v768_v0   ;;  %v429_v5 = vadd.f32 %v949_v22, %v428_v3  ;;  %v449_v6 = vadd.f32 %v949_v22, %v448_v4  ;;  %v391_v7 = vpop.f32.mrf.mxu0  ;;  %v411_v8 = vpop.f32.mrf.mxu1 }
  0xb9   : > { %v392_v15 = vadd.f32 %v949_v22, %v391_v7  ;;  %v412_v16 = vadd.f32 %v949_v22, %v411_v8 }
  0xba   : > { %v480_v11 = vmax.f32 %v429_v5, 0.0  ;;  %v488_v12 = vmax.f32 %v449_v6, 0.0 }
  0xbb   : > { %v465_v24 = vmax.f32 %v392_v15, 0.0  ;;  %v473_v25 = vmax.f32 %v412_v16, 0.0 }
  0xbc   : > { %v788_v13 = vpack.c.bf16 %v480_v11, %v479_v9  ;;  %v808_v14 = vpack.c.bf16 %v488_v12, %v487_v10 }
  0xbe   : > { %828 = vst [vmem:[%s960_s4 + $0x48] sm:$0xff] %v788_v13  }
  0xbf   : > { %832 = vst [vmem:[%s960_s4 + $0x68] sm:$0xff] %v808_v14   ;;  %v431_v17 = vpop.f32.mrf.mxu2  ;;  %v451_v18 = vpop.f32.mrf.mxu3 }
  0xc0   : > { %v393_v19 = vpop.f32.mrf.mxu0  ;;  %v413_v20 = vpop.f32.mrf.mxu1  ;;  %v432_v30 = vadd.f32 %v949_v22, %v431_v17  ;;  %v452_v31 = vadd.f32 %v949_v22, %v451_v18 }
  0xc1   : > { %v394_v21 = vadd.f32 %v949_v22, %v393_v19  ;;  %v414_v23 = vadd.f32 %v949_v22, %v413_v20 }
  0xc2   : > { %v481_v38 = vmax.f32 %v432_v30, 0.0  ;;  %v489_v39 = vmax.f32 %v452_v31, 0.0 }
  0xc3   : > { %v466_v26 = vmax.f32 %v394_v21, 0.0  ;;  %v474_v27 = vmax.f32 %v414_v23, 0.0 }
  0xc5   : > { %v753_v28 = vpack.c.bf16 %v466_v26, %v465_v24  ;;  %v773_v29 = vpack.c.bf16 %v474_v27, %v473_v25 }
  0xc7   : > { %821 = vst [vmem:[%s960_s4 + $0x10] sm:$0xff] %v753_v28   ;;  %v433_v32 = vpop.f32.mrf.mxu2  ;;  %v453_v33 = vpop.f32.mrf.mxu3 }
  0xc8   : > { %825 = vst [vmem:[%s960_s4 + $0x30] sm:$0xff] %v773_v29   ;;  %v434_v34 = vadd.f32 %v949_v22, %v433_v32  ;;  %v454_v35 = vadd.f32 %v949_v22, %v453_v33  ;;  %v396_v36 = vpop.f32.mrf.mxu0  ;;  %v416_v37 = vpop.f32.mrf.mxu1 }
  0xc9   : > { %v397_v44 = vadd.f32 %v949_v22, %v396_v36  ;;  %v417_v45 = vadd.f32 %v949_v22, %v416_v37 }
  0xca   : > { %v482_v40 = vmax.f32 %v434_v34, 0.0  ;;  %v490_v41 = vmax.f32 %v454_v35, 0.0 }
  0xcb   : > { %v467_v52 = vmax.f32 %v397_v44, 0.0  ;;  %v475_v53 = vmax.f32 %v417_v45, 0.0 }
  0xcc   : > { %v793_v42 = vpack.c.bf16 %v482_v40, %v481_v38  ;;  %v813_v43 = vpack.c.bf16 %v490_v41, %v489_v39 }
  0xce   : > { %829 = vst [vmem:[%s960_s4 + $0x50] sm:$0xff] %v793_v42  }
  0xcf   : > { %833 = vst [vmem:[%s960_s4 + $0x70] sm:$0xff] %v813_v43   ;;  %v436_v46 = vpop.f32.mrf.mxu2  ;;  %v456_v47 = vpop.f32.mrf.mxu3 }
  0xd0   : > { %v398_v48 = vpop.f32.mrf.mxu0  ;;  %v418_v49 = vpop.f32.mrf.mxu1  ;;  %v437_v58 = vadd.f32 %v949_v22, %v436_v46  ;;  %v457_v59 = vadd.f32 %v949_v22, %v456_v47 }
  0xd1   : > { %v399_v50 = vadd.f32 %v949_v22, %v398_v48  ;;  %v419_v51 = vadd.f32 %v949_v22, %v418_v49 }
  0xd2   : > { %v483_v0 = vmax.f32 %v437_v58, 0.0  ;;  %v491_v1 = vmax.f32 %v457_v59, 0.0 }
  0xd3   : > { %v468_v54 = vmax.f32 %v399_v50, 0.0  ;;  %v476_v55 = vmax.f32 %v419_v51, 0.0 }
  0xd5   : > { %v758_v56 = vpack.c.bf16 %v468_v54, %v467_v52  ;;  %v778_v57 = vpack.c.bf16 %v476_v55, %v475_v53 }
  0xd7   : > { %822 = vst [vmem:[%s960_s4 + $0x18] sm:$0xff] %v758_v56   ;;  %v438_v60 = vpop.f32.mrf.mxu2  ;;  %v458_v61 = vpop.f32.mrf.mxu3 }
  0xd8   : > { %826 = vst [vmem:[%s960_s4 + $0x38] sm:$0xff] %v778_v57   ;;  %v439_v62 = vadd.f32 %v949_v22, %v438_v60  ;;  %v459_v63 = vadd.f32 %v949_v22, %v458_v61 }
  0xda   : > { %v484_v2 = vmax.f32 %v439_v62, 0.0  ;;  %v492_v3 = vmax.f32 %v459_v63, 0.0 }
  0xdc   : > { %v798_v4 = vpack.c.bf16 %v484_v2, %v483_v0  ;;  %v818_v5 = vpack.c.bf16 %v492_v3, %v491_v1 }
  0xde   : > { %830 = vst [vmem:[%s960_s4 + $0x58] sm:$0xff] %v798_v4  }
  0xdf   : > { %834 = vst [vmem:[%s960_s4 + $0x78] sm:$0xff] %v818_v5  }
  0xe0 PF: > { %s13_s12 = sadd.s32 1, %s862_s12  }
  0xe1   : > { %p10_p4 = scmp.ge.s32.totalorder %s13_s12, 4  }
  0xe3   :  { %12 = sbr.rel (!%p10_p4) target bundleno = 1 (0x1), region = 62 }

// kernel: run.6
= control target key start
LH: loop header
LB: loop body
LE: loop exit
PB: predicated region body
PF: predicated region fallthrough
CT: control target
= control target key end

     0   :  { %s825_s1 = inlined_call_operand.vmem [shape: bf16[256,128], index: 1, kind: input, shape index: {}]   ;;  %s826_s2 = inlined_call_operand.vmem [shape: f32[1,128], index: 2, kind: input, shape index: {}]   ;;  %s827_s0 = inlined_call_operand.vmem [shape: bf16[128,256], index: 0, kind: input, shape index: {}]   ;;  %s828_s3 = inlined_call_operand.vmem [shape: bf16[128,128], index: 3, kind: output, shape index: {}]  }
   0x1   :  { %v543_v0 = vld [vmem:[%s825_s1 + $0x38] sm:$0xff]  ;;  %v542_v2 = vld [vmem:[%s825_s1 + $0x30] sm:$0xff]  ;;  %v541_v4 = vld [vmem:[%s825_s1 + $0x28] sm:$0xff] }
   0x2   :  { %v551_v1 = vld [vmem:[%s825_s1 + $0x78] sm:$0xff]  ;;  %242 = vmatpush.bf16.msra.mxu0 %v543_v0  ;;  %599 = vmatpush.bf16.msra.mxu2 %v543_v0  ;;  %v550_v3 = vld [vmem:[%s825_s1 + $0x70] sm:$0xff]  ;;  %v549_v5 = vld [vmem:[%s825_s1 + $0x68] sm:$0xff] }
   0x3   :  { %291 = vmatpush.bf16.msra.mxu1 %v551_v1  ;;  %607 = vmatpush.bf16.msra.mxu3 %v551_v1  ;;  %v540_v6 = vld [vmem:[%s825_s1 + $0x20] sm:$0xff]  ;;  %v539_v8 = vld [vmem:[%s825_s1 + $0x18] sm:$0xff]  ;;  %v538_v10 = vld [vmem:[%s825_s1 + $0x10] sm:$0xff] }
   0x4   :  { %v548_v7 = vld [vmem:[%s825_s1 + $0x60] sm:$0xff]  ;;  %v547_v9 = vld [vmem:[%s825_s1 + $0x58] sm:$0xff]  ;;  %v546_v11 = vld [vmem:[%s825_s1 + $0x50] sm:$0xff] }
   0x5   :  { %v537_v12 = vld [vmem:[%s825_s1 + $0x8] sm:$0xff]  ;;  %v536_v14 = vld [vmem:[%s825_s1] sm:$0xff]  ;;  %v402_v28 = vld [vmem:[%s827_s0 + $0x10] sm:$0xf] }
   0x6   :  { %243 = vmatpush.bf16.msra.mxu0 %v542_v2  ;;  %600 = vmatpush.bf16.msra.mxu2 %v542_v2  ;;  %v545_v13 = vld [vmem:[%s825_s1 + $0x48] sm:$0xff]  ;;  %v544_v15 = vld [vmem:[%s825_s1 + $0x40] sm:$0xff]  ;;  %v523_v29 = vld [vmem:[%s827_s0 + $0x14] sm:$0xf0] }
   0x7   :  { %292 = vmatpush.bf16.msra.mxu1 %v550_v3  ;;  %608 = vmatpush.bf16.msra.mxu3 %v550_v3  ;;  %v394_v16 = vld [vmem:[%s827_s0] sm:$0xf]  ;;  %v521_v17 = vld [vmem:[%s827_s0 + $0x4] sm:$0xf0]  ;;  %v520_v20 = vld [vmem:[%s827_s0 + $0x4] sm:$0xf]  ;;  %v403_v36 = vor.u32 %v523_v29, %v402_v28 }
   0x8   :  { %v426_v18 = vld [vmem:[%s827_s0 + $0x40] sm:$0xf]  ;;  %v529_v19 = vld [vmem:[%s827_s0 + $0x44] sm:$0xf0]  ;;  %v396_v21 = vld [vmem:[%s827_s0 + $0x8] sm:$0xf0]  ;;  %v395_v24 = vor.u32 %v521_v17, %v394_v16 }
   0x9   :  { %v528_v22 = vld [vmem:[%s827_s0 + $0x44] sm:$0xf]  ;;  %v428_v23 = vld [vmem:[%s827_s0 + $0x48] sm:$0xf0]  ;;  %v427_v25 = vor.u32 %v529_v19, %v426_v18  ;;  %v399_v26 = vor.u32 %v520_v20, %v396_v21  ;;  %v434_v30 = vld [vmem:[%s827_s0 + $0x50] sm:$0xf] }
   0xa   :  { %244 = vmatpush.bf16.msra.mxu0 %v541_v4  ;;  %601 = vmatpush.bf16.msra.mxu2 %v541_v4  ;;  %v431_v27 = vor.u32 %v528_v22, %v428_v23  ;;  %v531_v31 = vld [vmem:[%s827_s0 + $0x54] sm:$0xf0]  ;;  %v522_v32 = vld [vmem:[%s827_s0 + $0x14] sm:$0xf]  ;;  %v404_v33 = vld [vmem:[%s827_s0 + $0x18] sm:$0xf0] }
   0xb   :  { %293 = vmatpush.bf16.msra.mxu1 %v549_v5  ;;  %609 = vmatpush.bf16.msra.mxu3 %v549_v5  ;;  %v530_v34 = vld [vmem:[%s827_s0 + $0x54] sm:$0xf]  ;;  %v436_v35 = vld [vmem:[%s827_s0 + $0x58] sm:$0xf0]  ;;  %v435_v37 = vor.u32 %v531_v31, %v434_v30  ;;  %v407_v38 = vor.u32 %v522_v32, %v404_v33  ;;  %v410_v40 = vld [vmem:[%s827_s0 + $0x20] sm:$0xf] }
   0xc   :  { %v439_v39 = vor.u32 %v530_v34, %v436_v35  ;;  %v525_v41 = vld [vmem:[%s827_s0 + $0x24] sm:$0xf0]  ;;  %v442_v42 = vld [vmem:[%s827_s0 + $0x60] sm:$0xf]  ;;  %v524_v44 = vld [vmem:[%s827_s0 + $0x24] sm:$0xf] }
   0xd   :  { %v533_v43 = vld [vmem:[%s827_s0 + $0x64] sm:$0xf0]  ;;  %v412_v45 = vld [vmem:[%s827_s0 + $0x28] sm:$0xf0]  ;;  %v532_v46 = vld [vmem:[%s827_s0 + $0x64] sm:$0xf]  ;;  %v411_v48 = vor.u32 %v525_v41, %v410_v40 }
   0xe   :  { %245 = vmatpush.bf16.msra.mxu0 %v540_v6  ;;  %602 = vmatpush.bf16.msra.mxu2 %v540_v6  ;;  %v444_v47 = vld [vmem:[%s827_s0 + $0x68] sm:$0xf0]  ;;  %v443_v49 = vor.u32 %v533_v43, %v442_v42  ;;  %v415_v50 = vor.u32 %v524_v44, %v412_v45  ;;  %v418_v52 = vld [vmem:[%s827_s0 + $0x30] sm:$0xf]  ;;  %v527_v53 = vld [vmem:[%s827_s0 + $0x34] sm:$0xf0] }
   0xf   :  { %294 = vmatpush.bf16.msra.mxu1 %v548_v7  ;;  %610 = vmatpush.bf16.msra.mxu3 %v548_v7  ;;  %v447_v51 = vor.u32 %v532_v46, %v444_v47  ;;  %v450_v54 = vld [vmem:[%s827_s0 + $0x70] sm:$0xf]  ;;  %v535_v55 = vld [vmem:[%s827_s0 + $0x74] sm:$0xf0]  ;;  %v526_v56 = vld [vmem:[%s827_s0 + $0x34] sm:$0xf]  ;;  %v419_v60 = vor.u32 %v527_v53, %v418_v52 }
  0x10   :  { %v420_v57 = vld [vmem:[%s827_s0 + $0x38] sm:$0xf0]  ;;  %v534_v58 = vld [vmem:[%s827_s0 + $0x74] sm:$0xf]  ;;  %v451_v61 = vor.u32 %v535_v55, %v450_v54  ;;  %v783_v1 = vld [vmem:[%s826_s2] ss:$0 sm:$0xff] }
  0x11   :  { %v452_v59 = vld [vmem:[%s827_s0 + $0x78] sm:$0xf0]  ;;  %v423_v62 = vor.u32 %v526_v56, %v420_v57 }
  0x12   :  { %246 = vmatpush.bf16.msra.mxu0 %v539_v8  ;;  %603 = vmatpush.bf16.msra.mxu2 %v539_v8  ;;  %v455_v63 = vor.u32 %v534_v58, %v452_v59 }
  0x13   :  { %295 = vmatpush.bf16.msra.mxu1 %v547_v9  ;;  %611 = vmatpush.bf16.msra.mxu3 %v547_v9 }
  0x16   :  { %247 = vmatpush.bf16.msra.mxu0 %v538_v10  ;;  %604 = vmatpush.bf16.msra.mxu2 %v538_v10 }
  0x17   :  { %296 = vmatpush.bf16.msra.mxu1 %v546_v11  ;;  %612 = vmatpush.bf16.msra.mxu3 %v546_v11 }
  0x1a   :  { %248 = vmatpush.bf16.msra.mxu0 %v537_v12  ;;  %605 = vmatpush.bf16.msra.mxu2 %v537_v12 }
  0x1b   :  { %297 = vmatpush.bf16.msra.mxu1 %v545_v13  ;;  %613 = vmatpush.bf16.msra.mxu3 %v545_v13 }
  0x1e   :  { %249 = vmatpush.bf16.msra.mxu0 %v536_v14  ;;  %606 = vmatpush.bf16.msra.mxu2 %v536_v14 }
  0x1f   :  { %298 = vmatpush.bf16.msra.mxu1 %v544_v15  ;;  %614 = vmatpush.bf16.msra.mxu3 %v544_v15 }
  0x21   :  { %250 = vmatmul.bf16.vlgmr.msra.gmra.mxu0 %v395_v24  ;;  %270 = vmatmul.bf16.vlgmr.msra.gmra.mxu2 %v427_v25 }
  0x22   :  { %299 = vmatmul.bf16.vlgmr.msra.gmra.mxu1 %v399_v26  ;;  %319 = vmatmul.bf16.vlgmr.msra.gmra.mxu3 %v431_v27 }
  0x31   :  { %255 = vmatmul.bf16.gmra.mxu0 %v403_v36  ;;  %275 = vmatmul.bf16.gmra.mxu2 %v435_v37 }
  0x32   :  { %304 = vmatmul.bf16.gmra.mxu1 %v407_v38  ;;  %324 = vmatmul.bf16.gmra.mxu3 %v439_v39 }
  0x41   :  { %260 = vmatmul.bf16.gmra.mxu0 %v411_v48  ;;  %280 = vmatmul.bf16.gmra.mxu2 %v443_v49 }
  0x42   :  { %309 = vmatmul.bf16.gmra.mxu1 %v415_v50  ;;  %329 = vmatmul.bf16.gmra.mxu3 %v447_v51 }
  0x51   :  { %265 = vmatmul.bf16.gmra.mxu0 %v419_v60  ;;  %285 = vmatmul.bf16.gmra.mxu2 %v451_v61 }
  0x52   :  { %314 = vmatmul.bf16.gmra.mxu1 %v423_v62  ;;  %334 = vmatmul.bf16.gmra.mxu3 %v455_v63 }
  0x9e   :  { %v251_v0 = vpop.f32.mrf.mxu0 }
  0x9f   :  { %v300_v2 = vpop.f32.mrf.mxu1  ;;  %v252_v3 = vadd.f32 %v783_v1, %v251_v0 }
  0xa1   :  { %v301_v7 = vadd.f32 %v300_v2, %v252_v3 }
  0xa3   :  { %v340_v12 = vmax.f32 %v301_v7, 0.0 }
  0xa4   :  { %v271_v4 = vpop.f32.mrf.mxu2 }
  0xa5   :  { %v320_v5 = vpop.f32.mrf.mxu3  ;;  %v272_v10 = vadd.f32 %v783_v1, %v271_v4 }
  0xa6   :  { %v253_v6 = vpop.f32.mrf.mxu0 }
  0xa7   :  { %v254_v8 = vadd.f32 %v783_v1, %v253_v6  ;;  %v302_v9 = vpop.f32.mrf.mxu1  ;;  %v321_v15 = vadd.f32 %v320_v5, %v272_v10 }
  0xa9   :  { %v303_v11 = vadd.f32 %v302_v9, %v254_v8  ;;  %v348_v22 = vmax.f32 %v321_v15, 0.0 }
  0xab   :  { %v341_v13 = vmax.f32 %v303_v11, 0.0 }
  0xac   :  { %v273_v14 = vpop.f32.mrf.mxu2 }
  0xad   :  { %v555_v16 = vpack.c.bf16 %v341_v13, %v340_v12  ;;  %v274_v17 = vadd.f32 %v783_v1, %v273_v14  ;;  %v322_v18 = vpop.f32.mrf.mxu3 }
  0xae   :  { %v256_v19 = vpop.f32.mrf.mxu0 }
  0xaf   :  { %556 = vst [vmem:[%s828_s3] sm:$0xff] %v555_v16   ;;  %v323_v20 = vadd.f32 %v322_v18, %v274_v17  ;;  %v305_v21 = vpop.f32.mrf.mxu1  ;;  %v257_v25 = vadd.f32 %v783_v1, %v256_v19 }
  0xb1   :  { %v349_v23 = vmax.f32 %v323_v20, 0.0  ;;  %v306_v29 = vadd.f32 %v305_v21, %v257_v25 }
  0xb3   :  { %v575_v24 = vpack.c.bf16 %v349_v23, %v348_v22  ;;  %v342_v34 = vmax.f32 %v306_v29, 0.0 }
  0xb4   :  { %v276_v26 = vpop.f32.mrf.mxu2 }
  0xb5   :  { %595 = vst [vmem:[%s828_s3 + $0x20] sm:$0xff] %v575_v24   ;;  %v325_v27 = vpop.f32.mrf.mxu3  ;;  %v277_v32 = vadd.f32 %v783_v1, %v276_v26 }
  0xb6   :  { %v258_v28 = vpop.f32.mrf.mxu0 }
  0xb7   :  { %v259_v30 = vadd.f32 %v783_v1, %v258_v28  ;;  %v307_v31 = vpop.f32.mrf.mxu1  ;;  %v326_v37 = vadd.f32 %v325_v27, %v277_v32 }
  0xb9   :  { %v308_v33 = vadd.f32 %v307_v31, %v259_v30  ;;  %v350_v44 = vmax.f32 %v326_v37, 0.0 }
  0xbb   :  { %v343_v35 = vmax.f32 %v308_v33, 0.0 }
  0xbc   :  { %v278_v36 = vpop.f32.mrf.mxu2 }
  0xbd   :  { %v560_v38 = vpack.c.bf16 %v343_v35, %v342_v34  ;;  %v279_v39 = vadd.f32 %v783_v1, %v278_v36  ;;  %v327_v40 = vpop.f32.mrf.mxu3 }
  0xbe   :  { %v261_v41 = vpop.f32.mrf.mxu0 }
  0xbf   :  { %592 = vst [vmem:[%s828_s3 + $0x8] sm:$0xff] %v560_v38   ;;  %v328_v42 = vadd.f32 %v327_v40, %v279_v39  ;;  %v310_v43 = vpop.f32.mrf.mxu1  ;;  %v262_v47 = vadd.f32 %v783_v1, %v261_v41 }
  0xc1   :  { %v351_v45 = vmax.f32 %v328_v42, 0.0  ;;  %v311_v51 = vadd.f32 %v310_v43, %v262_v47 }
  0xc3   :  { %v580_v46 = vpack.c.bf16 %v351_v45, %v350_v44  ;;  %v344_v56 = vmax.f32 %v311_v51, 0.0 }
  0xc4   :  { %v281_v48 = vpop.f32.mrf.mxu2 }
  0xc5   :  { %596 = vst [vmem:[%s828_s3 + $0x28] sm:$0xff] %v580_v46   ;;  %v330_v49 = vpop.f32.mrf.mxu3  ;;  %v282_v54 = vadd.f32 %v783_v1, %v281_v48 }
  0xc6   :  { %v263_v50 = vpop.f32.mrf.mxu0 }
  0xc7   :  { %v264_v52 = vadd.f32 %v783_v1, %v263_v50  ;;  %v312_v53 = vpop.f32.mrf.mxu1  ;;  %v331_v59 = vadd.f32 %v330_v49, %v282_v54 }
  0xc9   :  { %v313_v55 = vadd.f32 %v312_v53, %v264_v52  ;;  %v352_v3 = vmax.f32 %v331_v59, 0.0 }
  0xcb   :  { %v345_v57 = vmax.f32 %v313_v55, 0.0 }
  0xcc   :  { %v283_v58 = vpop.f32.mrf.mxu2 }
  0xcd   :  { %v565_v60 = vpack.c.bf16 %v345_v57, %v344_v56  ;;  %v284_v61 = vadd.f32 %v783_v1, %v283_v58  ;;  %v332_v62 = vpop.f32.mrf.mxu3 }
  0xce   :  { %v266_v63 = vpop.f32.mrf.mxu0 }
  0xcf   :  { %593 = vst [vmem:[%s828_s3 + $0x10] sm:$0xff] %v565_v60   ;;  %v333_v0 = vadd.f32 %v332_v62, %v284_v61  ;;  %v315_v2 = vpop.f32.mrf.mxu1  ;;  %v267_v6 = vadd.f32 %v783_v1, %v266_v63 }
  0xd1   :  { %v353_v4 = vmax.f32 %v333_v0, 0.0  ;;  %v316_v10 = vadd.f32 %v315_v2, %v267_v6 }
  0xd3   :  { %v585_v5 = vpack.c.bf16 %v353_v4, %v352_v3  ;;  %v346_v15 = vmax.f32 %v316_v10, 0.0 }
  0xd4   :  { %v286_v7 = vpop.f32.mrf.mxu2 }
  0xd5   :  { %597 = vst [vmem:[%s828_s3 + $0x30] sm:$0xff] %v585_v5   ;;  %v335_v8 = vpop.f32.mrf.mxu3  ;;  %v287_v13 = vadd.f32 %v783_v1, %v286_v7 }
  0xd6   :  { %v268_v9 = vpop.f32.mrf.mxu0 }
  0xd7   :  { %v269_v11 = vadd.f32 %v783_v1, %v268_v9  ;;  %v317_v12 = vpop.f32.mrf.mxu1  ;;  %v336_v18 = vadd.f32 %v335_v8, %v287_v13 }
  0xd9   :  { %v318_v14 = vadd.f32 %v317_v12, %v269_v11  ;;  %v354_v23 = vmax.f32 %v336_v18, 0.0 }
  0xdb   :  { %v347_v16 = vmax.f32 %v318_v14, 0.0 }
  0xdc   :  { %v288_v17 = vpop.f32.mrf.mxu2 }
  0xdd   :  { %v570_v19 = vpack.c.bf16 %v347_v16, %v346_v15  ;;  %v289_v20 = vadd.f32 %v783_v1, %v288_v17  ;;  %v337_v21 = vpop.f32.mrf.mxu3 }
  0xdf   :  { %594 = vst [vmem:[%s828_s3 + $0x18] sm:$0xff] %v570_v19   ;;  %v338_v22 = vadd.f32 %v337_v21, %v289_v20 }
  0xe1   :  { %v355_v24 = vmax.f32 %v338_v22, 0.0 }
  0xe3   :  { %v590_v25 = vpack.c.bf16 %v355_v24, %v354_v23 }
  0xe5   :  { %598 = vst [vmem:[%s828_s3 + $0x38] sm:$0xff] %v590_v25  }

// kernel: run.5
= control target key start
LH: loop header
LB: loop body
LE: loop exit
PB: predicated region body
PF: predicated region fallthrough
CT: control target
= control target key end

     0   :  { %s3613_s27 = smov 0   ;;  %s3615_s28 = smov 0   ;;  %s4431_s0 = inlined_call_operand.vmem [shape: bf16[4,2,9,9,128], index: 0, kind: input, shape index: {}]   ;;  %s4432_s1 = inlined_call_operand.vmem [shape: bf16[9,128,128], index: 1, kind: input, shape index: {}]   ;;  %s4433_s2 = inlined_call_operand.vmem [shape: f32[1,128], index: 2, kind: input, shape index: {}]   ;;  %s4434_s3 = inlined_call_operand.vmem [shape: bf16[128,256], index: 3, kind: input, shape index: {}]   ;;  %s4435_s4 = inlined_call_operand.vmem [shape: f32[1,256], index: 4, kind: input, shape index: {}]   ;;  %s4436_s5 = inlined_call_operand.vmem [shape: bf16[128,64], index: 5, kind: input, shape index: {}]   ;;  %s4437_s6 = inlined_call_operand.vmem [shape: bf16[64,256], index: 6, kind: input, shape index: {}]   ;;  %s4438_s7 = inlined_call_operand.vmem [shape: f32[1,256], index: 7, kind: input, shape index: {}]   ;;  %s4439_s8 = inlined_call_operand.vmem [shape: f32[128,256], index: 8, kind: output, shape index: {}]  }
   0x1   :  { %s3617_s29 = smov 0  }
   0x2 LB: > { %s2654_s30 = sadd.s32 4294967295, %s3566_s29   ;;  %s3630_s9 = sadd.s32 1, %s3566_s29   ;;  %s3566_s29 = sphi %s3617_s29, %s4444_s29   ;;  %s3562_s28 = sphi %s3615_s28, %s4443_s28   ;;  %s3558_s27 = sphi %s3613_s27, %s4442_s27  }
   0x3   : > { %s22_s10 = ssub.s32 %s3566_s29, %s3630_s9  ;;  %s25_s11 = sadd.s32 1, %s3562_s28 }
   0x4   : > { %p23_p0 = scmp.eq.s32.totalorder %s22_s10, 0  ;;  %p32_p1 = scmp.ne.s32.totalorder %s3562_s28, %s3558_s27 }
   0x5   : > { %p33_p2 = scmp.eq.s32.totalorder %s3566_s29, 0  ;;  %p2657_p4 = scmp.ge.s32.totalorder %s3566_s29, 2 }
   0x6   : > { %s3639_s12 = scalar_select %p23_p0, %s3562_s28, %s25_s11  }
   0x7   : > { %p34_p3 = por %p33_p2, %p32_p1  ;;  %254 = sbr.rel (%p2657_p4) target bundleno = 53 (0x35), region = 40 }
   0xc   : > { %257 = sbr.rel (!%p34_p3) target bundleno = 53 (0x35), region = 44  ;;  %s259_s13 = sand.u32 (%p34_p3), 1, %s3562_s28  }
   0xd   : > { %s3517_s14 = smul.u32 (%p34_p3), 72, %s3566_s29 }
   0xe   : > { %s3516_s15 = smul.u32 (%p34_p3), 288, %s259_s13 }
   0xf   : > { %s3647_s18 = scalar_lea.vmem (%p34_p3), %s4431_s0, %s3517_s14 }
  0x10   : > { %v281_v0 = vld [vmem:[%s3647_s18] sm:$0xff] (%p34_p3)   ;;  %v285_v1 = vld [vmem:[%s3647_s18 + $0x8] sm:$0xff] (%p34_p3)   ;;  %v289_v2 = vld [vmem:[%s3647_s18 + $0x10] sm:$0xff] (%p34_p3)   ;;  %s3652_s19 = scalar_lea.vmem (%p34_p3), [#allocation2], %s3516_s15 }
  0x11   : > { %282 = vst [vmem:[%s3652_s19] sm:$0xff] %v281_v0   ;;  %v293_v3 = vld [vmem:[%s3647_s18 + $0x18] sm:$0xff]   ;;  %v297_v4 = vld [vmem:[%s3647_s18 + $0x20] sm:$0xff]   ;;  %v301_v5 = vld [vmem:[%s3647_s18 + $0x28] sm:$0xff]  }
  0x12   : > { %286 = vst [vmem:[%s3652_s19 + $0x8] sm:$0xff] %v285_v1   ;;  %v305_v6 = vld [vmem:[%s3647_s18 + $0x30] sm:$0xff]   ;;  %v309_v7 = vld [vmem:[%s3647_s18 + $0x38] sm:$0xff]   ;;  %v313_v8 = vld [vmem:[%s3647_s18 + $0x40] sm:$0xff]  }
  0x13   : > { %290 = vst [vmem:[%s3652_s19 + $0x10] sm:$0xff] %v289_v2   ;;  %v317_v9 = vld [vmem:[%s3647_s18 + $0x90] sm:$0xff]   ;;  %v321_v10 = vld [vmem:[%s3647_s18 + $0x98] sm:$0xff]   ;;  %v325_v11 = vld [vmem:[%s3647_s18 + $0xa0] sm:$0xff]  }
  0x14   : > { %294 = vst [vmem:[%s3652_s19 + $0x18] sm:$0xff] %v293_v3   ;;  %v329_v12 = vld [vmem:[%s3647_s18 + $0xa8] sm:$0xff]   ;;  %v333_v13 = vld [vmem:[%s3647_s18 + $0xb0] sm:$0xff]   ;;  %v337_v14 = vld [vmem:[%s3647_s18 + $0xb8] sm:$0xff]  }
  0x15   : > { %298 = vst [vmem:[%s3652_s19 + $0x20] sm:$0xff] %v297_v4   ;;  %v341_v15 = vld [vmem:[%s3647_s18 + $0xc0] sm:$0xff]   ;;  %v345_v16 = vld [vmem:[%s3647_s18 + $0xc8] sm:$0xff]   ;;  %v349_v17 = vld [vmem:[%s3647_s18 + $0xd0] sm:$0xff]  }
  0x16   : > { %302 = vst [vmem:[%s3652_s19 + $0x28] sm:$0xff] %v301_v5   ;;  %v353_v18 = vld [vmem:[%s3647_s18 + $0x120] sm:$0xff]   ;;  %v357_v19 = vld [vmem:[%s3647_s18 + $0x128] sm:$0xff]   ;;  %v361_v20 = vld [vmem:[%s3647_s18 + $0x130] sm:$0xff]  }
  0x17   : > { %306 = vst [vmem:[%s3652_s19 + $0x30] sm:$0xff] %v305_v6   ;;  %v365_v21 = vld [vmem:[%s3647_s18 + $0x138] sm:$0xff]   ;;  %v369_v22 = vld [vmem:[%s3647_s18 + $0x140] sm:$0xff]   ;;  %v373_v23 = vld [vmem:[%s3647_s18 + $0x148] sm:$0xff]  }
  0x18   : > { %310 = vst [vmem:[%s3652_s19 + $0x38] sm:$0xff] %v309_v7   ;;  %v377_v24 = vld [vmem:[%s3647_s18 + $0x150] sm:$0xff]   ;;  %v381_v25 = vld [vmem:[%s3647_s18 + $0x158] sm:$0xff]   ;;  %v385_v26 = vld [vmem:[%s3647_s18 + $0x160] sm:$0xff]  }
  0x19   : > { %314 = vst [vmem:[%s3652_s19 + $0x40] sm:$0xff] %v313_v8   ;;  %v389_v27 = vld [vmem:[%s3647_s18 + $0x1b0] sm:$0xff]   ;;  %v393_v28 = vld [vmem:[%s3647_s18 + $0x1b8] sm:$0xff]   ;;  %v397_v29 = vld [vmem:[%s3647_s18 + $0x1c0] sm:$0xff]  }
  0x1a   : > { %318 = vst [vmem:[%s3652_s19 + $0x48] sm:$0xff] %v317_v9   ;;  %v401_v30 = vld [vmem:[%s3647_s18 + $0x1c8] sm:$0xff]   ;;  %v405_v31 = vld [vmem:[%s3647_s18 + $0x1d0] sm:$0xff]   ;;  %v409_v32 = vld [vmem:[%s3647_s18 + $0x1d8] sm:$0xff]  }
  0x1b   : > { %322 = vst [vmem:[%s3652_s19 + $0x50] sm:$0xff] %v321_v10   ;;  %v413_v33 = vld [vmem:[%s3647_s18 + $0x1e0] sm:$0xff]   ;;  %v417_v34 = vld [vmem:[%s3647_s18 + $0x1e8] sm:$0xff]   ;;  %v421_v35 = vld [vmem:[%s3647_s18 + $0x1f0] sm:$0xff]  }
  0x1c   : > { %326 = vst [vmem:[%s3652_s19 + $0x58] sm:$0xff] %v325_v11  }
  0x1d   : > { %330 = vst [vmem:[%s3652_s19 + $0x60] sm:$0xff] %v329_v12  }
  0x1e   : > { %334 = vst [vmem:[%s3652_s19 + $0x68] sm:$0xff] %v333_v13  }
  0x1f   : > { %338 = vst [vmem:[%s3652_s19 + $0x70] sm:$0xff] %v337_v14  }
  0x20   : > { %342 = vst [vmem:[%s3652_s19 + $0x78] sm:$0xff] %v341_v15  }
  0x21   : > { %346 = vst [vmem:[%s3652_s19 + $0x80] sm:$0xff] %v345_v16  }
  0x22   : > { %350 = vst [vmem:[%s3652_s19 + $0x88] sm:$0xff] %v349_v17  }
  0x23   : > { %354 = vst [vmem:[%s3652_s19 + $0x90] sm:$0xff] %v353_v18  }
  0x24   : > { %358 = vst [vmem:[%s3652_s19 + $0x98] sm:$0xff] %v357_v19  }
  0x25   : > { %362 = vst [vmem:[%s3652_s19 + $0xa0] sm:$0xff] %v361_v20  }
  0x26   : > { %366 = vst [vmem:[%s3652_s19 + $0xa8] sm:$0xff] %v365_v21  }
  0x27   : > { %370 = vst [vmem:[%s3652_s19 + $0xb0] sm:$0xff] %v369_v22  }
  0x28   : > { %374 = vst [vmem:[%s3652_s19 + $0xb8] sm:$0xff] %v373_v23  }
  0x29   : > { %378 = vst [vmem:[%s3652_s19 + $0xc0] sm:$0xff] %v377_v24  }
  0x2a   : > { %382 = vst [vmem:[%s3652_s19 + $0xc8] sm:$0xff] %v381_v25  }
  0x2b   : > { %386 = vst [vmem:[%s3652_s19 + $0xd0] sm:$0xff] %v385_v26  }
  0x2c   : > { %390 = vst [vmem:[%s3652_s19 + $0xd8] sm:$0xff] %v389_v27  }
  0x2d   : > { %394 = vst [vmem:[%s3652_s19 + $0xe0] sm:$0xff] %v393_v28  }
  0x2e   : > { %398 = vst [vmem:[%s3652_s19 + $0xe8] sm:$0xff] %v397_v29  }
  0x2f   : > { %402 = vst [vmem:[%s3652_s19 + $0xf0] sm:$0xff] %v401_v30  }
  0x30   : > { %406 = vst [vmem:[%s3652_s19 + $0xf8] sm:$0xff] %v405_v31  }
  0x31   : > { %410 = vst [vmem:[%s3652_s19 + $0x100] sm:$0xff] %v409_v32  }
  0x32   : > { %414 = vst [vmem:[%s3652_s19 + $0x108] sm:$0xff] %v413_v33  }
  0x33   : > { %418 = vst [vmem:[%s3652_s19 + $0x110] sm:$0xff] %v417_v34  }
  0x34   : > { %422 = vst [vmem:[%s3652_s19 + $0x118] sm:$0xff] %v421_v35  }
  0x35 PF: > { %p2659_p5 = scmp.ge.s32.totalorder %s3566_s29, 1  ;;  %p600_p6 = scmp.lt.s32.totalorder %s3566_s29, 3 }
  0x37   : > { %p601_p7 = pnand %p2659_p5, %p600_p6 }
  0x38   : > { %s607_s11 = sand.u32 (!%p601_p7), 1, %s3558_s27   ;;  %s4201_s10 = sshll.u32 (!%p601_p7), %s2654_s30, 3 }
  0x39   : > { %604 = sbr.rel (%p601_p7) target bundleno = 597 (0x255), region = 89  ;;  %p647_p8 = scmp.lt.s32.totalorder (!%p601_p7), %s4201_s10, 15 }
  0x3a   : > { %s3518_s17 = smul.u32 (!%p601_p7), 288, %s607_s11 }
  0x3c   : > { %s3756_s25 = scalar_lea.vmem (!%p601_p7), [#allocation2], %s3518_s17 }
  0x3e   : > { %v3395_v36 = vld [vmem:[%s4432_s1 + $0x78] sm:$0xff]  ;;  %v3394_v37 = vld [vmem:[%s4432_s1 + $0x70] sm:$0xff]  ;;  %v3393_v42 = vld [vmem:[%s4432_s1 + $0x68] sm:$0xff]  ;;  %vm928_vm0 = vsmask.f32 3328  ;;  %s4446_s10 = smov (!%p647_p8, %s4201_s10), 15 }
  0x3f   : > { %782 = vmatpush.bf16.msra.mxu0 %v3395_v36  ;;  %3496 = vmatpush.bf16.msra.mxu1 %v3395_v36  ;;  %v3403_v38 = vld [vmem:[%s4432_s1 + $0xb8] sm:$0xff]  ;;  %v3402_v40 = vld [vmem:[%s4432_s1 + $0xb0] sm:$0xff]  ;;  %v3401_v43 = vld [vmem:[%s4432_s1 + $0xa8] sm:$0xff]  ;;  %vm929_vm1 = vsmask.f32 7440  ;;  %s2661_s11 = sshll.u32 %s4446_s10, 2 }
  0x40   : > { %v3415_v39 = vld [vmem:[%s4432_s1 + $0xf8] sm:$0xff]  ;;  %1124 = vmatpush.bf16.msra.mxu2 %v3403_v38  ;;  %v3414_v41 = vld [vmem:[%s4432_s1 + $0xf0] sm:$0xff]  ;;  %v3413_v44 = vld [vmem:[%s4432_s1 + $0xe8] sm:$0xff]  ;;  %s4286_s30 = scalar_lea.vmem %s4436_s5, %s2661_s11  ;;  %vm2459_vm3 = vcmask 523264  }
  0x41   : > { %1259 = vmatpush.bf16.msra.mxu3 %v3415_v39  ;;  %v3392_v45 = vld [vmem:[%s4432_s1 + $0x60] sm:$0xff]  ;;  %v914_v47 = vld [vmem:[%s3756_s25 + $0x8] sm:$0xf]  ;;  %v3391_v55 = vld [vmem:[%s4432_s1 + $0x58] sm:$0xff] }
  0x42   : > { %v912_v46 = vld [vmem:[%s3756_s25] sm:$0xf]  ;;  %v946_v52 = vshrl.u32 %v914_v47, 16  ;;  %v913_v56 = vld [vmem:[%s3756_s25 + $0x4] sm:$0x1]  ;;  %v3399_v58 = vld [vmem:[%s4432_s1 + $0x98] sm:$0xff] }
  0x43   : > { %783 = vmatpush.bf16.msra.mxu0 %v3394_v37  ;;  %3497 = vmatpush.bf16.msra.mxu1 %v3394_v37  ;;  %v932_v48 = vshrl.u32 %v912_v46, 16  ;;  %v935_v49 = vshll.u32 %v912_v46, 16  ;;  %v3400_v50 = vld [vmem:[%s4432_s1 + $0xa0] sm:$0xff]  ;;  %v915_v57 = vld [vmem:[%s3756_s25 + $0xc] sm:$0x1]  ;;  %v3411_v59 = vld [vmem:[%s4432_s1 + $0xd8] sm:$0xff] }
  0x44   : > { %1125 = vmatpush.bf16.msra.mxu2 %v3402_v40  ;;  %v3412_v51 = vld [vmem:[%s4432_s1 + $0xe0] sm:$0xff]  ;;  %v948_v60 = vrot.slane %v946_v52, 4  ;;  %v949_v61 = vshll.u32 %v914_v47, 16  ;;  %v941_v63 = vshll.u32 %v913_v56, 16  ;;  %v955_v0 = vshll.u32 %v915_v57, 16  ;;  %v3390_v1 = vld [vmem:[%s4432_s1 + $0x50] sm:$0xff]  ;;  %vm3789_vm2 = vmor %vm928_vm0, %vm929_vm1 }
  0x45   : > { %1260 = vmatpush.bf16.msra.mxu3 %v3414_v41  ;;  %v934_v53 = vrot.slane %v932_v48, 4  ;;  %v937_v54 = vrot.slane %v935_v49, 5  ;;  %v3398_v3 = vld [vmem:[%s4432_s1 + $0x90] sm:$0xff]  ;;  %v3389_v9 = vld [vmem:[%s4432_s1 + $0x48] sm:$0xff]  ;;  %v918_v15 = vld [vmem:[%s3756_s25 + $0x18] sm:$0xf] }
  0x46   : > { %v951_v2 = vrot.slane %v949_v61, 5  ;;  %v3410_v4 = vld [vmem:[%s4432_s1 + $0xd0] sm:$0xff]  ;;  %v943_v7 = vrot.slane %v941_v63, 5  ;;  %v957_v8 = vrot.slane %v955_v0, 5  ;;  %v3397_v13 = vld [vmem:[%s4432_s1 + $0x88] sm:$0xff]  ;;  %v3388_v18 = vld [vmem:[%s4432_s1 + $0x40] sm:$0xff] }
  0x47   : > { %784 = vmatpush.bf16.msra.mxu0 %v3393_v42  ;;  %3498 = vmatpush.bf16.msra.mxu1 %v3393_v42  ;;  %v938_v62 = vor.u32 %v937_v54, %v934_v53  ;;  %v916_v12 = vld [vmem:[%s3756_s25 + $0x10] sm:$0xf]  ;;  %v3409_v14 = vld [vmem:[%s4432_s1 + $0xc8] sm:$0xff]  ;;  %v974_v22 = vshrl.u32 %v918_v15, 16  ;;  %v977_v23 = vshll.u32 %v918_v15, 16  ;;  %v3383_v27 = vld [vmem:[%s4432_s1 + $0x38] sm:$0xff] }
  0x48   : > { %1126 = vmatpush.bf16.msra.mxu2 %v3401_v43  ;;  %v952_v5 = vor.u32 %v951_v2, %v948_v60  ;;  %v960_v16 = vshrl.u32 %v916_v12, 16  ;;  %v963_v17 = vshll.u32 %v916_v12, 16  ;;  %v2691_v19 = vld [vmem:[%s3756_s25 + $0x48] sm:$0xf]  ;;  %v3384_v24 = vld [vmem:[%s3756_s25 + $0x4c] sm:$0xf0] }
  0x49   : > { %1261 = vmatpush.bf16.msra.mxu3 %v3413_v44  ;;  %v939_v6 = vrot.slane %v938_v62, 4  ;;  %v2699_v25 = vld [vmem:[%s3756_s25 + $0x68] sm:$0xf]  ;;  %v3386_v26 = vld [vmem:[%s3756_s25 + $0x6c] sm:$0xf0]  ;;  %v3427_v28 = vld [vmem:[%s4432_s1 + $0x138] sm:$0xff]  ;;  %v2692_v38 = vor.u32 %v3384_v24, %v2691_v19 }
  0x4a   : > { %v953_v11 = vrot.slane %v952_v5, 4  ;;  %v962_v29 = vrot.slane %v960_v16, 4  ;;  %v965_v30 = vrot.slane %v963_v17, 5  ;;  %v976_v31 = vrot.slane %v974_v22, 4  ;;  %v3396_v33 = vld [vmem:[%s4432_s1 + $0x80] sm:$0xff]  ;;  %v3447_v43 = vld [vmem:[%s4432_s1 + $0x1b8] sm:$0xff] }
  0x4b   : > { %785 = vmatpush.bf16.msra.mxu0 %v3392_v45  ;;  %3499 = vmatpush.bf16.msra.mxu1 %v3392_v45  ;;  %v944_v20 = vsel %vm3789_vm2, %v939_v6, %v943_v7  ;;  %v979_v32 = vrot.slane %v977_v23, 5  ;;  %v3408_v34 = vld [vmem:[%s4432_s1 + $0xc0] sm:$0xff]  ;;  %v917_v37 = vld [vmem:[%s3756_s25 + $0x14] sm:$0x1]  ;;  %v2700_v39 = vor.u32 %v3386_v26, %v2699_v25  ;;  %v2859_v40 = vld [vmem:[%s3756_s25 + $0x90] sm:$0xf] }
  0x4c   : > { %1127 = vmatpush.bf16.msra.mxu2 %v3400_v50  ;;  %v958_v21 = vsel %vm3789_vm2, %v953_v11, %v957_v8  ;;  %v1060_v35 = vunpack.c.l.b16 %v944_v20  ;;  %v3404_v41 = vld [vmem:[%s3756_s25 + $0x94] sm:$0xf0]  ;;  %v919_v42 = vld [vmem:[%s3756_s25 + $0x1c] sm:$0x1]  ;;  %v3382_v45 = vld [vmem:[%s4432_s1 + $0x30] sm:$0xff]  ;;  %v966_v47 = vor.u32 %v965_v30, %v962_v29  ;;  %v969_v48 = vshll.u32 %v917_v37, 16 }
  0x4d   : > { %1262 = vmatpush.bf16.msra.mxu3 %v3412_v51  ;;  %v1061_v36 = vunpack.c.l.b16 %v958_v21  ;;  %v3459_v44 = vld [vmem:[%s4432_s1 + $0x1f8] sm:$0xff]  ;;  %v3426_v46 = vld [vmem:[%s4432_s1 + $0x130] sm:$0xff]  ;;  %v980_v49 = vor.u32 %v979_v32, %v976_v31  ;;  %v983_v50 = vshll.u32 %v919_v42, 16  ;;  %v2860_v52 = vor.u32 %v3404_v41, %v2859_v40  ;;  %v3425_v56 = vld [vmem:[%s4432_s1 + $0x128] sm:$0xff] }
  0x4e   : > { %v3446_v53 = vld [vmem:[%s4432_s1 + $0x1b0] sm:$0xff]  ;;  %v967_v57 = vrot.slane %v966_v47, 4  ;;  %v3380_v61 = vld [vmem:[%s4432_s1 + $0x20] sm:$0xff]  ;;  %v3445_v62 = vld [vmem:[%s4432_s1 + $0x1a8] sm:$0xff] }
  0x4f   : > { %786 = vmatpush.bf16.msra.mxu0 %v3391_v55  ;;  %3500 = vmatpush.bf16.msra.mxu1 %v3391_v55  ;;  %v1068_v51 = vpack.c.b16 %v1061_v36, %v1060_v35  ;;  %v3458_v54 = vld [vmem:[%s4432_s1 + $0x1f0] sm:$0xff]  ;;  %v3381_v55 = vld [vmem:[%s4432_s1 + $0x28] sm:$0xff]  ;;  %v985_v60 = vrot.slane %v983_v50, 5  ;;  %v3424_v0 = vld [vmem:[%s4432_s1 + $0x120] sm:$0xff] }
  0x50   : > { %1128 = vmatpush.bf16.msra.mxu2 %v3399_v58  ;;  %v971_v58 = vrot.slane %v969_v48, 5  ;;  %v3457_v63 = vld [vmem:[%s4432_s1 + $0x1e8] sm:$0xff]  ;;  %v3385_v11 = vld [vmem:[%s3756_s25 + $0x5c] sm:$0xf0]  ;;  %v2703_v12 = vld [vmem:[%s3756_s25 + $0x78] sm:$0xf] }
  0x51   : > { %1263 = vmatpush.bf16.msra.mxu3 %v3411_v59  ;;  %v981_v59 = vrot.slane %v980_v49, 4  ;;  %v3423_v15 = vld [vmem:[%s4432_s1 + $0x118] sm:$0xff]  ;;  %v3405_v19 = vld [vmem:[%s3756_s25 + $0xa4] sm:$0xf0]  ;;  %v921_v26 = vld [vmem:[%s3756_s25 + $0x24] sm:$0x1] }
  0x52   : > { %v3422_v29 = vld [vmem:[%s4432_s1 + $0x110] sm:$0xff]  ;;  %v3444_v36 = vld [vmem:[%s4432_s1 + $0x1a0] sm:$0xff]  ;;  %v3372_v49 = vld [vmem:[%s3756_s25 + $0x4] sm:$0xf0] }
  0x53   : > { %787 = vmatpush.bf16.msra.mxu0 %v3390_v1  ;;  %3501 = vmatpush.bf16.msra.mxu1 %v3390_v1  ;;  %v972_v1 = vsel %vm3789_vm2, %v967_v57, %v971_v58  ;;  %v986_v2 = vsel %vm3789_vm2, %v981_v59, %v985_v60  ;;  %v3456_v37 = vld [vmem:[%s4432_s1 + $0x1e0] sm:$0xff]  ;;  %v924_v50 = vld [vmem:[%s3756_s25 + $0x30] sm:$0xf] }
  0x54   : > { %1129 = vmatpush.bf16.msra.mxu2 %v3398_v3  ;;  %v920_v3 = vld [vmem:[%s3756_s25 + $0x20] sm:$0xf]  ;;  %v1062_v16 = vunpack.c.l.b16 %v972_v1  ;;  %v1063_v17 = vunpack.c.l.b16 %v986_v2  ;;  %v1016_v58 = vshrl.u32 %v924_v50, 16  ;;  %v1019_v59 = vshll.u32 %v924_v50, 16  ;;  %v3466_v1 = vld [vmem:[%s4432_s1 + $0x230] sm:$0xff]  ;;  %v3429_v50 = vld [vmem:[%s4432_s1 + $0x148] sm:$0xff] }
  0x55   : > { %1264 = vmatpush.bf16.msra.mxu3 %v3410_v4  ;;  %v922_v4 = vld [vmem:[%s3756_s25 + $0x28] sm:$0xf]  ;;  %v988_v5 = vshrl.u32 %v920_v3, 16  ;;  %v991_v6 = vshll.u32 %v920_v3, 16  ;;  %v3420_v47 = vld [vmem:[%s4432_s1 + $0x100] sm:$0xff] }
  0x56   : > { %v1002_v7 = vshrl.u32 %v922_v4, 16  ;;  %v1005_v8 = vshll.u32 %v922_v4, 16  ;;  %v1069_v30 = vpack.c.b16 %v1063_v17, %v1062_v16  ;;  %v2739_v48 = vld [vmem:[%s3756_s25] sm:$0xf]  ;;  %v2867_v4 = vld [vmem:[%s3756_s25 + $0xb0] sm:$0xf] }
  0x57   : > { %788 = vmatpush.bf16.msra.mxu0 %v3389_v9  ;;  %3502 = vmatpush.bf16.msra.mxu1 %v3389_v9  ;;  %v2695_v9 = vld [vmem:[%s3756_s25 + $0x58] sm:$0xf]  ;;  %v990_v20 = vrot.slane %v988_v5, 4  ;;  %v993_v21 = vrot.slane %v991_v6, 5  ;;  %v3416_v57 = vld [vmem:[%s3756_s25 + $0xdc] sm:$0xf0] }
  0x58   : > { %1130 = vmatpush.bf16.msra.mxu2 %v3397_v13  ;;  %v3387_v13 = vld [vmem:[%s3756_s25 + $0x7c] sm:$0xf0]  ;;  %v1004_v22 = vrot.slane %v1002_v7, 4  ;;  %v1007_v23 = vrot.slane %v1005_v8, 5  ;;  %v2696_v24 = vor.u32 %v3385_v11, %v2695_v9  ;;  %v3406_v5 = vld [vmem:[%s3756_s25 + $0xb4] sm:$0xf0] }
  0x59   : > { %1265 = vmatpush.bf16.msra.mxu3 %v3409_v14  ;;  %v3379_v14 = vld [vmem:[%s4432_s1 + $0x18] sm:$0xff]  ;;  %v2704_v25 = vor.u32 %v3387_v13, %v2703_v12  ;;  %v994_v32 = vor.u32 %v993_v21, %v990_v20  ;;  %v1018_v6 = vrot.slane %v1016_v58, 4  ;;  %v1021_v7 = vrot.slane %v1019_v59, 5  ;;  %v925_v11 = vld [vmem:[%s3756_s25 + $0x34] sm:$0x1]  ;;  %v3433_v13 = vld [vmem:[%s4432_s1 + $0x168] sm:$0xff] }
  0x5a   : > { %v927_v12 = vld [vmem:[%s3756_s25 + $0x3c] sm:$0x1]  ;;  %v3465_v16 = vld [vmem:[%s4432_s1 + $0x228] sm:$0xff]  ;;  %v3442_v21 = vld [vmem:[%s4432_s1 + $0x190] sm:$0xff] }
  0x5b   : > { %789 = vmatpush.bf16.msra.mxu0 %v3388_v18  ;;  %3503 = vmatpush.bf16.msra.mxu1 %v3388_v18  ;;  %v2863_v18 = vld [vmem:[%s3756_s25 + $0xa0] sm:$0xf]  ;;  %v995_v40 = vrot.slane %v994_v32, 4  ;;  %v1022_v17 = vor.u32 %v1021_v7, %v1018_v6  ;;  %v1039_v20 = vshll.u32 %v927_v12, 16  ;;  %v2743_v32 = vld [vmem:[%s3756_s25 + $0x10] sm:$0xf] }
  0x5c   : > { %1131 = vmatpush.bf16.msra.mxu2 %v3396_v33  ;;  %v2864_v31 = vor.u32 %v3405_v19, %v2863_v18  ;;  %v997_v33 = vshll.u32 %v921_v26, 16  ;;  %v1025_v18 = vshll.u32 %v925_v11, 16  ;;  %v3418_v58 = vld [vmem:[%s3756_s25 + $0xfc] sm:$0xf0]  ;;  %v3187_v6 = vld [vmem:[%s3756_s25 + $0x10] sm:$0xf] }
  0x5d   : > { %1266 = vmatpush.bf16.msra.mxu3 %v3408_v34  ;;  %v1008_v34 = vor.u32 %v1007_v23, %v1004_v22  ;;  %v3454_v22 = vld [vmem:[%s4432_s1 + $0x1d0] sm:$0xff]  ;;  %v3441_v23 = vld [vmem:[%s4432_s1 + $0x188] sm:$0xff]  ;;  %v1023_v26 = vrot.slane %v1022_v17, 4 }
  0x5e   : > { %790 = vmatmul.bf16.vlgmr.msra.gmra.mxu0 %v2692_v38  ;;  %800 = vmatmul.bf16.vlgmr.msra.gmra.mxu1 %v2700_v39  ;;  %v3377_v38 = vld [vmem:[%s4432_s1 + $0x8] sm:$0xff]  ;;  %v999_v41 = vrot.slane %v997_v33, 5 }
  0x5f   : > { %883 = vmatpush.bf16.msrb.mxu1 %v3383_v27  ;;  %1394 = vmatpush.bf16.msrb.mxu0 %v3427_v28  ;;  %v923_v27 = vld [vmem:[%s3756_s25 + $0x2c] sm:$0x1]  ;;  %v3378_v28 = vld [vmem:[%s4432_s1 + $0x10] sm:$0xff]  ;;  %v1009_v42 = vrot.slane %v1008_v34, 4 }
  0x60   : > { %1775 = vmatpush.bf16.msrb.mxu2 %v3447_v43  ;;  %1267 = vmatmul.bf16.vlgmr.msra.gmra.mxu3 %v2860_v52  ;;  %v1011_v35 = vshll.u32 %v923_v27, 16  ;;  %v3421_v39 = vld [vmem:[%s4432_s1 + $0x108] sm:$0xff]  ;;  %v2931_v52 = vld [vmem:[%s3756_s25 + $0xd8] sm:$0xf]  ;;  %v1027_v27 = vrot.slane %v1025_v18, 5 }
  0x61   : > { %1910 = vmatpush.bf16.msrb.mxu3 %v3459_v44  ;;  %1132 = vmatmul.bf16.vlgmr.msra.gmra.mxu2 %v1068_v51  ;;  %v3443_v44 = vld [vmem:[%s4432_s1 + $0x198] sm:$0xff] }
  0x62   : > { %v1013_v43 = vrot.slane %v1011_v35, 5  ;;  %v926_v51 = vld [vmem:[%s3756_s25 + $0x38] sm:$0xf]  ;;  %v1028_v33 = vsel %vm3789_vm2, %v1023_v26, %v1027_v27 }
  0x63   : > { %884 = vmatpush.bf16.msrb.mxu1 %v3382_v45  ;;  %1395 = vmatpush.bf16.msrb.mxu0 %v3426_v46  ;;  %v3455_v45 = vld [vmem:[%s4432_s1 + $0x1d8] sm:$0xff]  ;;  %v3376_v46 = vld [vmem:[%s4432_s1] sm:$0xff]  ;;  %v1030_v60 = vshrl.u32 %v926_v51, 16 }
  0x64   : > { %1776 = vmatpush.bf16.msrb.mxu2 %v3446_v53  ;;  %v3435_v53 = vld [vmem:[%s4432_s1 + $0x178] sm:$0xff] }
  0x65   : > { %1911 = vmatpush.bf16.msrb.mxu3 %v3458_v54  ;;  %v3467_v54 = vld [vmem:[%s4432_s1 + $0x238] sm:$0xff]  ;;  %v1032_v8 = vrot.slane %v1030_v60, 4 }
  0x66   : > { %v3463_v35 = vld [vmem:[%s4432_s1 + $0x218] sm:$0xff] }
  0x67   : > { %885 = vmatpush.bf16.msrb.mxu1 %v3381_v55  ;;  %1396 = vmatpush.bf16.msrb.mxu0 %v3425_v56  ;;  %v1000_v55 = vsel %vm3789_vm2, %v995_v40, %v999_v41  ;;  %v1014_v56 = vsel %vm3789_vm2, %v1009_v42, %v1013_v43  ;;  %v3430_v41 = vld [vmem:[%s4432_s1 + $0x150] sm:$0xff] }
  0x68   : > { %1777 = vmatpush.bf16.msrb.mxu2 %v3445_v62  ;;  %v2740_v62 = vor.u32 %v3372_v49, %v2739_v48  ;;  %v1064_v2 = vunpack.c.l.b16 %v1000_v55  ;;  %v1065_v3 = vunpack.c.l.b16 %v1014_v56  ;;  %v3440_v48 = vld [vmem:[%s4432_s1 + $0x180] sm:$0xff]  ;;  %v3374_v56 = vld [vmem:[%s3756_s25 + $0x24] sm:$0xf0] }
  0x69   : > { %1912 = vmatpush.bf16.msrb.mxu3 %v3457_v63  ;;  %v2932_v63 = vor.u32 %v3416_v57, %v2931_v52  ;;  %v3461_v52 = vld [vmem:[%s4432_s1 + $0x208] sm:$0xff]  ;;  %v2747_v55 = vld [vmem:[%s3756_s25 + $0x20] sm:$0xf]  ;;  %v2939_v57 = vld [vmem:[%s3756_s25 + $0xf8] sm:$0xf] }
  0x6a   : > { %v2748_v59 = vor.u32 %v3374_v56, %v2747_v55  ;;  %v2940_v60 = vor.u32 %v3418_v58, %v2939_v57  ;;  %v2981_v56 = vld [vmem:[%s3756_s25 + $0xa0] sm:$0xf]  ;;  %v2983_v57 = vld [vmem:[%s3756_s25 + $0xa8] sm:$0xf]  ;;  %v3189_v58 = vld [vmem:[%s3756_s25 + $0x18] sm:$0xf] }
  0x6b   : > { %886 = vmatpush.bf16.msrb.mxu1 %v3380_v61  ;;  %1397 = vmatpush.bf16.msrb.mxu0 %v3424_v0  ;;  %v1033_v61 = vshll.u32 %v926_v51, 16  ;;  %v3434_v0 = vld [vmem:[%s4432_s1 + $0x170] sm:$0xff]  ;;  %v3452_v51 = vld [vmem:[%s4432_s1 + $0x1c0] sm:$0xff] }
  0x6c   : > { %1778 = vmatpush.bf16.msrb.mxu2 %v3444_v36  ;;  %v3373_v36 = vld [vmem:[%s3756_s25 + $0x14] sm:$0xf0] }
  0x6d   : > { %1913 = vmatpush.bf16.msrb.mxu3 %v3456_v37  ;;  %v1035_v9 = vrot.slane %v1033_v61, 5  ;;  %v2935_v37 = vld [vmem:[%s3756_s25 + $0xe8] sm:$0xf]  ;;  %v2744_v42 = vor.u32 %v3373_v36, %v2743_v32 }
  0x6e   : > { %795 = vmatmul.bf16.gmra.mxu0 %v2696_v24  ;;  %805 = vmatmul.bf16.gmra.mxu1 %v2704_v25  ;;  %v3432_v24 = vld [vmem:[%s4432_s1 + $0x160] sm:$0xff]  ;;  %v3067_v61 = vld [vmem:[%s3756_s25 + $0x8] sm:$0xf] }
  0x6f   : > { %887 = vmatpush.bf16.msrb.mxu1 %v3379_v14  ;;  %1398 = vmatpush.bf16.msrb.mxu0 %v3423_v15  ;;  %v1070_v14 = vpack.c.b16 %v1065_v3, %v1064_v2  ;;  %v2868_v15 = vor.u32 %v3406_v5, %v2867_v4  ;;  %v1036_v19 = vor.u32 %v1035_v9, %v1032_v8  ;;  %v3464_v25 = vld [vmem:[%s4432_s1 + $0x220] sm:$0xff]  ;;  %v2977_v2 = vld [vmem:[%s3756_s25 + $0x90] sm:$0xf]  ;;  %v2979_v4 = vld [vmem:[%s3756_s25 + $0x98] sm:$0xf] }
  0x70   : > { %1272 = vmatmul.bf16.gmra.mxu3 %v2864_v31  ;;  %1779 = vmatpush.bf16.msrb.mxu2 %v3443_v44  ;;  %v3431_v31 = vld [vmem:[%s4432_s1 + $0x158] sm:$0xff]  ;;  %v2871_v44 = vld [vmem:[%s3756_s25 + $0xc0] sm:$0xf]  ;;  %v3185_v5 = vld [vmem:[%s3756_s25 + $0x8] sm:$0xf]  ;;  %v1448_v7 = vshrl.u32 %v2977_v2, 16 }
  0x71   : > { %1137 = vmatmul.bf16.gmra.mxu2 %v1069_v30  ;;  %1914 = vmatpush.bf16.msrb.mxu3 %v3455_v45  ;;  %v3453_v30 = vld [vmem:[%s4432_s1 + $0x1c8] sm:$0xff]  ;;  %v1451_v8 = vshll.u32 %v2977_v2, 16  ;;  %v1462_v9 = vshrl.u32 %v2979_v4, 16  ;;  %v1465_v11 = vshll.u32 %v2979_v4, 16  ;;  %v1964_v12 = vshrl.u32 %v3185_v5, 16 }
  0x72   : > { %v3407_v45 = vld [vmem:[%s3756_s25 + $0xc4] sm:$0xf0]  ;;  %v1450_v17 = vrot.slane %v1448_v7, 4  ;;  %v1992_v4 = vshrl.u32 %v3189_v58, 16 }
  0x73   : > { %888 = vmatpush.bf16.msrb.mxu1 %v3378_v28  ;;  %1399 = vmatpush.bf16.msrb.mxu0 %v3422_v29  ;;  %v1037_v28 = vrot.slane %v1036_v19, 4  ;;  %v1041_v29 = vrot.slane %v1039_v20, 5  ;;  %v2872_v49 = vor.u32 %v3407_v45, %v2871_v44  ;;  %v1453_v18 = vrot.slane %v1451_v8, 5  ;;  %v2751_v19 = vld [vmem:[%s3756_s25 + $0x30] sm:$0xf] }
  0x74   : > { %1780 = vmatpush.bf16.msrb.mxu2 %v3442_v21  ;;  %v2980_v20 = vld [vmem:[%s3756_s25 + $0x9c] sm:$0x1]  ;;  %v1464_v21 = vrot.slane %v1462_v9, 4  ;;  %v3143_v44 = vld [vmem:[%s3756_s25 + $0x60] sm:$0xf] }
  0x75   : > { %1915 = vmatpush.bf16.msrb.mxu3 %v3454_v22  ;;  %v1042_v34 = vsel %vm3789_vm2, %v1037_v28, %v1041_v29  ;;  %v1467_v22 = vrot.slane %v1465_v11, 5  ;;  %v3375_v29 = vld [vmem:[%s3756_s25 + $0x34] sm:$0xf0]  ;;  %v1454_v32 = vor.u32 %v1453_v18, %v1450_v17  ;;  %v3449_v45 = vld [vmem:[%s3756_s25 + $0x64] sm:$0xf0] }
  0x76   : > { %v1067_v40 = vunpack.c.l.b16 %v1042_v34  ;;  %v1471_v34 = vshll.u32 %v2980_v20, 16  ;;  %v3144_v55 = vor.u32 %v3449_v45, %v3143_v44  ;;  %v2982_v8 = vld [vmem:[%s3756_s25 + $0xa4] sm:$0x1]  ;;  %v2984_v18 = vld [vmem:[%s3756_s25 + $0xac] sm:$0x1] }
  0x77   : > { %889 = vmatpush.bf16.msrb.mxu1 %v3377_v38  ;;  %1400 = vmatpush.bf16.msrb.mxu0 %v3421_v39  ;;  %v3417_v38 = vld [vmem:[%s3756_s25 + $0xec] sm:$0xf0]  ;;  %v1066_v39 = vunpack.c.l.b16 %v1028_v33  ;;  %v3192_v20 = vld [vmem:[%s3756_s25 + $0x24] sm:$0x1]  ;;  %v2987_v45 = vld [vmem:[%s3756_s25 + $0xb8] sm:$0xf] }
  0x78   : > { %1781 = vmatpush.bf16.msrb.mxu2 %v3441_v23  ;;  %v2936_v43 = vor.u32 %v3417_v38, %v2935_v37  ;;  %v3186_v23 = vld [vmem:[%s3756_s25 + $0xc] sm:$0x1]  ;;  %v2752_v38 = vor.u32 %v3375_v29, %v2751_v19  ;;  %v3190_v19 = vld [vmem:[%s3756_s25 + $0x1c] sm:$0x1] }
  0x79   : > { %1916 = vmatpush.bf16.msrb.mxu3 %v3453_v30  ;;  %v2943_v30 = vld [vmem:[%s3756_s25 + $0x108] sm:$0xf]  ;;  %v1973_v36 = vshll.u32 %v3186_v23, 16 }
  0x7b   : > { %890 = vmatpush.bf16.msrb.mxu1 %v3376_v46  ;;  %1401 = vmatpush.bf16.msrb.mxu0 %v3420_v47  ;;  %v3462_v46 = vld [vmem:[%s4432_s1 + $0x210] sm:$0xff]  ;;  %v1071_v47 = vpack.c.b16 %v1067_v40, %v1066_v39 }
  0x7c   : > { %1782 = vmatpush.bf16.msrb.mxu2 %v3440_v48  ;;  %v1473_v48 = vrot.slane %v1471_v34, 5  ;;  %v3438_v34 = vld [vmem:[%s3756_s25 + $0x2c] sm:$0xf0] }
  0x7d   : > { %1917 = vmatpush.bf16.msrb.mxu3 %v3452_v51 }
  0x7e   : > { %891 = vmatmul.bf16.vlgmr.msrb.gmra.mxu1 %v2740_v62  ;;  %1402 = vmatmul.bf16.vlgmr.msrb.gmra.mxu0 %v2932_v63  ;;  %v3436_v62 = vld [vmem:[%s3756_s25 + $0xc] sm:$0xf0] }
  0x7f   : > { %1640 = vmatpush.bf16.msra.mxu1 %v3435_v53  ;;  %2156 = vmatpush.bf16.msra.mxu0 %v3467_v54  ;;  %v3428_v53 = vld [vmem:[%s4432_s1 + $0x140] sm:$0xff]  ;;  %v3139_v63 = vld [vmem:[%s3756_s25 + $0x50] sm:$0xf] }
  0x80   : > { %1277 = vmatmul.bf16.gmra.mxu3 %v2868_v15  ;;  %v3460_v54 = vld [vmem:[%s4432_s1 + $0x200] sm:$0xff]  ;;  %v1981_v15 = vshll.u32 %v3187_v6, 16 }
  0x81   : > { %1142 = vmatmul.bf16.gmra.mxu2 %v1070_v14  ;;  %v1978_v14 = vshrl.u32 %v3187_v6, 16 }
  0x82   : > { %v1983_v28 = vrot.slane %v1981_v15, 5 }
  0x83   : > { %1641 = vmatpush.bf16.msra.mxu1 %v3434_v0  ;;  %2157 = vmatpush.bf16.msra.mxu0 %v3466_v1  ;;  %v3448_v0 = vld [vmem:[%s3756_s25 + $0x54] sm:$0xf0]  ;;  %v3068_v1 = vor.u32 %v3436_v62, %v3067_v61  ;;  %v1980_v27 = vrot.slane %v1978_v14, 4  ;;  %v1479_v61 = vshll.u32 %v2981_v56, 16  ;;  %v1490_v62 = vshrl.u32 %v2983_v57, 16 }
  0x84   : > { %v3140_v3 = vor.u32 %v3448_v0, %v3139_v63  ;;  %v1493_v63 = vshll.u32 %v2983_v57, 16 }
  0x85   : > { %v1481_v11 = vrot.slane %v1479_v61, 5 }
  0x87   : > { %1642 = vmatpush.bf16.msra.mxu1 %v3433_v13  ;;  %2158 = vmatpush.bf16.msra.mxu0 %v3465_v16  ;;  %v1967_v13 = vshll.u32 %v3185_v5, 16  ;;  %v2978_v16 = vld [vmem:[%s3756_s25 + $0x94] sm:$0x1]  ;;  %v1995_v5 = vshll.u32 %v3189_v58, 16 }
  0x88   : > { %v1457_v33 = vshll.u32 %v2978_v16, 16 }
  0x89   : > { %v1969_v26 = vrot.slane %v1967_v13, 5  ;;  %v1495_v13 = vrot.slane %v1493_v63, 5 }
  0x8b   : > { %1643 = vmatpush.bf16.msra.mxu1 %v3432_v24  ;;  %2159 = vmatpush.bf16.msra.mxu0 %v3464_v25  ;;  %v3188_v24 = vld [vmem:[%s3756_s25 + $0x14] sm:$0x1]  ;;  %v1966_v25 = vrot.slane %v1964_v12, 4  ;;  %v1492_v12 = vrot.slane %v1490_v62, 4 }
  0x8c   : > { %v1987_v37 = vshll.u32 %v3188_v24, 16 }
  0x8d   : > { %v1970_v40 = vor.u32 %v1969_v26, %v1966_v25  ;;  %v1485_v25 = vshll.u32 %v2982_v8, 16 }
  0x8e   : > { %896 = vmatmul.bf16.gmra.mxu1 %v2744_v42  ;;  %1407 = vmatmul.bf16.gmra.mxu0 %v2936_v43  ;;  %v3071_v42 = vld [vmem:[%s3756_s25 + $0x18] sm:$0xf]  ;;  %v3437_v43 = vld [vmem:[%s3756_s25 + $0x1c] sm:$0xf0]  ;;  %v1989_v51 = vrot.slane %v1987_v37, 5 }
  0x8f   : > { %1644 = vmatpush.bf16.msra.mxu1 %v3431_v31  ;;  %2160 = vmatpush.bf16.msra.mxu0 %v3463_v35  ;;  %v3419_v31 = vld [vmem:[%s3756_s25 + $0x10c] sm:$0xf0]  ;;  %v1468_v35 = vor.u32 %v1467_v22, %v1464_v21  ;;  %v1994_v21 = vrot.slane %v1992_v4, 4  ;;  %v1997_v22 = vrot.slane %v1995_v5, 5  ;;  %v2988_v4 = vld [vmem:[%s3756_s25 + $0xbc] sm:$0x1] }
  0x90   : > { %1282 = vmatmul.bf16.gmra.mxu3 %v2872_v49  ;;  %v2944_v39 = vor.u32 %v3419_v31, %v2943_v30  ;;  %v2001_v31 = vshll.u32 %v3190_v19, 16  ;;  %v3147_v37 = vld [vmem:[%s3756_s25 + $0x70] sm:$0xf] }
  0x91   : > { %1147 = vmatmul.bf16.gmra.mxu2 %v1071_v47  ;;  %v1459_v47 = vrot.slane %v1457_v33, 5  ;;  %v1469_v49 = vrot.slane %v1468_v35, 4  ;;  %v3075_v33 = vld [vmem:[%s3756_s25 + $0x28] sm:$0xf]  ;;  %v1998_v35 = vor.u32 %v1997_v22, %v1994_v21  ;;  %v1527_v21 = vshll.u32 %v2988_v4, 16 }
  0x92   : > { %v3076_v44 = vor.u32 %v3438_v34, %v3075_v33 }
  0x93   : > { %1645 = vmatpush.bf16.msra.mxu1 %v3430_v41  ;;  %2161 = vmatpush.bf16.msra.mxu0 %v3462_v46  ;;  %v1984_v41 = vor.u32 %v1983_v28, %v1980_v27  ;;  %v1455_v46 = vrot.slane %v1454_v32, 4  ;;  %v1496_v27 = vor.u32 %v1495_v13, %v1492_v12  ;;  %v1499_v28 = vshll.u32 %v2984_v18, 16 }
  0x94   : > { %v2015_v32 = vshll.u32 %v3192_v20, 16 }
  0x95   : > { %v1460_v0 = vsel %vm3789_vm2, %v1455_v46, %v1459_v47  ;;  %v2003_v46 = vrot.slane %v2001_v31, 5  ;;  %v3151_v31 = vld [vmem:[%s3756_s25 + $0x80] sm:$0xf] }
  0x96   : > { %v1576_v14 = vunpack.c.l.b16 %v1460_v0  ;;  %v2017_v47 = vrot.slane %v2015_v32, 5  ;;  %v3451_v32 = vld [vmem:[%s3756_s25 + $0x84] sm:$0xf0] }
  0x97   : > { %1646 = vmatpush.bf16.msra.mxu1 %v3429_v50  ;;  %2162 = vmatpush.bf16.msra.mxu0 %v3461_v52  ;;  %v1975_v50 = vrot.slane %v1973_v36, 5  ;;  %v3072_v52 = vor.u32 %v3437_v43, %v3071_v42  ;;  %v1497_v42 = vrot.slane %v1496_v27, 4  ;;  %v1501_v43 = vrot.slane %v1499_v28, 5  ;;  %v3079_v28 = vld [vmem:[%s3756_s25 + $0x38] sm:$0xf] }
  0x99   : > { %v1502_v62 = vsel %vm3789_vm2, %v1497_v42, %v1501_v43  ;;  %v2989_v42 = vld [vmem:[%s3756_s25 + $0xc0] sm:$0xf]  ;;  %v2991_v43 = vld [vmem:[%s3756_s25 + $0xc8] sm:$0xf] }
  0x9b   : > { %1647 = vmatpush.bf16.msra.mxu1 %v3428_v53  ;;  %2163 = vmatpush.bf16.msra.mxu0 %v3460_v54  ;;  %v1971_v53 = vrot.slane %v1970_v40, 4  ;;  %v1985_v54 = vrot.slane %v1984_v41, 4  ;;  %v2985_v40 = vld [vmem:[%s3756_s25 + $0xb0] sm:$0xf] }
  0x9d   : > { %v1976_v2 = vsel %vm3789_vm2, %v1971_v53, %v1975_v50  ;;  %v3195_v50 = vld [vmem:[%s3756_s25 + $0x30] sm:$0xf]  ;;  %v1504_v53 = vshrl.u32 %v2985_v40, 16 }
  0x9e   : > { %901 = vmatmul.bf16.gmra.mxu1 %v2748_v59  ;;  %1412 = vmatmul.bf16.gmra.mxu0 %v2940_v60  ;;  %v3191_v59 = vld [vmem:[%s3756_s25 + $0x20] sm:$0xf]  ;;  %v1476_v60 = vshrl.u32 %v2981_v56, 16  ;;  %v2092_v16 = vunpack.c.l.b16 %v1976_v2  ;;  %v1521_v56 = vshll.u32 %v2987_v45, 16 }
  0x9f   : > { %v2006_v6 = vshrl.u32 %v3191_v59, 16  ;;  %v2009_v7 = vshll.u32 %v3191_v59, 16  ;;  %v2034_v59 = vshrl.u32 %v3195_v50, 16 }
  0xa0   : > { %1918 = vmatmul.bf16.vlgmr.msrb.gmra.mxu3 %v3140_v3  ;;  %v1990_v3 = vsel %vm3789_vm2, %v1985_v54, %v1989_v51  ;;  %v1478_v9 = vrot.slane %v1476_v60, 4  ;;  %v1999_v51 = vrot.slane %v1998_v35, 4  ;;  %v1507_v54 = vshll.u32 %v2985_v40, 16 }
  0xa1   : > { %1783 = vmatmul.bf16.vlgmr.msrb.gmra.mxu2 %v3068_v1  ;;  %v1474_v1 = vsel %vm3789_vm2, %v1469_v49, %v1473_v48  ;;  %v2093_v17 = vunpack.c.l.b16 %v1990_v3  ;;  %v2008_v23 = vrot.slane %v2006_v6, 4  ;;  %v2011_v24 = vrot.slane %v2009_v7, 5  ;;  %v3193_v49 = vld [vmem:[%s3756_s25 + $0x28] sm:$0xf]  ;;  %v2986_v3 = vld [vmem:[%s3756_s25 + $0xb4] sm:$0x1] }
  0xa2   : > { %v1577_v15 = vunpack.c.l.b16 %v1474_v1  ;;  %v1482_v26 = vor.u32 %v1481_v11, %v1478_v9  ;;  %v2020_v57 = vshrl.u32 %v3193_v49, 16  ;;  %v2023_v58 = vshll.u32 %v3193_v49, 16  ;;  %v3194_v7 = vld [vmem:[%s3756_s25 + $0x2c] sm:$0x1] }
  0xa3   : > { %v2100_v30 = vpack.c.b16 %v2093_v17, %v2092_v16  ;;  %v2012_v36 = vor.u32 %v2011_v24, %v2008_v23  ;;  %v2037_v60 = vshll.u32 %v3195_v50, 16  ;;  %v2004_v63 = vsel %vm3789_vm2, %v1999_v51, %v2003_v46  ;;  %v3196_v17 = vld [vmem:[%s3756_s25 + $0x34] sm:$0x1] }
  0xa4   : > { %v1584_v29 = vpack.c.b16 %v1577_v15, %v1576_v14  ;;  %v1483_v41 = vrot.slane %v1482_v26, 4  ;;  %v1506_v1 = vrot.slane %v1504_v53, 4  ;;  %v1509_v2 = vrot.slane %v1507_v54, 5 }
  0xa5   : > { %v1523_v6 = vrot.slane %v1521_v56, 5  ;;  %v2022_v8 = vrot.slane %v2020_v57, 4  ;;  %v2025_v9 = vrot.slane %v2023_v58, 5  ;;  %v2036_v11 = vrot.slane %v2034_v59, 4 }
  0xa6   : > { %v2039_v12 = vrot.slane %v2037_v60, 5  ;;  %v1579_v14 = vunpack.c.l.b16 %v1502_v62  ;;  %v2094_v15 = vunpack.c.l.b16 %v2004_v63  ;;  %v1510_v18 = vor.u32 %v1509_v2, %v1506_v1  ;;  %v2990_v62 = vld [vmem:[%s3756_s25 + $0xc4] sm:$0x1] }
  0xa7   : > { %v1513_v19 = vshll.u32 %v2986_v3, 16  ;;  %v2029_v22 = vshll.u32 %v3194_v7, 16  ;;  %v2026_v23 = vor.u32 %v2025_v9, %v2022_v8  ;;  %v1529_v35 = vrot.slane %v1527_v21, 5  ;;  %v2992_v3 = vld [vmem:[%s3756_s25 + $0xcc] sm:$0x1] }
  0xa8   : > { %v2040_v24 = vor.u32 %v2039_v12, %v2036_v11  ;;  %v1532_v50 = vshrl.u32 %v2989_v42, 16  ;;  %v1535_v51 = vshll.u32 %v2989_v42, 16  ;;  %v1549_v53 = vshll.u32 %v2991_v43, 16  ;;  %v3198_v8 = vld [vmem:[%s3756_s25 + $0x3c] sm:$0x1] }
  0xa9   : > { %v1515_v33 = vrot.slane %v1513_v19, 5  ;;  %v3200_v9 = vld [vmem:[%s3756_s25 + $0x44] sm:$0x1] }
  0xaa   : > { %v1534_v63 = vrot.slane %v1532_v50, 4  ;;  %v1551_v2 = vrot.slane %v1549_v53, 5 }
  0xae   : > { %906 = vmatmul.bf16.gmra.mxu1 %v2752_v38  ;;  %1417 = vmatmul.bf16.gmra.mxu0 %v2944_v39  ;;  %v3450_v38 = vld [vmem:[%s3756_s25 + $0x74] sm:$0xf0]  ;;  %v1487_v39 = vrot.slane %v1485_v25, 5  ;;  %v2043_v25 = vshll.u32 %v3196_v17, 16 }
  0xaf   : > { %v3148_v48 = vor.u32 %v3450_v38, %v3147_v37  ;;  %v2027_v37 = vrot.slane %v2026_v23, 4  ;;  %v2041_v38 = vrot.slane %v2040_v24, 4 }
  0xb0   : > { %1923 = vmatmul.bf16.gmra.mxu3 %v3144_v55  ;;  %v1518_v55 = vshrl.u32 %v2987_v45, 16  ;;  %v1488_v61 = vsel %vm3789_vm2, %v1483_v41, %v1487_v39  ;;  %v2045_v39 = vrot.slane %v2043_v25, 5  ;;  %v3152_v41 = vor.u32 %v3451_v32, %v3151_v31  ;;  %v3199_v45 = vld [vmem:[%s3756_s25 + $0x40] sm:$0xf] }
  0xb1   : > { %1788 = vmatmul.bf16.gmra.mxu2 %v3072_v52  ;;  %v2013_v52 = vrot.slane %v2012_v36, 4  ;;  %v1578_v13 = vunpack.c.l.b16 %v1488_v61  ;;  %v2031_v36 = vrot.slane %v2029_v22, 5  ;;  %v2062_v56 = vshrl.u32 %v3199_v45, 16 }
  0xb2   : > { %v1520_v5 = vrot.slane %v1518_v55, 4  ;;  %v2046_v49 = vsel %vm3789_vm2, %v2041_v38, %v2045_v39  ;;  %v2065_v57 = vshll.u32 %v3199_v45, 16  ;;  %v2071_v22 = vshll.u32 %v3200_v9, 16 }
  0xb3   : > { %v2018_v0 = vsel %vm3789_vm2, %v2013_v52, %v2017_v47  ;;  %v1585_v26 = vpack.c.b16 %v1579_v14, %v1578_v13  ;;  %v1546_v52 = vshrl.u32 %v2991_v43, 16  ;;  %v2097_v61 = vunpack.c.l.b16 %v2046_v49 }
  0xb4   : > { %v2095_v16 = vunpack.c.l.b16 %v2018_v0  ;;  %v1524_v20 = vor.u32 %v1523_v6, %v1520_v5  ;;  %v1537_v0 = vrot.slane %v1535_v51, 5  ;;  %v2064_v6 = vrot.slane %v2062_v56, 4 }
  0xb5   : > { %v1548_v1 = vrot.slane %v1546_v52, 4  ;;  %v2067_v7 = vrot.slane %v2065_v57, 5  ;;  %v1541_v14 = vshll.u32 %v2990_v62, 16 }
  0xb6   : > { %v2101_v27 = vpack.c.b16 %v2095_v16, %v2094_v15  ;;  %v1525_v34 = vrot.slane %v1524_v20, 4  ;;  %v1538_v13 = vor.u32 %v1537_v0, %v1534_v63  ;;  %v1555_v16 = vshll.u32 %v2992_v3, 16 }
  0xb7   : > { %v1552_v15 = vor.u32 %v1551_v2, %v1548_v1  ;;  %v2057_v20 = vshll.u32 %v3198_v8, 16  ;;  %v2068_v21 = vor.u32 %v2067_v7, %v2064_v6  ;;  %v1543_v24 = vrot.slane %v1541_v14, 5  ;;  %v3307_v6 = vld [vmem:[%s4434_s3 + $0x70] sm:$0xf]  ;;  %v3483_v7 = vld [vmem:[%s4434_s3 + $0x74] sm:$0xf0] }
  0xb8   : > { %v1530_v47 = vsel %vm3789_vm2, %v1525_v34, %v1529_v35  ;;  %v1539_v23 = vrot.slane %v1538_v13, 4  ;;  %v3482_v8 = vld [vmem:[%s4434_s3 + $0x74] sm:$0xf]  ;;  %v3308_v9 = vor.u32 %v3483_v7, %v3307_v6 }
  0xb9   : > { %v1581_v59 = vunpack.c.l.b16 %v1530_v47  ;;  %v1553_v25 = vrot.slane %v1552_v15, 4  ;;  %v3494_v7 = vld [vmem:[%s4437_s6 + $0x34] sm:$0xf] }
  0xba   : > { %2319 = vmatpush.bf16.msrb.mxu1 %v3308_v9  ;;  %3504 = vmatpush.bf16.msra.mxu3 %v3308_v9 }
  0xbe   : > { %1648 = vmatmul.bf16.vlgmr.msra.gmra.mxu1 %v1584_v29  ;;  %2164 = vmatmul.bf16.vlgmr.msra.gmra.mxu0 %v2100_v30  ;;  %v3439_v29 = vld [vmem:[%s3756_s25 + $0x3c] sm:$0xf0]  ;;  %v1511_v30 = vrot.slane %v1510_v18, 4 }
  0xbf   : > { %v3080_v40 = vor.u32 %v3439_v29, %v3079_v28  ;;  %v2059_v28 = vrot.slane %v2057_v20, 5  ;;  %v2069_v29 = vrot.slane %v2068_v21, 4  ;;  %v3480_v20 = vld [vmem:[%s4434_s3 + $0x64] sm:$0xf] }
  0xc0   : > { %1928 = vmatmul.bf16.gmra.mxu3 %v3148_v48  ;;  %v1516_v46 = vsel %vm3789_vm2, %v1511_v30, %v1515_v33  ;;  %v2032_v48 = vsel %vm3789_vm2, %v2027_v37, %v2031_v36  ;;  %v2073_v30 = vrot.slane %v2071_v22, 5  ;;  %v1544_v33 = vsel %vm3789_vm2, %v1539_v23, %v1543_v24  ;;  %v3301_v22 = vld [vmem:[%s4434_s3 + $0x68] sm:$0xf0]  ;;  %v3291_v24 = vld [vmem:[%s4434_s3 + $0x50] sm:$0xf] }
  0xc1   : > { %1793 = vmatmul.bf16.gmra.mxu2 %v3076_v44  ;;  %v3197_v44 = vld [vmem:[%s3756_s25 + $0x38] sm:$0xf]  ;;  %v1580_v58 = vunpack.c.l.b16 %v1516_v46  ;;  %v2096_v60 = vunpack.c.l.b16 %v2032_v48  ;;  %v1582_v39 = vunpack.c.l.b16 %v1544_v33  ;;  %v3304_v23 = vor.u32 %v3480_v20, %v3301_v22  ;;  %v3261_v20 = vld [vmem:[%s4434_s3 + $0x18] sm:$0xf0]  ;;  %v3492_v22 = vld [vmem:[%s4437_s6 + $0x24] sm:$0xf] }
  0xc2   : > { %v2048_v54 = vshrl.u32 %v3197_v44, 16  ;;  %v2051_v55 = vshll.u32 %v3197_v44, 16  ;;  %v2074_v36 = vsel %vm3789_vm2, %v2069_v29, %v2073_v30  ;;  %s3371_s25 = sshll.u32 %s4446_s10, 4 }
  0xc3   : > { %v1586_v11 = vpack.c.b16 %v1581_v59, %v1580_v58  ;;  %v2102_v12 = vpack.c.b16 %v2097_v61, %v2096_v60  ;;  %v2099_v42 = vunpack.c.l.b16 %v2074_v36  ;;  %s4389_s23 = scalar_lea.vmem %s4439_s8, %s3371_s25 }
  0xc4   : > { %v2050_v4 = vrot.slane %v2048_v54, 4  ;;  %v2053_v5 = vrot.slane %v2051_v55, 5 }
  0xc6   : > { %v2054_v19 = vor.u32 %v2053_v5, %v2050_v4 }
  0xce   : > { %1653 = vmatmul.bf16.gmra.mxu1 %v1585_v26  ;;  %2169 = vmatmul.bf16.gmra.mxu0 %v2101_v27  ;;  %v1557_v26 = vrot.slane %v1555_v16, 5  ;;  %v2055_v27 = vrot.slane %v2054_v19, 4  ;;  %v3481_v19 = vld [vmem:[%s4434_s3 + $0x64] sm:$0xf0] }
  0xd0   : > { %1933 = vmatmul.bf16.gmra.mxu3 %v3152_v41  ;;  %v1558_v34 = vsel %vm3789_vm2, %v1553_v25, %v1557_v26  ;;  %v2060_v35 = vsel %vm3789_vm2, %v2055_v27, %v2059_v28  ;;  %v3479_v25 = vld [vmem:[%s4434_s3 + $0x54] sm:$0xf0]  ;;  %v3478_v26 = vld [vmem:[%s4434_s3 + $0x54] sm:$0xf]  ;;  %v3293_v28 = vld [vmem:[%s4434_s3 + $0x58] sm:$0xf0] }
  0xd1   : > { %1798 = vmatmul.bf16.gmra.mxu2 %v3080_v40  ;;  %v1583_v40 = vunpack.c.l.b16 %v1558_v34  ;;  %v2098_v41 = vunpack.c.l.b16 %v2060_v35  ;;  %v3292_v27 = vor.u32 %v3479_v25, %v3291_v24  ;;  %v3296_v30 = vor.u32 %v3478_v26, %v3293_v28  ;;  %v3251_v28 = vld [vmem:[%s4434_s3] sm:$0xf] }
  0xd3   : > { %v1587_v43 = vpack.c.b16 %v1583_v40, %v1582_v39  ;;  %v2103_v44 = vpack.c.b16 %v2099_v42, %v2098_v41  ;;  %v3476_v39 = vld [vmem:[%s4434_s3 + $0x44] sm:$0xf] }
  0xdb   : > { %v791_v17 = vpop.f32.mrf.mxu0  ;;  %v4084_v18 = vpop.f32.mrf.mxu1 }
  0xde   : > { %1658 = vmatmul.bf16.gmra.mxu1 %v1586_v11  ;;  %2174 = vmatmul.bf16.gmra.mxu0 %v2102_v12  ;;  %v3309_v11 = vld [vmem:[%s4434_s3 + $0x78] sm:$0xf0] }
  0xdf   : > { %v3312_v14 = vor.u32 %v3482_v8, %v3309_v11  ;;  %v3357_v8 = vld [vmem:[%s4437_s6 + $0x38] sm:$0xf0]  ;;  %v3259_v11 = vld [vmem:[%s4434_s3 + $0x10] sm:$0xf] }
  0xe0   : > { %v3360_v9 = vor.u32 %v3494_v7, %v3357_v8 }
  0xe1   : > { %2348 = vmatpush.bf16.msra.mxu2 %v3312_v14  ;;  %v3471_v14 = vld [vmem:[%s4434_s3 + $0x14] sm:$0xf0] }
  0xe2   : > { %2505 = vmatpush.bf16.msrb.mxu0 %v3360_v9 }
  0xe3   : > { %v4086_v31 = vpop.f32.mrf.mxu0  ;;  %v4088_v32 = vpop.f32.mrf.mxu1 }
  0xe4   : > { %v1133_v37 = vpop.f32.mrf.mxu2  ;;  %v1268_v38 = vpop.f32.mrf.mxu3 }
  0xe5   : > { %2349 = vmatpush.bf16.msra.mxu2 %v3304_v23  ;;  %v3349_v23 = vld [vmem:[%s4437_s6 + $0x28] sm:$0xf0] }
  0xe6   : > { %v3352_v26 = vor.u32 %v3492_v22, %v3349_v23 }
  0xe8   : > { %2506 = vmatpush.bf16.msrb.mxu0 %v3352_v26 }
  0xe9   : > { %2350 = vmatpush.bf16.msra.mxu2 %v3296_v30  ;;  %v3469_v30 = vld [vmem:[%s4434_s3 + $0x4] sm:$0xf0] }
  0xeb   : > { %v796_v45 = vpop.f32.mrf.mxu0  ;;  %v4098_v46 = vpop.f32.mrf.mxu1 }
  0xec   : > { %v4100_v47 = vpop.f32.mrf.mxu2  ;;  %v4102_v48 = vpop.f32.mrf.mxu3 }
  0xee   : > { %1663 = vmatmul.bf16.gmra.mxu1 %v1587_v43  ;;  %2179 = vmatmul.bf16.gmra.mxu0 %v2103_v44  ;;  %v3275_v44 = vld [vmem:[%s4434_s3 + $0x30] sm:$0xf] }
  0xf3   : > { %v4104_v49 = vpop.f32.mrf.mxu0  ;;  %v4106_v10 = vpop.f32.mrf.mxu1 }
  0xf4   : > { %v1138_v50 = vpop.f32.mrf.mxu2  ;;  %v1273_v51 = vpop.f32.mrf.mxu3 }
  0xfb   : > { %v892_v52 = vpop.f32.mrf.mxu1  ;;  %v1403_v53 = vpop.f32.mrf.mxu0 }
  0xfc   : > { %v893_v54 = vadd.f32 %v892_v52, %v791_v17  ;;  %v4108_v55 = vpop.f32.mrf.mxu2  ;;  %v4110_v57 = vpop.f32.mrf.mxu3  ;;  %v3299_v17 = vld [vmem:[%s4434_s3 + $0x60] sm:$0xf]  ;;  %v3277_v52 = vld [vmem:[%s4434_s3 + $0x38] sm:$0xf0] }
  0xfd   : > { %v3300_v21 = vor.u32 %v3481_v19, %v3299_v17  ;;  %v3470_v17 = vld [vmem:[%s4434_s3 + $0x14] sm:$0xf]  ;;  %v3260_v19 = vor.u32 %v3471_v14, %v3259_v11 }
  0xfe   : > { %v1153_v56 = vadd.f32 %v1133_v37, %v893_v54  ;;  %v3283_v37 = vld [vmem:[%s4434_s3 + $0x40] sm:$0xf] }
  0xff   : > { %2320 = vmatpush.bf16.msrb.mxu1 %v3300_v21  ;;  %3505 = vmatpush.bf16.msra.mxu3 %v3300_v21  ;;  %v3264_v21 = vor.u32 %v3470_v17, %v3261_v20 }
 0x100   : > { %v1288_v58 = vadd.f32 %v1268_v38, %v1153_v56  ;;  %v3477_v38 = vld [vmem:[%s4434_s3 + $0x44] sm:$0xf0] }
 0x101   : > { %v3284_v40 = vor.u32 %v3477_v38, %v3283_v37 }
 0x102   : > { %v4112_v59 = vadd.f32 %v1403_v53, %v1288_v58 }
 0x103   : > { %v4114_v60 = vpop.f32.mrf.mxu1  ;;  %v4116_v61 = vpop.f32.mrf.mxu0  ;;  %2321 = vmatpush.bf16.msrb.mxu1 %v3292_v27  ;;  %3506 = vmatpush.bf16.msra.mxu3 %v3292_v27 }
 0x104   : > { %v1143_v62 = vpop.f32.mrf.mxu2  ;;  %v1278_v63 = vpop.f32.mrf.mxu3 }
 0x107   : > { %2322 = vmatpush.bf16.msrb.mxu1 %v3284_v40  ;;  %3507 = vmatpush.bf16.msra.mxu3 %v3284_v40  ;;  %v3341_v40 = vld [vmem:[%s4437_s6 + $0x18] sm:$0xf0] }
 0x10b   : > { %v897_v0 = vpop.f32.mrf.mxu1  ;;  %v1408_v1 = vpop.f32.mrf.mxu0 }
 0x10c   : > { %v898_v2 = vadd.f32 %v897_v0, %v796_v45  ;;  %v4118_v5 = vpop.f32.mrf.mxu2  ;;  %v4134_v13 = vpop.f32.mrf.mxu3  ;;  %v3475_v45 = vld [vmem:[%s4434_s3 + $0x34] sm:$0xf0]  ;;  %v3473_v0 = vld [vmem:[%s4434_s3 + $0x24] sm:$0xf0] }
 0x10e   : > { %v1155_v3 = vadd.f32 %v1138_v50, %v898_v2  ;;  %v3474_v50 = vld [vmem:[%s4434_s3 + $0x34] sm:$0xf] }
 0x10f   : > { %v3280_v54 = vor.u32 %v3474_v50, %v3277_v52  ;;  %v4291_v52 = vld [vmem:[%s4286_s30] sm:$0xff] }
 0x110   : > { %v1290_v4 = vadd.f32 %v1273_v51, %v1155_v3  ;;  %v3276_v51 = vor.u32 %v3475_v45, %v3275_v44  ;;  %v3269_v3 = vld [vmem:[%s4434_s3 + $0x28] sm:$0xf0] }
 0x111   : > { %v3333_v44 = vld [vmem:[%s4437_s6 + $0x8] sm:$0xf0] }
 0x112   : > { %v4132_v12 = vadd.f32 %v1408_v1, %v1290_v4  ;;  %2323 = vmatpush.bf16.msrb.mxu1 %v3276_v51  ;;  %3508 = vmatpush.bf16.msra.mxu3 %v3276_v51  ;;  %v3472_v1 = vld [vmem:[%s4434_s3 + $0x24] sm:$0xf]  ;;  %v895_v51 = vadd.f32 %v4114_v60, %v4086_v31 }
 0x113   : > { %v4136_v15 = vpop.f32.mrf.mxu1  ;;  %v4138_v16 = vpop.f32.mrf.mxu0  ;;  %v3272_v6 = vor.u32 %v3472_v1, %v3269_v3 }
 0x114   : > { %v4164_v29 = vpop.f32.mrf.mxu2  ;;  %v4167_v36 = vpop.f32.mrf.mxu3 }
 0x11b   : > { %v902_v33 = vpop.f32.mrf.mxu1  ;;  %v1413_v34 = vpop.f32.mrf.mxu0 }
 0x11c   : > { %v903_v35 = vadd.f32 %v902_v33, %v4084_v18  ;;  %v3285_v18 = vld [vmem:[%s4434_s3 + $0x48] sm:$0xf0]  ;;  %v4217_v4 = vpop.f32.mrf.mxu3  ;;  %v3468_v33 = vld [vmem:[%s4434_s3 + $0x4] sm:$0xf] }
 0x11d   : > { %v3288_v42 = vor.u32 %v3476_v39, %v3285_v18  ;;  %v3490_v39 = vld [vmem:[%s4437_s6 + $0x14] sm:$0xf] }
 0x11e   : > { %v1157_v41 = vadd.f32 %v1143_v62, %v903_v35  ;;  %v4203_v62 = vpop.f32.mrf.mxu2  ;;  %v3344_v18 = vor.u32 %v3490_v39, %v3341_v40 }
 0x11f   : > { %2351 = vmatpush.bf16.msra.mxu2 %v3288_v42 }
 0x120   : > { %v1292_v43 = vadd.f32 %v1278_v63, %v1157_v41  ;;  %v3267_v63 = vld [vmem:[%s4434_s3 + $0x20] sm:$0xf]  ;;  %2507 = vmatpush.bf16.msrb.mxu0 %v3344_v18 }
 0x121   : > { %v3268_v2 = vor.u32 %v3473_v0, %v3267_v63  ;;  %v1154_v63 = vadd.f32 %v4100_v47, %v895_v51  ;;  %v900_v47 = vadd.f32 %v4136_v15, %v4104_v49 }
 0x122   : > { %v4193_v53 = vadd.f32 %v1413_v34, %v1292_v43  ;;  %v3252_v34 = vor.u32 %v3469_v30, %v3251_v28  ;;  %v3488_v43 = vld [vmem:[%s4437_s6 + $0x4] sm:$0xf] }
 0x123   : > { %v4195_v56 = vpop.f32.mrf.mxu1  ;;  %v4197_v58 = vpop.f32.mrf.mxu0  ;;  %2352 = vmatpush.bf16.msra.mxu2 %v3280_v54  ;;  %2324 = vmatpush.bf16.msrb.mxu1 %v3268_v2 }
 0x124   : > { %3509 = vmatpush.bf16.msra.mxu3 %v3268_v2  ;;  %v1919_v42 = vpop.f32.mrf.mxu3 }
 0x126   : > { %v1784_v37 = vpop.f32.mrf.mxu2 }
 0x127   : > { %2353 = vmatpush.bf16.msra.mxu2 %v3272_v6  ;;  %2325 = vmatpush.bf16.msrb.mxu1 %v3260_v19  ;;  %v1289_v6 = vadd.f32 %v4102_v48, %v1154_v63  ;;  %v4307_v48 = vld [vmem:[%s4286_s30 + $0x8] sm:$0xff] }
 0x128   : > { %3510 = vmatpush.bf16.msra.mxu3 %v3260_v19 }
 0x129   : > { %v1424_v60 = vadd.f32 %v4116_v61, %v1289_v6  ;;  %v1156_v61 = vadd.f32 %v4108_v55, %v900_v47  ;;  %v3355_v6 = vld [vmem:[%s4437_s6 + $0x30] sm:$0xf]  ;;  %v3491_v47 = vld [vmem:[%s4437_s6 + $0x14] sm:$0xf0] }
 0x12b   : > { %v907_v24 = vpop.f32.mrf.mxu1  ;;  %v1418_v25 = vpop.f32.mrf.mxu0  ;;  %2354 = vmatpush.bf16.msra.mxu2 %v3264_v21  ;;  %2326 = vmatpush.bf16.msrb.mxu1 %v3252_v34 }
 0x12c   : > { %v908_v27 = vadd.f32 %v907_v24, %v4098_v46  ;;  %v3253_v46 = vld [vmem:[%s4434_s3 + $0x8] sm:$0xf0]  ;;  %3511 = vmatpush.bf16.msra.mxu3 %v3252_v34  ;;  %v1921_v0 = vpop.f32.mrf.mxu3 }
 0x12d   : > { %v3256_v38 = vor.u32 %v3468_v33, %v3253_v46 }
 0x12e   : > { %v1159_v35 = vadd.f32 %v4164_v29, %v908_v27  ;;  %v1786_v54 = vpop.f32.mrf.mxu2  ;;  %v1291_v27 = vadd.f32 %v4110_v57, %v1156_v61  ;;  %v4320_v57 = vld [vmem:[%s4286_s30 + $0x10] sm:$0xff] }
 0x12f   : > { %2355 = vmatpush.bf16.msra.mxu2 %v3256_v38 }
 0x130   : > { %v1294_v41 = vadd.f32 %v4167_v36, %v1159_v35  ;;  %v3336_v36 = vor.u32 %v3488_v43, %v3333_v44  ;;  %v1426_v55 = vadd.f32 %v4138_v16, %v1291_v27 }
 0x132   : > { %v4271_v29 = vadd.f32 %v1418_v25, %v1294_v41  ;;  %2508 = vmatpush.bf16.msrb.mxu0 %v3336_v36 }
 0x133   : > { %3512 = vmatpush.bf16.msrb.mxu2 %v3360_v9  ;;  %v4279_v45 = vpop.f32.mrf.mxu1  ;;  %v4281_v50 = vpop.f32.mrf.mxu0 }
 0x134   : > { %v1924_v17 = vpop.f32.mrf.mxu3 }
 0x135   : > { %3365 = vmatmul.msk.bf16.vlgmr.msrb.gmra.mxu0 %vm2459_vm3, %v4291_v52 }
 0x136   : > { %v1789_v8 = vpop.f32.mrf.mxu2 }
 0x137   : > { %3513 = vmatpush.bf16.msrb.mxu2 %v3352_v26 }
 0x13b   : > { %3514 = vmatpush.bf16.msrb.mxu2 %v3344_v18  ;;  %v1649_v1 = vpop.f32.mrf.mxu1  ;;  %v2165_v2 = vpop.f32.mrf.mxu0 }
 0x13c   : > { %v1669_v3 = vadd.f32 %v1649_v1, %v4112_v59  ;;  %v4304_v59 = vld [vmem:[%s4433_s2] ss:$0 sm:$0xff]  ;;  %v1926_v34 = vpop.f32.mrf.mxu3 }
 0x13e   : > { %v1804_v31 = vadd.f32 %v1784_v37, %v1669_v3  ;;  %v1791_v26 = vpop.f32.mrf.mxu2 }
 0x13f   : > { %3515 = vmatpush.bf16.msrb.mxu2 %v3336_v36 }
 0x140   : > { %v1939_v7 = vadd.f32 %v1919_v42, %v1804_v31 }
 0x142   : > { %v2185_v19 = vadd.f32 %v2165_v2, %v1939_v7 }
 0x143   : > { %v1651_v9 = vpop.f32.mrf.mxu1  ;;  %v2167_v11 = vpop.f32.mrf.mxu0 }
 0x144   : > { %v1670_v14 = vadd.f32 %v1651_v9, %v1424_v60  ;;  %v2197_v22 = vadd.f32 %v4304_v59, %v2185_v19  ;;  %v1929_v43 = vpop.f32.mrf.mxu3 }
 0x145   : > { %3366 = vmatmul.msk.bf16.gmra.mxu0 %vm2459_vm3, %v4307_v48 }
 0x146   : > { %v1805_v20 = vadd.f32 %v1786_v54, %v1670_v14  ;;  %v2205_v28 = vmax.f32 %v2197_v22, 0.0  ;;  %v1794_v41 = vpop.f32.mrf.mxu2 }
 0x148   : > { %v1940_v21 = vadd.f32 %v1921_v0, %v1805_v20  ;;  %v910_v20 = vadd.f32 %v4279_v45, %v4106_v10 }
 0x14a   : > { %v2186_v23 = vadd.f32 %v2167_v11, %v1940_v21 }
 0x14b   : > { %v1654_v24 = vpop.f32.mrf.mxu1  ;;  %v2170_v49 = vpop.f32.mrf.mxu0 }
 0x14c   : > { %v2198_v15 = vadd.f32 %v4304_v59, %v2186_v23  ;;  %v1671_v25 = vadd.f32 %v1654_v24, %v4132_v12  ;;  %v905_v12 = vadd.f32 %v4195_v56, %v4088_v32  ;;  %v1931_v9 = vpop.f32.mrf.mxu3  ;;  %v3331_v24 = vld [vmem:[%s4437_s6] sm:$0xf] }
 0x14e   : > { %v2206_v30 = vmax.f32 %v2198_v15, 0.0  ;;  %v1806_v33 = vadd.f32 %v1789_v8, %v1671_v25  ;;  %v1158_v16 = vadd.f32 %v4118_v5, %v905_v12  ;;  %v3495_v5 = vld [vmem:[%s4437_s6 + $0x34] sm:$0xf0]  ;;  %v1796_v31 = vpop.f32.mrf.mxu2  ;;  %v1160_v15 = vadd.f32 %v4203_v62, %v910_v20 }
 0x14f   : > { %v3356_v60 = vor.u32 %v3495_v5, %v3355_v6 }
 0x150   : > { %v2213_v46 = vpack.c.bf16 %v2206_v30, %v2205_v28  ;;  %v1941_v35 = vadd.f32 %v1924_v17, %v1806_v33  ;;  %v1293_v56 = vadd.f32 %v4134_v13, %v1158_v16  ;;  %v3347_v13 = vld [vmem:[%s4437_s6 + $0x20] sm:$0xf] }
 0x151   : > { %2476 = vmatpush.bf16.msrb.mxu3 %v3356_v60 }
 0x152   : > { %2327 = vmatmul.bf16.vlgmr.msrb.gmra.mxu1 %v2213_v46  ;;  %2356 = vmatmul.bf16.vlgmr.msra.gmra.mxu2 %v2213_v46  ;;  %v2187_v40 = vadd.f32 %v2170_v49, %v1941_v35  ;;  %v1428_v7 = vadd.f32 %v4197_v58, %v1293_v56  ;;  %v3339_v58 = vld [vmem:[%s4437_s6 + $0x10] sm:$0xf]  ;;  %v3489_v49 = vld [vmem:[%s4437_s6 + $0x4] sm:$0xf0] }
 0x153   : > { %v1656_v37 = vpop.f32.mrf.mxu1  ;;  %v2172_v38 = vpop.f32.mrf.mxu0  ;;  %v3340_v22 = vor.u32 %v3491_v47, %v3339_v58  ;;  %v3332_v45 = vor.u32 %v3489_v49, %v3331_v24 }
 0x154   : > { %v1672_v39 = vadd.f32 %v1656_v37, %v1426_v55  ;;  %v2199_v44 = vadd.f32 %v4304_v59, %v2187_v40  ;;  %v1934_v33 = vpop.f32.mrf.mxu3 }
 0x155   : > { %3367 = vmatmul.msk.bf16.gmra.mxu0 %vm2459_vm3, %v4320_v57 }
 0x156   : > { %v1807_v18 = vadd.f32 %v1791_v26, %v1672_v39  ;;  %v2207_v0 = vmax.f32 %v2199_v44, 0.0  ;;  %v1799_v27 = vpop.f32.mrf.mxu2 }
 0x158   : > { %v1942_v42 = vadd.f32 %v1926_v34, %v1807_v18  ;;  %v1295_v34 = vadd.f32 %v4217_v4, %v1160_v15 }
 0x15a   : > { %v2188_v36 = vadd.f32 %v2172_v38, %v1942_v42  ;;  %v1430_v38 = vadd.f32 %v4281_v50, %v1295_v34 }
 0x15b   : > { %v1659_v51 = vpop.f32.mrf.mxu1  ;;  %v2175_v54 = vpop.f32.mrf.mxu0 }
 0x15c   : > { %v2200_v63 = vadd.f32 %v4304_v59, %v2188_v36  ;;  %v1673_v32 = vadd.f32 %v1659_v51, %v4193_v53  ;;  %v3493_v53 = vld [vmem:[%s4437_s6 + $0x24] sm:$0xf0]  ;;  %v1936_v42 = vpop.f32.mrf.mxu3 }
 0x15d   : > { %v3348_v14 = vor.u32 %v3493_v53, %v3347_v13 }
 0x15e   : > { %v2208_v1 = vmax.f32 %v2200_v63, 0.0  ;;  %v1808_v2 = vadd.f32 %v1794_v41, %v1673_v32  ;;  %v1801_v18 = vpop.f32.mrf.mxu2  ;;  %v3487_v63 = vld [vmem:[%s4286_s30 + $0x18] sm:$0xff]  ;;  %v2393_v32 = vld [vmem:[%s4438_s7] sm:$0x3] }
 0x15f   : > { %2477 = vmatpush.bf16.msrb.mxu3 %v3348_v14  ;;  %v4376_v56 = vperm.slane %v2393_v32, 1 }
 0x160   : > { %v2214_v3 = vpack.c.bf16 %v2208_v1, %v2207_v0  ;;  %v1943_v8 = vadd.f32 %v1929_v43, %v1808_v2 }
 0x162   : > { %2332 = vmatmul.bf16.gmra.mxu1 %v2214_v3  ;;  %2361 = vmatmul.bf16.gmra.mxu2 %v2214_v3  ;;  %v2189_v21 = vadd.f32 %v2175_v54, %v1943_v8 }
 0x163   : > { %v1661_v11 = vpop.f32.mrf.mxu1  ;;  %v2177_v19 = vpop.f32.mrf.mxu0  ;;  %2478 = vmatpush.bf16.msrb.mxu3 %v3340_v22 }
 0x164   : > { %v1674_v17 = vadd.f32 %v1661_v11, %v1428_v7  ;;  %v2201_v25 = vadd.f32 %v4304_v59, %v2189_v21 }
 0x166   : > { %v1809_v61 = vadd.f32 %v1796_v31, %v1674_v17  ;;  %v2209_v46 = vmax.f32 %v2201_v25, 0.0 }
 0x167   : > { %2479 = vmatpush.bf16.msrb.mxu3 %v3332_v45 }
 0x168   : > { %v1944_v23 = vadd.f32 %v1931_v9, %v1809_v61 }
 0x16a   : > { %v2190_v26 = vadd.f32 %v2177_v19, %v1944_v23 }
 0x16b   : > { %v1664_v10 = vpop.f32.mrf.mxu1  ;;  %v2180_v37 = vpop.f32.mrf.mxu0 }
 0x16c   : > { %v2202_v28 = vadd.f32 %v4304_v59, %v2190_v26  ;;  %v1675_v30 = vadd.f32 %v1664_v10, %v4271_v29 }
 0x16e   : > { %v2210_v55 = vmax.f32 %v2202_v28, 0.0  ;;  %v1810_v35 = vadd.f32 %v1799_v27, %v1675_v30 }
 0x170   : > { %v2215_v62 = vpack.c.bf16 %v2210_v55, %v2209_v46  ;;  %v1945_v39 = vadd.f32 %v1934_v33, %v1810_v35 }
 0x172   : > { %2337 = vmatmul.bf16.gmra.mxu1 %v2215_v62  ;;  %2366 = vmatmul.bf16.gmra.mxu2 %v2215_v62  ;;  %v2191_v41 = vadd.f32 %v2180_v37, %v1945_v39 }
 0x173   : > { %v1666_v12 = vpop.f32.mrf.mxu1  ;;  %v2182_v4 = vpop.f32.mrf.mxu0 }
 0x174   : > { %v1676_v40 = vadd.f32 %v1666_v12, %v1430_v38  ;;  %v2203_v16 = vadd.f32 %v4304_v59, %v2191_v41  ;;  %v2395_v12 = vperm.slane %v2393_v32, 0 }
 0x176   : > { %v1811_v29 = vadd.f32 %v1801_v18, %v1676_v40  ;;  %v2211_v51 = vmax.f32 %v2203_v16, 0.0 }
 0x178   : > { %v1946_v43 = vadd.f32 %v1936_v42, %v1811_v29 }
 0x17a   : > { %v2192_v44 = vadd.f32 %v2182_v4, %v1946_v43 }
 0x17c   : > { %v2204_v36 = vadd.f32 %v4304_v59, %v2192_v44 }
 0x17e   : > { %v2212_v54 = vmax.f32 %v2204_v36, 0.0 }
 0x180   : > { %v2216_v50 = vpack.c.bf16 %v2212_v54, %v2211_v51 }
 0x182   : > { %2342 = vmatmul.bf16.vlgmr.msra.gmra.mxu3 %v2216_v50  ;;  %2371 = vmatmul.bf16.gmra.mxu2 %v2216_v50 }
 0x192   : > { %3361 = vmatmul.msk.bf16.vlgmr.msrb.gmra.mxu3 %vm2459_vm3, %v4291_v52  ;;  %3368 = vmatmul.msk.bf16.vlgmr.msrb.gmra.mxu2 %vm2459_vm3, %v3487_v63  ;;  %v2233_v52 = vld [vmem:[%s4435_s4] sm:$0x3] }
 0x193   : > { %v4381_v1 = vperm.slane %v2233_v52, 1  ;;  %v2235_v33 = vperm.slane %v2233_v52, 0 }
 0x1a2   : > { %3362 = vmatmul.msk.bf16.gmra.mxu3 %vm2459_vm3, %v4307_v48 }
 0x1b2   : > { %3363 = vmatmul.msk.bf16.gmra.mxu3 %vm2459_vm3, %v4320_v57  ;;  %v2510_v59 = vpop.f32.mrf.mxu0 }
 0x1b3   : > { %v2511_v48 = vadd.f32 %v2510_v59, %v4376_v56 }
 0x1ba   : > { %v2512_v0 = vpop.f32.mrf.mxu0 }
 0x1bb   : > { %v2513_v31 = vadd.f32 %v2512_v0, %v4376_v56 }
 0x1c2   : > { %3364 = vmatmul.msk.bf16.gmra.mxu3 %vm2459_vm3, %v3487_v63  ;;  %v2515_v5 = vpop.f32.mrf.mxu0 }
 0x1c3   : > { %v2516_v53 = vadd.f32 %v2515_v5, %v4376_v56 }
 0x1ca   : > { %v2517_v11 = vpop.f32.mrf.mxu0 }
 0x1cb   : > { %v2518_v47 = vadd.f32 %v2517_v11, %v4376_v56 }
 0x1cf   : > { %v2328_v35 = vpop.f32.mrf.mxu1 }
 0x1d0   : > { %v2329_v41 = vadd.f32 %v2328_v35, %v2235_v33 }
 0x1d2   : > { %v2520_v21 = vpop.f32.mrf.mxu0 }
 0x1d3   : > { %v2521_v23 = vadd.f32 %v2520_v21, %v4376_v56 }
 0x1d5   : > { %v2357_v2 = vpop.f32.mrf.mxu2 }
 0x1d6   : > { %v2358_v57 = vadd.f32 %v2357_v2, %v4381_v1 }
 0x1d7   : > { %v2330_v39 = vpop.f32.mrf.mxu1 }
 0x1d8   : > { %v2531_v3 = vadd.f32 %v2511_v48, %v2358_v57  ;;  %v2331_v63 = vadd.f32 %v2330_v39, %v2235_v33 }
 0x1da   : > { %v2547_v6 = vmax.f32 %v2531_v3, 0.0  ;;  %v2522_v25 = vpop.f32.mrf.mxu0 }
 0x1db   : > { %v2523_v27 = vadd.f32 %v2522_v25, %v4376_v56 }
 0x1dc   : > { %2563 = vst [vmem:[%s4389_s23 + $0x8] sm:$0xff] %v2547_v6 }
 0x1dd   : > { %v2359_v60 = vpop.f32.mrf.mxu2 }
 0x1de   : > { %v2360_v7 = vadd.f32 %v2359_v60, %v4381_v1 }
 0x1df   : > { %v2333_v51 = vpop.f32.mrf.mxu1 }
 0x1e0   : > { %v2533_v8 = vadd.f32 %v2513_v31, %v2360_v7  ;;  %v2334_v6 = vadd.f32 %v2333_v51, %v2235_v33 }
 0x1e2   : > { %v2549_v13 = vmax.f32 %v2533_v8, 0.0 }
 0x1e4   : > { %2565 = vst [vmem:[%s4389_s23 + $0x18] sm:$0xff] %v2549_v13 }
 0x1e5   : > { %v2362_v9 = vpop.f32.mrf.mxu2 }
 0x1e6   : > { %v2363_v14 = vadd.f32 %v2362_v9, %v4381_v1 }
 0x1e7   : > { %v2335_v31 = vpop.f32.mrf.mxu1 }
 0x1e8   : > { %v2535_v17 = vadd.f32 %v2516_v53, %v2363_v14 }
 0x1ea   : > { %v2551_v58 = vmax.f32 %v2535_v17, 0.0 }
 0x1ec   : > { %2567 = vst [vmem:[%s4389_s23 + $0x28] sm:$0xff] %v2551_v58 }
 0x1ed   : > { %v2364_v19 = vpop.f32.mrf.mxu2 }
 0x1ee   : > { %v2365_v20 = vadd.f32 %v2364_v19, %v4381_v1 }
 0x1f0   : > { %v2537_v61 = vadd.f32 %v2518_v47, %v2365_v20 }
 0x1f2   : > { %v2553_v22 = vmax.f32 %v2537_v61, 0.0 }
 0x1f4   : > { %2569 = vst [vmem:[%s4389_s23 + $0x38] sm:$0xff] %v2553_v22 }
 0x1f5   : > { %v2367_v24 = vpop.f32.mrf.mxu2 }
 0x1f6   : > { %v2368_v49 = vadd.f32 %v2367_v24, %v4381_v1 }
 0x1f8   : > { %v2539_v15 = vadd.f32 %v2521_v23, %v2368_v49 }
 0x1fa   : > { %v2555_v26 = vmax.f32 %v2539_v15, 0.0 }
 0x1fc   : > { %2571 = vst [vmem:[%s4389_s23 + $0x48] sm:$0xff] %v2555_v26 }
 0x1fd   : > { %v2369_v10 = vpop.f32.mrf.mxu2 }
 0x1fe   : > { %v2370_v45 = vadd.f32 %v2369_v10, %v4381_v1 }
 0x200   : > { %v2541_v28 = vadd.f32 %v2523_v27, %v2370_v45 }
 0x202   : > { %v2557_v30 = vmax.f32 %v2541_v28, 0.0 }
 0x204   : > { %2573 = vst [vmem:[%s4389_s23 + $0x58] sm:$0xff] %v2557_v30 }
 0x205   : > { %v2343_v34 = vpop.f32.mrf.mxu3  ;;  %v2372_v46 = vpop.f32.mrf.mxu2 }
 0x206   : > { %v2344_v55 = vadd.f32 %v2343_v34, %v2235_v33  ;;  %v2373_v29 = vadd.f32 %v2372_v46, %v4381_v1 }
 0x20d   : > { %v2345_v37 = vpop.f32.mrf.mxu3  ;;  %v2374_v62 = vpop.f32.mrf.mxu2 }
 0x20e   : > { %v2346_v38 = vadd.f32 %v2345_v37, %v2235_v33  ;;  %v2375_v59 = vadd.f32 %v2374_v62, %v4381_v1  ;;  %v2336_v1 = vadd.f32 %v2335_v31, %v2235_v33 }
 0x215   : > { %v2481_v40 = vpop.f32.mrf.mxu3  ;;  %v2525_v18 = vpop.f32.mrf.mxu2 }
 0x216   : > { %v2482_v42 = vadd.f32 %v2481_v40, %v2395_v12  ;;  %v2526_v43 = vadd.f32 %v2525_v18, %v4376_v56 }
 0x218   : > { %v2530_v4 = vadd.f32 %v2482_v42, %v2329_v41  ;;  %v2543_v16 = vadd.f32 %v2526_v43, %v2373_v29 }
 0x21a   : > { %v2546_v44 = vmax.f32 %v2530_v4, 0.0  ;;  %v2559_v36 = vmax.f32 %v2543_v16, 0.0 }
 0x21c   : > { %2562 = vst [vmem:[%s4389_s23] sm:$0xff] %v2546_v44 }
 0x21d   : > { %2575 = vst [vmem:[%s4389_s23 + $0x68] sm:$0xff] %v2559_v36  ;;  %v2483_v54 = vpop.f32.mrf.mxu3  ;;  %v2527_v50 = vpop.f32.mrf.mxu2 }
 0x21e   : > { %v2484_v32 = vadd.f32 %v2483_v54, %v2395_v12  ;;  %v2528_v52 = vadd.f32 %v2527_v50, %v4376_v56  ;;  %v2338_v56 = vpop.f32.mrf.mxu1 }
 0x21f   : > { %v2339_v14 = vadd.f32 %v2338_v56, %v2235_v33 }
 0x220   : > { %v2532_v0 = vadd.f32 %v2484_v32, %v2331_v63  ;;  %v2545_v48 = vadd.f32 %v2528_v52, %v2375_v59 }
 0x222   : > { %v2548_v2 = vmax.f32 %v2532_v0, 0.0  ;;  %v2561_v57 = vmax.f32 %v2545_v48, 0.0 }
 0x224   : > { %2564 = vst [vmem:[%s4389_s23 + $0x10] sm:$0xff] %v2548_v2 }
 0x225   : > { %2577 = vst [vmem:[%s4389_s23 + $0x78] sm:$0xff] %v2561_v57  ;;  %v2486_v3 = vpop.f32.mrf.mxu3 }
 0x226   : > { %v2487_v5 = vadd.f32 %v2486_v3, %v2395_v12  ;;  %v2340_v19 = vpop.f32.mrf.mxu1 }
 0x227   : > { %v2341_v21 = vadd.f32 %v2340_v19, %v2235_v33 }
 0x228   : > { %v2534_v60 = vadd.f32 %v2487_v5, %v2334_v6 }
 0x22a   : > { %v2550_v7 = vmax.f32 %v2534_v60, 0.0 }
 0x22c   : > { %2566 = vst [vmem:[%s4389_s23 + $0x20] sm:$0xff] %v2550_v7 }
 0x22d   : > { %v2488_v8 = vpop.f32.mrf.mxu3 }
 0x22e   : > { %v2489_v13 = vadd.f32 %v2488_v8, %v2395_v12 }
 0x230   : > { %v2536_v53 = vadd.f32 %v2489_v13, %v2336_v1 }
 0x232   : > { %v2552_v9 = vmax.f32 %v2536_v53, 0.0 }
 0x234   : > { %2568 = vst [vmem:[%s4389_s23 + $0x30] sm:$0xff] %v2552_v9 }
 0x235   : > { %v2491_v11 = vpop.f32.mrf.mxu3 }
 0x236   : > { %v2492_v17 = vadd.f32 %v2491_v11, %v2395_v12 }
 0x238   : > { %v2538_v58 = vadd.f32 %v2492_v17, %v2339_v14 }
 0x23a   : > { %v2554_v47 = vmax.f32 %v2538_v58, 0.0 }
 0x23c   : > { %2570 = vst [vmem:[%s4389_s23 + $0x40] sm:$0xff] %v2554_v47 }
 0x23d   : > { %v2493_v20 = vpop.f32.mrf.mxu3 }
 0x23e   : > { %v2494_v61 = vadd.f32 %v2493_v20, %v2395_v12 }
 0x240   : > { %v2540_v22 = vadd.f32 %v2494_v61, %v2341_v21 }
 0x242   : > { %v2556_v23 = vmax.f32 %v2540_v22, 0.0 }
 0x244   : > { %2572 = vst [vmem:[%s4389_s23 + $0x50] sm:$0xff] %v2556_v23 }
 0x245   : > { %v2496_v24 = vpop.f32.mrf.mxu3 }
 0x246   : > { %v2497_v49 = vadd.f32 %v2496_v24, %v2395_v12 }
 0x248   : > { %v2542_v15 = vadd.f32 %v2497_v49, %v2344_v55 }
 0x24a   : > { %v2558_v25 = vmax.f32 %v2542_v15, 0.0 }
 0x24c   : > { %2574 = vst [vmem:[%s4389_s23 + $0x60] sm:$0xff] %v2558_v25 }
 0x24d   : > { %v2498_v26 = vpop.f32.mrf.mxu3 }
 0x24e   : > { %v2499_v27 = vadd.f32 %v2498_v26, %v2395_v12 }
 0x250   : > { %v2544_v10 = vadd.f32 %v2499_v27, %v2346_v38 }
 0x252   : > { %v2560_v45 = vmax.f32 %v2544_v10, 0.0 }
 0x254   : > { %2576 = vst [vmem:[%s4389_s23 + $0x70] sm:$0xff] %v2560_v45 }
 0x255 PF: > { %p15_p9 = scmp.ge.s32.totalorder %s3630_s9, 4   ;;  %s4442_s27 = smov %s3562_s28 }
 0x256   : > { %s4443_s28 = smov %s3639_s12  ;;  %s4444_s29 = smov %s3630_s9 }
 0x257   :  { %17 = sbr.rel (!%p15_p9) target bundleno = 2 (0x2), region = 144 }

// kernel: run.7
= control target key start
LH: loop header
LB: loop body
LE: loop exit
PB: predicated region body
PF: predicated region fallthrough
CT: control target
= control target key end

     0   :  { %11 = vsyncpa [#allocation3], 0  ;;  %s3988_s0 = inlined_call_operand.vmem [shape: bf16[1,2,10,10,128], index: 0, kind: input, shape index: {}]   ;;  %s3989_s1 = inlined_call_operand.vmem [shape: bf16[9,128,128], index: 1, kind: input, shape index: {}]   ;;  %s3990_s2 = inlined_call_operand.vmem [shape: f32[1,128], index: 2, kind: input, shape index: {}]   ;;  %s3991_s3 = inlined_call_operand.vmem [shape: bf16[128,256], index: 3, kind: input, shape index: {}]   ;;  %s3992_s4 = inlined_call_operand.vmem [shape: f32[1,256], index: 4, kind: input, shape index: {}]   ;;  %s3993_s5 = inlined_call_operand.vmem [shape: f32[128,256], index: 5, kind: input, shape index: {}]   ;;  %s3994_s6 = inlined_call_operand.hbm [shape: f32[128,256], index: 6, kind: output, shape index: {}]  }
   0x1   :  { %13 = vsyncpa [#allocation3 + $0x1], 0  ;;  %s3162_s21 = smov 0   ;;  %s3164_s22 = smov 0  }
   0x2   :  { %s3166_s23 = smov 0   ;;  %s3168_s24 = smov 0  }
   0x3 LB: > { %s3183_s25 = sadd.s32 4294967295, %s3123_s24   ;;  %s2260_s26 = sadd.s32 4294967294, %s3123_s24   ;;  %s3123_s24 = sphi %s3168_s24, %s4004_s24   ;;  %s3119_s23 = sphi %s3166_s23, %s4003_s23   ;;  %s3115_s22 = sphi %s3164_s22, %s4002_s22   ;;  %s3111_s21 = sphi %s3162_s21, %s4001_s21  }
   0x4   : > { %s3187_s27 = sadd.s32 1, %s3123_s24   ;;  %s162_s28 = sadd.s32 1, %s3119_s23 }
   0x5   : > { %s159_s29 = ssub.s32 %s3123_s24, %s3187_s27  ;;  %p172_p0 = scmp.ne.s32.totalorder %s3119_s23, %s3115_s22 }
   0x6   : > { %p160_p1 = scmp.eq.s32.totalorder %s159_s29, 0  ;;  %p173_p2 = scmp.eq.s32.totalorder %s3183_s25, 1 }
   0x7   : > { %p178_p3 = scmp.ne.s32.totalorder %s3115_s22, %s3111_s21  ;;  %p179_p4 = scmp.eq.s32.totalorder %s2260_s26, 1 }
   0x8   : > { %s3198_s30 = scalar_select %p160_p1, %s3119_s23, %s162_s28  }
   0x9   : > { %p3200_p5 = por %p173_p2, %p172_p0  ;;  %p3204_p6 = por %p179_p4, %p178_p3 }
   0xa   : > { %p2263_p7 = scmp.ge.s32.totalorder %s3123_s24, 1  ;;  %p227_p8 = scmp.lt.s32.totalorder %s3123_s24, 3 }
   0xc   : > { %p228_p9 = pnand %p2263_p7, %p227_p8 }
   0xd   : > { %p263_p10 = scmp.lt.s32.totalorder (!%p228_p9), %s3183_s25, 1  ;;  %s260_s15 = sand.u32 (!%p228_p9), 1, %s3115_s22  }
   0xe   : > { %231 = sbr.rel (%p228_p9) target bundleno = 495 (0x1ef), region = 44  ;;  %s2264_s16 = sshll.u32 (!%p228_p9), %s260_s15, 7 }
   0xf   : > { %s3081_s13 = scalar_lea.hbm (!%p228_p9), %s3994_s6, 256 }
  0x13   : > { %v2911_v0 = vld [vmem:[%s3989_s1 + $0x78] sm:$0xff]  ;;  %v2910_v3 = vld [vmem:[%s3989_s1 + $0x70] sm:$0xff]  ;;  %s264_s17 = scalar_select %p263_p10, %s3183_s25, 1  ;;  %v2909_v6 = vld [vmem:[%s3989_s1 + $0x68] sm:$0xff]  ;;  %vm308_vm0 = vsmask.f32 3328 }
  0x14   : > { %v2903_v1 = vld [vmem:[%s3989_s1 + $0x38] sm:$0xff]  ;;  %504 = vmatpush.bf16.msra.mxu0 %v2911_v0  ;;  %2994 = vmatpush.bf16.msra.mxu3 %v2911_v0  ;;  %v2902_v4 = vld [vmem:[%s3989_s1 + $0x30] sm:$0xff]  ;;  %v2901_v7 = vld [vmem:[%s3989_s1 + $0x28] sm:$0xff]  ;;  %vm309_vm1 = vsmask.f32 7440  ;;  %vm658_vm3 = vcmask 1042432  }
  0x15   : > { %v2919_v2 = vld [vmem:[%s3989_s1 + $0xb8] sm:$0xff]  ;;  %605 = vmatpush.bf16.msra.mxu1 %v2903_v1  ;;  %v2918_v5 = vld [vmem:[%s3989_s1 + $0xb0] sm:$0xff]  ;;  %s3018_s28 = smul.u32 80, %s264_s17  ;;  %v2917_v8 = vld [vmem:[%s3989_s1 + $0xa8] sm:$0xff]  ;;  %vm659_vm4 = vcmask 1046532   ;;  %s2993_s17 = sshll.u32 %s3183_s25, 7 }
  0x16   : > { %774 = vmatpush.bf16.msra.mxu2 %v2919_v2  ;;  %v2908_v9 = vld [vmem:[%s3989_s1 + $0x60] sm:$0xff]  ;;  %v2907_v37 = vld [vmem:[%s3989_s1 + $0x58] sm:$0xff]  ;;  %vm3284_vm2 = vmor %vm308_vm0, %vm309_vm1  ;;  %s2182_s20 = scalar_lea.hbm %s3994_s6, %s2993_s17 }
  0x17   : > { %s3236_s12 = scalar_lea.vmem %s3988_s0, %s3018_s28  ;;  %v2900_v13 = vld [vmem:[%s3989_s1 + $0x20] sm:$0xff]  ;;  %v2899_v38 = vld [vmem:[%s3989_s1 + $0x18] sm:$0xff]  ;;  %v2906_v55 = vld [vmem:[%s3989_s1 + $0x50] sm:$0xff]  ;;  %s2266_s28 = sshll.u32 %s3183_s25, 3 }
  0x18   : > { %505 = vmatpush.bf16.msra.mxu0 %v2910_v3  ;;  %2995 = vmatpush.bf16.msra.mxu3 %v2910_v3  ;;  %v276_v10 = vld [vmem:[%s3236_s12] sm:$0xf]  ;;  %v277_v11 = vld [vmem:[%s3236_s12 + $0x8] sm:$0xf]  ;;  %v3250_v12 = vld [vmem:[%s3236_s12 + $0x4] sm:$0x1] }
  0x19   : > { %606 = vmatpush.bf16.msra.mxu1 %v2902_v4  ;;  %v3256_v14 = vld [vmem:[%s3236_s12 + $0xc] sm:$0x1]  ;;  %v312_v15 = vshrl.u32 %v276_v10, 16  ;;  %v315_v16 = vshll.u32 %v276_v10, 16  ;;  %v321_v17 = vshll.u32 %v3250_v12, 16  ;;  %v326_v18 = vshrl.u32 %v277_v11, 16  ;;  %vm3306_vm5 = vmor %vm658_vm3, %vm659_vm4 }
  0x1a   : > { %775 = vmatpush.bf16.msra.mxu2 %v2918_v5  ;;  %v2916_v19 = vld [vmem:[%s3989_s1 + $0xa0] sm:$0xff]  ;;  %v329_v20 = vshll.u32 %v277_v11, 16  ;;  %v281_v22 = vld [vmem:[%s3236_s12 + $0x28] sm:$0xf]  ;;  %v335_v26 = vshll.u32 %v3256_v14, 16  ;;  %v2915_v43 = vld [vmem:[%s3989_s1 + $0x98] sm:$0xff] }
  0x1b   : > { %v280_v21 = vld [vmem:[%s3236_s12 + $0x20] sm:$0xf]  ;;  %v314_v23 = vrot.slane %v312_v15, 4  ;;  %v317_v24 = vrot.slane %v315_v16, 5  ;;  %v328_v25 = vrot.slane %v326_v18, 4  ;;  %v323_v28 = vrot.slane %v321_v17, 5 }
  0x1c   : > { %506 = vmatpush.bf16.msra.mxu0 %v2909_v6  ;;  %2996 = vmatpush.bf16.msra.mxu3 %v2909_v6  ;;  %v3266_v27 = vld [vmem:[%s3236_s12 + $0x24] sm:$0x1]  ;;  %v331_v29 = vrot.slane %v329_v20, 5  ;;  %v3269_v30 = vld [vmem:[%s3236_s12 + $0x2c] sm:$0x1]  ;;  %v368_v31 = vshrl.u32 %v280_v21, 16 }
  0x1d   : > { %607 = vmatpush.bf16.msra.mxu1 %v2901_v7  ;;  %v371_v32 = vshll.u32 %v280_v21, 16  ;;  %v318_v33 = vor.u32 %v317_v24, %v314_v23  ;;  %v377_v34 = vshll.u32 %v3266_v27, 16  ;;  %v382_v35 = vshrl.u32 %v281_v22, 16  ;;  %v634_v48 = vld [vmem:[%s3236_s12] sm:$0xe]  ;;  %v2898_v61 = vld [vmem:[%s3989_s1 + $0x10] sm:$0xff] }
  0x1e   : > { %776 = vmatpush.bf16.msra.mxu2 %v2917_v8  ;;  %v385_v36 = vshll.u32 %v281_v22, 16  ;;  %v332_v39 = vor.u32 %v331_v29, %v328_v25  ;;  %v370_v40 = vrot.slane %v368_v31, 4  ;;  %v391_v42 = vshll.u32 %v3269_v30, 16  ;;  %v635_v50 = vld [vmem:[%s3236_s12 + $0x8] sm:$0xe]  ;;  %v2914_v62 = vld [vmem:[%s3989_s1 + $0x90] sm:$0xff] }
  0x1f   : > { %v373_v41 = vrot.slane %v371_v32, 5  ;;  %v319_v45 = vrot.slane %v318_v33, 4  ;;  %v384_v46 = vrot.slane %v382_v35, 4  ;;  %v337_v52 = vrot.slane %v335_v26, 5  ;;  %v278_v60 = vld [vmem:[%s3236_s12 + $0x10] sm:$0xf] }
  0x20   : > { %507 = vmatpush.bf16.msra.mxu0 %v2908_v9  ;;  %2997 = vmatpush.bf16.msra.mxu3 %v2908_v9  ;;  %v387_v47 = vrot.slane %v385_v36, 5  ;;  %v333_v51 = vrot.slane %v332_v39, 4  ;;  %v379_v53 = vrot.slane %v377_v34, 5  ;;  %v393_v58 = vrot.slane %v391_v42, 5  ;;  %v279_v4 = vld [vmem:[%s3236_s12 + $0x18] sm:$0xf] }
  0x21   : > { %608 = vmatpush.bf16.msra.mxu1 %v2900_v13  ;;  %v374_v49 = vor.u32 %v373_v41, %v370_v40  ;;  %v324_v56 = vsel %vm3284_vm2, %v319_v45, %v323_v28  ;;  %v2365_v59 = vrot.slane %v634_v48, 9  ;;  %v663_v0 = vrot.slane %v3250_v12, 5  ;;  %v282_v8 = vld [vmem:[%s3236_s12 + $0x30] sm:$0xf]  ;;  %v2905_v9 = vld [vmem:[%s3989_s1 + $0x48] sm:$0xff]  ;;  %v2904_v21 = vld [vmem:[%s3989_s1 + $0x40] sm:$0xff] }
  0x22   : > { %777 = vmatpush.bf16.msra.mxu2 %v2916_v19  ;;  %v388_v54 = vor.u32 %v387_v47, %v384_v46  ;;  %v2366_v1 = vrot.slane %v635_v50, 9  ;;  %v667_v2 = vrot.slane %v3256_v14, 5  ;;  %v340_v5 = vshrl.u32 %v278_v60, 16  ;;  %v2897_v10 = vld [vmem:[%s3989_s1 + $0x8] sm:$0xff]  ;;  %v3334_v17 = vld [vmem:[%s3236_s12 + $0x14] sm:$0x1] }
  0x23   : > { %v375_v57 = vrot.slane %v374_v49, 4  ;;  %v343_v6 = vshll.u32 %v278_v60, 16  ;;  %v338_v7 = vsel %vm3284_vm2, %v333_v51, %v337_v52  ;;  %v2913_v11 = vld [vmem:[%s3989_s1 + $0x88] sm:$0xff]  ;;  %v3323_v12 = vunpack.c.l.b16 %v324_v56  ;;  %v3337_v18 = vld [vmem:[%s3236_s12 + $0x1c] sm:$0x1]  ;;  %v2896_v28 = vld [vmem:[%s3989_s1] sm:$0xff] }
  0x24   : > { %508 = vmatpush.bf16.msra.mxu0 %v2907_v37  ;;  %2998 = vmatpush.bf16.msra.mxu3 %v2907_v37  ;;  %v389_v63 = vrot.slane %v388_v54, 4  ;;  %v664_v15 = vsel %vm3306_vm5, %v2365_v59, %v663_v0  ;;  %v668_v16 = vsel %vm3306_vm5, %v2366_v1, %v667_v2  ;;  %v354_v19 = vshrl.u32 %v279_v4, 16  ;;  %v283_v25 = vld [vmem:[%s3236_s12 + $0x38] sm:$0xf]  ;;  %v2912_v29 = vld [vmem:[%s3989_s1 + $0x80] sm:$0xff]  ;;  %p269_p11 = scmp.lt.s32.totalorder %s2266_s28, 15 }
  0x25   : > { %609 = vmatpush.bf16.msra.mxu1 %v2899_v38  ;;  %v380_v13 = vsel %vm3284_vm2, %v375_v57, %v379_v53  ;;  %v357_v20 = vshll.u32 %v279_v4, 16  ;;  %v441_v22 = vunpack.c.l.b16 %v338_v7  ;;  %v342_v23 = vrot.slane %v340_v5, 4  ;;  %v3350_v35 = vld [vmem:[%s3236_s12 + $0x34] sm:$0x1]  ;;  %v2319_v36 = vld [vmem:[%s3236_s12] sm:$0xf] }
  0x26   : > { %778 = vmatpush.bf16.msra.mxu2 %v2915_v43  ;;  %v394_v14 = vsel %vm3284_vm2, %v389_v63, %v393_v58  ;;  %v345_v24 = vrot.slane %v343_v6, 5  ;;  %v396_v26 = vshrl.u32 %v282_v8, 16  ;;  %v444_v31 = vunpack.c.l.b16 %v380_v13  ;;  %v2892_v37 = vld [vmem:[%s3236_s12 + $0x4] sm:$0xf0]  ;;  %v3357_v45 = vld [vmem:[%s3236_s12 + $0x3c] sm:$0x1] }
  0x27   : > { %v445_v32 = vunpack.c.l.b16 %v394_v14  ;;  %v356_v33 = vrot.slane %v354_v19, 4  ;;  %v359_v34 = vrot.slane %v357_v20, 5  ;;  %v710_v38 = vunpack.c.l.b16 %v664_v15  ;;  %v2931_v48 = vld [vmem:[%s3989_s1 + $0xf8] sm:$0xff]  ;;  %v636_v58 = vld [vmem:[%s3236_s12 + $0x10] sm:$0xe]  ;;  %s4006_s28 = smov (!%p269_p11, %s2266_s28), 15 }
  0x28   : > { %509 = vmatpush.bf16.msra.mxu0 %v2906_v55  ;;  %2999 = vmatpush.bf16.msra.mxu3 %v2906_v55  ;;  %v711_v39 = vunpack.c.l.b16 %v668_v16  ;;  %v398_v40 = vrot.slane %v396_v26, 4  ;;  %v399_v41 = vshll.u32 %v282_v8, 16  ;;  %v349_v42 = vshll.u32 %v3334_v17, 16  ;;  %v2939_v49 = vld [vmem:[%s3989_s1 + $0x138] sm:$0xff]  ;;  %v2930_v5 = vld [vmem:[%s3989_s1 + $0xf0] sm:$0xff]  ;;  %s2891_s29 = sshll.u32 %s4006_s28, 4 }
  0x29   : > { %610 = vmatpush.bf16.msra.mxu1 %v2898_v61  ;;  %v363_v43 = vshll.u32 %v3337_v18, 16  ;;  %v410_v46 = vshrl.u32 %v283_v25, 16  ;;  %v413_v47 = vshll.u32 %v283_v25, 16  ;;  %v346_v50 = vor.u32 %v345_v24, %v342_v23  ;;  %v637_v63 = vld [vmem:[%s3236_s12 + $0x18] sm:$0xe]  ;;  %v2938_v6 = vld [vmem:[%s3989_s1 + $0x130] sm:$0xff]  ;;  %s3895_s14 = scalar_lea.vmem %s3993_s5, %s2891_s29 }
  0x2a   : > { %779 = vmatpush.bf16.msra.mxu2 %v2914_v62  ;;  %v360_v51 = vor.u32 %v359_v34, %v356_v33  ;;  %v401_v52 = vrot.slane %v399_v41, 5  ;;  %v405_v53 = vshll.u32 %v3350_v35, 16  ;;  %v448_v54 = vpack.c.b16 %v441_v22, %v3323_v12  ;;  %v2959_v4 = vld [vmem:[%s3989_s1 + $0x1b8] sm:$0xff]  ;;  %v2493_v20 = vld [vmem:[%s3236_s12 + $0x8] sm:$0xf]  ;;  %v2958_v22 = vld [vmem:[%s3989_s1 + $0x1b0] sm:$0xff] }
  0x2b   : > { %v450_v55 = vpack.c.b16 %v445_v32, %v444_v31  ;;  %v412_v56 = vrot.slane %v410_v46, 4  ;;  %v415_v57 = vrot.slane %v413_v47, 5  ;;  %v2320_v59 = vor.u32 %v2892_v37, %v2319_v36  ;;  %v2947_v19 = vld [vmem:[%s3989_s1 + $0x178] sm:$0xff]  ;;  %v2957_v37 = vld [vmem:[%s3989_s1 + $0x1a8] sm:$0xff]  ;;  %v2323_v46 = vld [vmem:[%s3236_s12 + $0x10] sm:$0xf] }
  0x2c   : > { %510 = vmatpush.bf16.msra.mxu0 %v2905_v9  ;;  %3000 = vmatpush.bf16.msra.mxu3 %v2905_v9  ;;  %v718_v60 = vpack.c.b16 %v711_v39, %v710_v38  ;;  %v402_v61 = vor.u32 %v401_v52, %v398_v40  ;;  %v419_v62 = vshll.u32 %v3357_v45, 16  ;;  %v351_v0 = vrot.slane %v349_v42, 5  ;;  %v2928_v38 = vld [vmem:[%s3989_s1 + $0xe0] sm:$0xff]  ;;  %s2185_s28 = sshll.u32 %s2182_s20, 4  ;;  %s2170_s25 = scalar_lea.sflag [#allocation3], %s260_s15  ;;  %s2186_s28 = int_to_ptr.hbm [resolvable:$true] %s2185_s28 }
  0x2d   : > { %611 = vmatpush.bf16.msra.mxu1 %v2897_v10  ;;  %v365_v1 = vrot.slane %v363_v43, 5  ;;  %v416_v2 = vor.u32 %v415_v57, %v412_v56  ;;  %v347_v7 = vrot.slane %v346_v50, 4  ;;  %v361_v8 = vrot.slane %v360_v51, 4  ;;  %v2936_v39 = vld [vmem:[%s3989_s1 + $0x120] sm:$0xff]  ;;  %v2893_v50 = vld [vmem:[%s3236_s12 + $0x14] sm:$0xf0] }
  0x2e   : > { %780 = vmatpush.bf16.msra.mxu2 %v2913_v11  ;;  %v407_v9 = vrot.slane %v405_v53, 5  ;;  %v2367_v10 = vrot.slane %v636_v58, 9  ;;  %v403_v11 = vrot.slane %v402_v61, 4  ;;  %v671_v12 = vrot.slane %v3334_v17, 5  ;;  %v2929_v17 = vld [vmem:[%s3989_s1 + $0xe8] sm:$0xff]  ;;  %v2956_v57 = vld [vmem:[%s3989_s1 + $0x1a0] sm:$0xff] }
  0x2f   : > { %v2368_v13 = vrot.slane %v637_v63, 9  ;;  %v675_v14 = vrot.slane %v3337_v18, 5  ;;  %v417_v15 = vrot.slane %v416_v2, 4  ;;  %v421_v16 = vrot.slane %v419_v62, 5  ;;  %v2937_v18 = vld [vmem:[%s3989_s1 + $0x128] sm:$0xff]  ;;  %v2927_v58 = vld [vmem:[%s3989_s1 + $0xd8] sm:$0xff] }
  0x30   : > { %511 = vmatpush.bf16.msra.mxu0 %v2904_v21  ;;  %3001 = vmatpush.bf16.msra.mxu3 %v2904_v21  ;;  %v2495_v21 = vld [vmem:[%s3236_s12 + $0x10] sm:$0xf]  ;;  %v352_v23 = vsel %vm3284_vm2, %v347_v7, %v351_v0  ;;  %v366_v24 = vsel %vm3284_vm2, %v361_v8, %v365_v1  ;;  %v408_v25 = vsel %vm3284_vm2, %v403_v11, %v407_v9  ;;  %v963_v32 = vshrl.u32 %v2493_v20, 16  ;;  %v3428_v56 = vld [vmem:[%s3236_s12 + $0x14] sm:$0x1]  ;;  %v2955_v11 = vld [vmem:[%s3989_s1 + $0x198] sm:$0xff] }
  0x31   : > { %612 = vmatpush.bf16.msra.mxu1 %v2896_v28  ;;  %v672_v26 = vsel %vm3306_vm5, %v2367_v10, %v671_v12  ;;  %v676_v28 = vsel %vm3306_vm5, %v2368_v13, %v675_v14  ;;  %v422_v31 = vsel %vm3284_vm2, %v417_v15, %v421_v16  ;;  %v966_v33 = vshll.u32 %v2493_v20, 16  ;;  %v2934_v7 = vld [vmem:[%s3989_s1 + $0x110] sm:$0xff]  ;;  %v638_v8 = vld [vmem:[%s3236_s12 + $0x20] sm:$0xe]  ;;  %v639_v9 = vld [vmem:[%s3236_s12 + $0x28] sm:$0xe] }
  0x32   : > { %781 = vmatpush.bf16.msra.mxu2 %v2912_v29  ;;  %v2946_v29 = vld [vmem:[%s3989_s1 + $0x170] sm:$0xff]  ;;  %v977_v34 = vshrl.u32 %v2495_v21, 16  ;;  %v980_v36 = vshll.u32 %v2495_v21, 16  ;;  %v442_v40 = vunpack.c.l.b16 %v352_v23  ;;  %v443_v41 = vunpack.c.l.b16 %v366_v24  ;;  %v2497_v10 = vld [vmem:[%s3236_s12 + $0x18] sm:$0xf]  ;;  %v2925_v23 = vld [vmem:[%s3989_s1 + $0xc8] sm:$0xff] }
  0x33   : > { %512 = vmatmul.bf16.vlgmr.msra.gmra.mxu0 %v448_v54  ;;  %522 = vmatmul.bf16.vlgmr.msra.gmra.mxu3 %v450_v55  ;;  %v446_v42 = vunpack.c.l.b16 %v408_v25  ;;  %v447_v43 = vunpack.c.l.b16 %v422_v31  ;;  %v712_v47 = vunpack.c.l.b16 %v672_v26  ;;  %v965_v51 = vrot.slane %v963_v32, 4  ;;  %v3425_v55 = vld [vmem:[%s3236_s12 + $0xc] sm:$0x1]  ;;  %v2499_v16 = vld [vmem:[%s3236_s12 + $0x20] sm:$0xf]  ;;  %s3075_s29 = sshra.s32 %s2186_s28, 4  ;;  %s3076_s29 = int_to_ptr.hbm [resolvable:$true] %s3075_s29 }
  0x34   : > { %909 = vmatpush.bf16.msrb.mxu3 %v2931_v48  ;;  %1155 = vmatpush.bf16.msrb.mxu0 %v2939_v49  ;;  %v713_v48 = vunpack.c.l.b16 %v676_v28  ;;  %v2945_v49 = vld [vmem:[%s3989_s1 + $0x168] sm:$0xff]  ;;  %v968_v52 = vrot.slane %v966_v33, 5  ;;  %v979_v53 = vrot.slane %v977_v34, 4  ;;  %v982_v54 = vrot.slane %v980_v36, 5  ;;  %v2924_v28 = vld [vmem:[%s3989_s1 + $0xc0] sm:$0xff]  ;;  %v2942_v36 = vld [vmem:[%s3989_s1 + $0x150] sm:$0xff]  ;;  %p3082_p1 = scmp.lt.s32.totalorder %s3076_s29, %s3994_s6 }
  0x35   : > { %613 = vmatmul.bf16.vlgmr.msra.gmra.mxu1 %v2320_v59  ;;  %782 = vmatmul.bf16.vlgmr.msra.gmra.mxu2 %v718_v60  ;;  %v2935_v59 = vld [vmem:[%s3989_s1 + $0x118] sm:$0xff]  ;;  %v449_v60 = vpack.c.b16 %v443_v41, %v442_v40  ;;  %v451_v61 = vpack.c.b16 %v447_v43, %v446_v42  ;;  %v2324_v62 = vor.u32 %v2893_v50, %v2323_v46  ;;  %v972_v1 = vshll.u32 %v3425_v55, 16  ;;  %v2932_v32 = vld [vmem:[%s3989_s1 + $0x100] sm:$0xff]  ;;  %s3077_s9 = scalar_lea.hbm %s3076_s29, 128 }
  0x36   : > { %1464 = vmatpush.bf16.msrb.mxu2 %v2959_v4  ;;  %1329 = vmatpush.bf16.msrb.mxu1 %v2947_v19  ;;  %v719_v63 = vpack.c.b16 %v713_v48, %v712_v47  ;;  %v969_v0 = vor.u32 %v968_v52, %v965_v51  ;;  %v983_v2 = vor.u32 %v982_v54, %v979_v53  ;;  %v986_v4 = vshll.u32 %v3428_v56, 16  ;;  %v2967_v46 = vld [vmem:[%s3989_s1 + $0x1f8] sm:$0xff]  ;;  %v2327_v51 = vld [vmem:[%s3236_s12 + $0x20] sm:$0xf]  ;;  %v3504_v54 = vld [vmem:[%s3236_s12 + $0x24] sm:$0x1]  ;;  %p3078_p12 = scmp.ne.s32.totalorder %s3076_s29, %s3077_s9  ;;  %p3083_p2 = scmp.lt.s32.totalorder %s3081_s13, %s3077_s9 }
  0x37   : > { %v974_v13 = vrot.slane %v972_v1, 5  ;;  %v2369_v19 = vrot.slane %v638_v8, 9  ;;  %v679_v20 = vrot.slane %v3266_v27, 5  ;;  %v2370_v21 = vrot.slane %v639_v9, 9  ;;  %v2933_v27 = vld [vmem:[%s3989_s1 + $0x108] sm:$0xff]  ;;  %v2975_v47 = vld [vmem:[%s3989_s1 + $0x238] sm:$0xff] }
  0x38   : > { %910 = vmatpush.bf16.msrb.mxu3 %v2930_v5  ;;  %1156 = vmatpush.bf16.msrb.mxu0 %v2938_v6  ;;  %v2926_v5 = vld [vmem:[%s3989_s1 + $0xd0] sm:$0xff]  ;;  %v2944_v6 = vld [vmem:[%s3989_s1 + $0x160] sm:$0xff]  ;;  %v970_v12 = vrot.slane %v969_v0, 4  ;;  %v984_v14 = vrot.slane %v983_v2, 4  ;;  %v988_v15 = vrot.slane %v986_v4, 5  ;;  %v994_v24 = vshll.u32 %v2497_v10, 16  ;;  %p3079_p13 = pnand %p3078_p12, %p3200_p5  ;;  %p3084_p3 = por %p3083_p2, %p3082_p1 }
  0x39   : > { %v1005_v25 = vshrl.u32 %v2499_v16, 16  ;;  %v1008_v26 = vshll.u32 %v2499_v16, 16  ;;  %v680_v33 = vsel %vm3306_vm5, %v2369_v19, %v679_v20  ;;  %v3500_v48 = vld [vmem:[%s3236_s12 + $0x1c] sm:$0x1]  ;;  %v641_v0 = vld [vmem:[%s3236_s12 + $0x38] sm:$0xe] }
  0x3a   : > { %1465 = vmatpush.bf16.msrb.mxu2 %v2958_v22  ;;  %1330 = vmatpush.bf16.msrb.mxu1 %v2946_v29  ;;  %v683_v22 = vrot.slane %v3269_v30, 5  ;;  %v991_v30 = vshrl.u32 %v2497_v10, 16  ;;  %v975_v29 = vsel %vm3284_vm2, %v970_v12, %v974_v13  ;;  %v989_v31 = vsel %vm3284_vm2, %v984_v14, %v988_v15  ;;  %v2974_v8 = vld [vmem:[%s3989_s1 + $0x230] sm:$0xff]  ;;  %v2940_v13 = vld [vmem:[%s3989_s1 + $0x140] sm:$0xff]  ;;  %v2501_v20 = vld [vmem:[%s3236_s12 + $0x28] sm:$0xf]  ;;  %p3080_p0 = pneg %p3079_p13 }
  0x3b   : > { %v996_v41 = vrot.slane %v994_v24, 5  ;;  %v1091_v42 = vunpack.c.l.b16 %v975_v29  ;;  %v1092_v43 = vunpack.c.l.b16 %v989_v31  ;;  %v1010_v50 = vrot.slane %v1008_v26, 5  ;;  %v2964_v26 = vld [vmem:[%s3989_s1 + $0x1e0] sm:$0xff]  ;;  %v2331_v29 = vld [vmem:[%s3236_s12 + $0x30] sm:$0xf] }
  0x3c   : > { %911 = vmatpush.bf16.msrb.mxu3 %v2929_v17  ;;  %1157 = vmatpush.bf16.msrb.mxu0 %v2937_v18  ;;  %v2943_v17 = vld [vmem:[%s3989_s1 + $0x158] sm:$0xff]  ;;  %v2954_v18 = vld [vmem:[%s3989_s1 + $0x190] sm:$0xff]  ;;  %v684_v34 = vsel %vm3306_vm5, %v2370_v21, %v683_v22  ;;  %v993_v40 = vrot.slane %v991_v30, 4  ;;  %v714_v52 = vunpack.c.l.b16 %v680_v33  ;;  %v1014_v4 = vshll.u32 %v3504_v54, 16  ;;  %p3085_p4 = pnand %p3084_p3, %p3080_p0 }
  0x3d   : > { %v715_v53 = vunpack.c.l.b16 %v684_v34  ;;  %v687_v10 = vrot.slane %v3350_v35, 5  ;;  %v691_v12 = vrot.slane %v3357_v45, 5  ;;  %v2965_v35 = vld [vmem:[%s3989_s1 + $0x1e8] sm:$0xff]  ;;  %v2503_v21 = vld [vmem:[%s3236_s12 + $0x30] sm:$0xf]  ;;  %v1022_v30 = vshll.u32 %v2501_v20, 16 }
  0x3e   : > { %1466 = vmatpush.bf16.msrb.mxu2 %v2957_v37  ;;  %1331 = vmatpush.bf16.msrb.mxu1 %v2945_v49  ;;  %v2953_v37 = vld [vmem:[%s3989_s1 + $0x188] sm:$0xff]  ;;  %v1007_v49 = vrot.slane %v1005_v25, 4  ;;  %v997_v1 = vor.u32 %v996_v41, %v993_v40  ;;  %v1016_v19 = vrot.slane %v1014_v4, 5  ;;  %v1033_v24 = vshrl.u32 %v2503_v21, 16  ;;  %v2895_v31 = vld [vmem:[%s3236_s12 + $0x34] sm:$0xf0] }
  0x3f   : > { %v2973_v45 = vld [vmem:[%s3989_s1 + $0x228] sm:$0xff]  ;;  %v1036_v25 = vshll.u32 %v2503_v21, 16  ;;  %v2451_v34 = vld [vmem:[%s3236_s12 + $0x18] sm:$0xf]  ;;  %v1024_v41 = vrot.slane %v1022_v30, 5 }
  0x40   : > { %912 = vmatpush.bf16.msrb.mxu3 %v2928_v38  ;;  %1158 = vmatpush.bf16.msrb.mxu0 %v2936_v39  ;;  %v2447_v38 = vld [vmem:[%s3236_s12 + $0x8] sm:$0xf]  ;;  %v2920_v39 = vld [vmem:[%s3236_s12 + $0xc] sm:$0xf0]  ;;  %v1011_v2 = vor.u32 %v1010_v50, %v1007_v49  ;;  %v998_v14 = vrot.slane %v997_v1, 4  ;;  %v2971_v49 = vld [vmem:[%s3989_s1 + $0x218] sm:$0xff]  ;;  %v2332_v50 = vor.u32 %v2895_v31, %v2331_v29 }
  0x41   : > { %v2507_v1 = vld [vmem:[%s3236_s12 + $0x40] sm:$0xf] }
  0x42   : > { %1467 = vmatpush.bf16.msrb.mxu2 %v2956_v57  ;;  %1332 = vmatpush.bf16.msrb.mxu1 %v2944_v6  ;;  %v2894_v57 = vld [vmem:[%s3236_s12 + $0x24] sm:$0xf0]  ;;  %v720_v6 = vpack.c.b16 %v715_v53, %v714_v52  ;;  %v1012_v16 = vrot.slane %v1011_v2, 4 }
  0x43   : > { %517 = vmatmul.bf16.gmra.mxu0 %v449_v60  ;;  %527 = vmatmul.bf16.gmra.mxu3 %v451_v61  ;;  %v2448_v60 = vor.u32 %v2920_v39, %v2447_v38  ;;  %v1000_v61 = vshll.u32 %v3500_v48, 16  ;;  %v3555_v39 = vld [vmem:[%s3236_s12 + $0x2c] sm:$0x1] }
  0x44   : > { %913 = vmatpush.bf16.msrb.mxu3 %v2927_v58  ;;  %1159 = vmatpush.bf16.msrb.mxu0 %v2935_v59  ;;  %v2941_v58 = vld [vmem:[%s3989_s1 + $0x148] sm:$0xff]  ;;  %v2952_v59 = vld [vmem:[%s3989_s1 + $0x180] sm:$0xff] }
  0x45   : > { %618 = vmatmul.bf16.gmra.mxu1 %v2324_v62  ;;  %787 = vmatmul.bf16.gmra.mxu2 %v719_v63  ;;  %v1099_v62 = vpack.c.b16 %v1092_v43, %v1091_v42  ;;  %v640_v63 = vld [vmem:[%s3236_s12 + $0x30] sm:$0xe]  ;;  %v1002_v15 = vrot.slane %v1000_v61, 5  ;;  %v1035_v42 = vrot.slane %v1033_v24, 4  ;;  %v1038_v43 = vrot.slane %v1036_v25, 5 }
  0x46   : > { %1468 = vmatpush.bf16.msrb.mxu2 %v2955_v11  ;;  %1333 = vmatpush.bf16.msrb.mxu1 %v2943_v17  ;;  %v2371_v9 = vrot.slane %v640_v63, 9  ;;  %v2372_v11 = vrot.slane %v641_v0, 9  ;;  %v2962_v61 = vld [vmem:[%s3989_s1 + $0x1d0] sm:$0xff]  ;;  %v2505_v0 = vld [vmem:[%s3236_s12 + $0x38] sm:$0xf] }
  0x47   : > { %v2558_v63 = vld [vmem:[%s3236_s12 + $0x10] sm:$0xe]  ;;  %v3601_v24 = vld [vmem:[%s3236_s12 + $0x3c] sm:$0x1]  ;;  %v3604_v25 = vld [vmem:[%s3236_s12 + $0x44] sm:$0x1] }
  0x48   : > { %914 = vmatpush.bf16.msrb.mxu3 %v2926_v5  ;;  %1160 = vmatpush.bf16.msrb.mxu0 %v2934_v7  ;;  %v2328_v5 = vor.u32 %v2894_v57, %v2327_v51  ;;  %v2966_v7 = vld [vmem:[%s3989_s1 + $0x1f0] sm:$0xff]  ;;  %v688_v22 = vsel %vm3306_vm5, %v2371_v9, %v687_v10  ;;  %v692_v17 = vsel %vm3306_vm5, %v2372_v11, %v691_v12  ;;  %v1218_v9 = vrot.slane %v3425_v55, 5  ;;  %v2961_v12 = vld [vmem:[%s3989_s1 + $0x1c8] sm:$0xff] }
  0x49   : > { %v717_v33 = vunpack.c.l.b16 %v692_v17  ;;  %v2566_v10 = vrot.slane %v2558_v63, 9  ;;  %v1222_v11 = vrot.slane %v3428_v56, 5 }
  0x4a   : > { %1469 = vmatpush.bf16.msrb.mxu2 %v2954_v18  ;;  %1334 = vmatpush.bf16.msrb.mxu1 %v2942_v36  ;;  %v1003_v18 = vsel %vm3284_vm2, %v998_v14, %v1002_v15  ;;  %v2921_v36 = vld [vmem:[%s3236_s12 + $0x1c] sm:$0xf0]  ;;  %v1050_v14 = vshll.u32 %v2505_v0, 16  ;;  %v1061_v15 = vshrl.u32 %v2507_v1, 16 }
  0x4b   : > { %v2452_v52 = vor.u32 %v2921_v36, %v2451_v34  ;;  %v1056_v36 = vshll.u32 %v3601_v24, 16 }
  0x4c   : > { %915 = vmatpush.bf16.msrb.mxu3 %v2925_v23  ;;  %1161 = vmatpush.bf16.msrb.mxu0 %v2933_v27  ;;  %v1017_v23 = vsel %vm3284_vm2, %v1012_v16, %v1016_v19  ;;  %v1019_v27 = vshrl.u32 %v2501_v20, 16  ;;  %v1064_v16 = vshll.u32 %v2507_v1, 16  ;;  %v2969_v19 = vld [vmem:[%s3989_s1 + $0x208] sm:$0xff]  ;;  %v2960_v20 = vld [vmem:[%s3989_s1 + $0x1c0] sm:$0xff]  ;;  %v1063_v17 = vrot.slane %v1061_v15, 4 }
  0x4d   : > { %v1094_v38 = vunpack.c.l.b16 %v1017_v23  ;;  %v2968_v23 = vld [vmem:[%s3989_s1 + $0x200] sm:$0xff] }
  0x4e   : > { %1470 = vmatpush.bf16.msrb.mxu2 %v2953_v37  ;;  %1335 = vmatpush.bf16.msrb.mxu1 %v2941_v58  ;;  %v1093_v37 = vunpack.c.l.b16 %v1003_v18  ;;  %v1021_v40 = vrot.slane %v1019_v27, 4  ;;  %v1028_v58 = vshll.u32 %v3555_v39, 16  ;;  %v1066_v18 = vrot.slane %v1064_v16, 5  ;;  %v2694_v16 = vld [vmem:[%s3236_s12 + $0x14] sm:$0x1] }
  0x50   : > { %916 = vmatpush.bf16.msrb.mxu3 %v2924_v28  ;;  %1162 = vmatpush.bf16.msrb.mxu0 %v2932_v32  ;;  %v2972_v28 = vld [vmem:[%s3989_s1 + $0x220] sm:$0xff]  ;;  %v716_v32 = vunpack.c.l.b16 %v688_v22  ;;  %v1100_v53 = vpack.c.b16 %v1094_v38, %v1093_v37  ;;  %v1025_v57 = vor.u32 %v1024_v41, %v1021_v40  ;;  %v1030_v4 = vrot.slane %v1028_v58, 5  ;;  %v2695_v58 = vld [vmem:[%s3236_s12 + $0x18] sm:$0xf] }
  0x51   : > { %v1052_v22 = vrot.slane %v1050_v14, 5  ;;  %v1067_v37 = vor.u32 %v1066_v18, %v1063_v17  ;;  %v1070_v38 = vshll.u32 %v3604_v25, 16 }
  0x52   : > { %1471 = vmatpush.bf16.msrb.mxu2 %v2952_v59  ;;  %1336 = vmatpush.bf16.msrb.mxu1 %v2940_v13  ;;  %v721_v51 = vpack.c.b16 %v717_v33, %v716_v32  ;;  %v1039_v59 = vor.u32 %v1038_v43, %v1035_v42  ;;  %v1026_v2 = vrot.slane %v1025_v57, 4  ;;  %v1047_v13 = vshrl.u32 %v2505_v0, 16  ;;  %v2647_v32 = vld [vmem:[%s3236_s12 + $0x10] sm:$0xf]  ;;  %v2948_v33 = vld [vmem:[%s3236_s12 + $0x14] sm:$0xf0] }
  0x53   : > { %917 = vmatmul.bf16.vlgmr.msrb.gmra.mxu3 %v2448_v60  ;;  %1163 = vmatmul.bf16.vlgmr.msrb.gmra.mxu0 %v1099_v62  ;;  %v2557_v62 = vld [vmem:[%s3236_s12 + $0x8] sm:$0xe]  ;;  %v2648_v43 = vor.u32 %v2948_v33, %v2647_v32  ;;  %v2693_v57 = vld [vmem:[%s3236_s12 + $0x10] sm:$0xf] }
  0x54   : > { %1710 = vmatpush.bf16.msra.mxu3 %v2967_v46  ;;  %1884 = vmatpush.bf16.msra.mxu0 %v2975_v47  ;;  %v3558_v46 = vld [vmem:[%s3236_s12 + $0x34] sm:$0x1]  ;;  %v2963_v47 = vld [vmem:[%s3989_s1 + $0x1d8] sm:$0xff]  ;;  %v1031_v55 = vsel %vm3284_vm2, %v1026_v2, %v1030_v4  ;;  %v1049_v21 = vrot.slane %v1047_v13, 4  ;;  %v1518_v1 = vshrl.u32 %v2693_v57, 16  ;;  %v1521_v2 = vshll.u32 %v2693_v57, 16 }
  0x55   : > { %623 = vmatmul.bf16.gmra.mxu1 %v2328_v5  ;;  %792 = vmatmul.bf16.gmra.mxu2 %v720_v6  ;;  %v1042_v60 = vshll.u32 %v3558_v46, 16  ;;  %v1040_v5 = vrot.slane %v1039_v59, 4  ;;  %v1095_v27 = vunpack.c.l.b16 %v1031_v55  ;;  %v1532_v4 = vshrl.u32 %v2695_v58, 16  ;;  %v2651_v55 = vld [vmem:[%s3236_s12 + $0x20] sm:$0xf] }
  0x56   : > { %v1053_v34 = vor.u32 %v1052_v22, %v1049_v21  ;;  %v1527_v21 = vshll.u32 %v2694_v16, 16 }
  0x57   : > { %v1044_v6 = vrot.slane %v1042_v60, 5  ;;  %v1226_v60 = vrot.slane %v3500_v48, 5 }
  0x58   : > { %1711 = vmatpush.bf16.msra.mxu3 %v2966_v7  ;;  %1885 = vmatpush.bf16.msra.mxu0 %v2974_v8  ;;  %v2970_v7 = vld [vmem:[%s3989_s1 + $0x210] sm:$0xff]  ;;  %v2565_v8 = vrot.slane %v2557_v62, 9  ;;  %v1230_v62 = vrot.slane %v3504_v54, 5 }
  0x59   : > { %v1045_v56 = vsel %vm3284_vm2, %v1040_v5, %v1044_v6  ;;  %v1535_v5 = vshll.u32 %v2695_v58, 16  ;;  %v2459_v6 = vld [vmem:[%s3236_s12 + $0x38] sm:$0xf] }
  0x5a   : > { %v1096_v30 = vunpack.c.l.b16 %v1045_v56  ;;  %v2949_v56 = vld [vmem:[%s3236_s12 + $0x24] sm:$0xf0] }
  0x5b   : > { %v1537_v13 = vrot.slane %v1535_v5, 5 }
  0x5c   : > { %1712 = vmatpush.bf16.msra.mxu3 %v2965_v35  ;;  %1886 = vmatpush.bf16.msra.mxu0 %v2973_v45  ;;  %v1219_v35 = vsel %vm3306_vm5, %v2565_v8, %v1218_v9  ;;  %v1223_v45 = vsel %vm3306_vm5, %v2566_v10, %v1222_v11  ;;  %v1101_v41 = vpack.c.b16 %v1096_v30, %v1095_v27  ;;  %v2923_v9 = vld [vmem:[%s3236_s12 + $0x3c] sm:$0xf0]  ;;  %v1520_v10 = vrot.slane %v1518_v1, 4  ;;  %v2757_v27 = vld [vmem:[%s3236_s12 + $0x10] sm:$0xe] }
  0x5d   : > { %v1265_v29 = vunpack.c.l.b16 %v1219_v35  ;;  %v1266_v31 = vunpack.c.l.b16 %v1223_v45  ;;  %v1523_v11 = vrot.slane %v1521_v2, 5  ;;  %v2460_v35 = vor.u32 %v2923_v9, %v2459_v6  ;;  %v2758_v30 = vld [vmem:[%s3236_s12 + $0x18] sm:$0xe] }
  0x5e   : > { %v2950_v9 = vld [vmem:[%s3236_s12 + $0x34] sm:$0xf0] }
  0x5f   : > { %v1273_v42 = vpack.c.b16 %v1266_v31, %v1265_v29  ;;  %v1529_v31 = vrot.slane %v1527_v21, 5  ;;  %v2760_v21 = vld [vmem:[%s3236_s12 + $0x28] sm:$0xe] }
  0x60   : > { %1713 = vmatpush.bf16.msra.mxu3 %v2964_v26  ;;  %1887 = vmatpush.bf16.msra.mxu0 %v2972_v28  ;;  %v2455_v26 = vld [vmem:[%s3236_s12 + $0x28] sm:$0xf]  ;;  %v2922_v28 = vld [vmem:[%s3236_s12 + $0x2c] sm:$0xf0] }
  0x61   : > { %v2456_v40 = vor.u32 %v2922_v28, %v2455_v26  ;;  %v2561_v26 = vld [vmem:[%s3236_s12 + $0x28] sm:$0xe]  ;;  %v2562_v28 = vld [vmem:[%s3236_s12 + $0x30] sm:$0xe] }
  0x63   : > { %922 = vmatmul.bf16.gmra.mxu3 %v2452_v52  ;;  %1168 = vmatmul.bf16.gmra.mxu0 %v1100_v53  ;;  %v1072_v52 = vrot.slane %v1070_v38, 5  ;;  %v2560_v53 = vld [vmem:[%s3236_s12 + $0x20] sm:$0xe] }
  0x64   : > { %1714 = vmatpush.bf16.msra.mxu3 %v2963_v47  ;;  %1888 = vmatpush.bf16.msra.mxu0 %v2971_v49  ;;  %v2559_v47 = vld [vmem:[%s3236_s12 + $0x18] sm:$0xe]  ;;  %v1054_v49 = vrot.slane %v1053_v34, 4  ;;  %v2765_v34 = vrot.slane %v2757_v27, 9 }
  0x65   : > { %628 = vmatmul.bf16.gmra.mxu1 %v2332_v50  ;;  %797 = vmatmul.bf16.gmra.mxu2 %v721_v51  ;;  %v1058_v50 = vrot.slane %v1056_v36, 5  ;;  %v1068_v51 = vrot.slane %v1067_v37, 4  ;;  %v2567_v59 = vrot.slane %v2559_v47, 9  ;;  %v1773_v36 = vrot.slane %v2694_v16, 5 }
  0x66   : > { %v2766_v37 = vrot.slane %v2758_v30, 9  ;;  %v1238_v47 = vrot.slane %v3558_v46, 5 }
  0x67   : > { %v1059_v63 = vsel %vm3284_vm2, %v1054_v49, %v1058_v50  ;;  %v1073_v0 = vsel %vm3284_vm2, %v1068_v51, %v1072_v52  ;;  %v1227_v48 = vsel %vm3306_vm5, %v2567_v59, %v1226_v60  ;;  %v2699_v49 = vld [vmem:[%s3236_s12 + $0x28] sm:$0xf]  ;;  %v1774_v57 = vsel %vm3306_vm5, %v2765_v34, %v1773_v36 }
  0x68   : > { %1715 = vmatpush.bf16.msra.mxu3 %v2962_v61  ;;  %1889 = vmatpush.bf16.msra.mxu0 %v2970_v7  ;;  %v2568_v61 = vrot.slane %v2560_v53, 9  ;;  %v1097_v7 = vunpack.c.l.b16 %v1059_v63  ;;  %v1098_v8 = vunpack.c.l.b16 %v1073_v0  ;;  %v1267_v14 = vunpack.c.l.b16 %v1227_v48  ;;  %v2698_v48 = vld [vmem:[%s3236_s12 + $0x24] sm:$0x1] }
  0x69   : > { %v1560_v58 = vshrl.u32 %v2699_v49, 16  ;;  %v1563_v46 = vshll.u32 %v2699_v49, 16  ;;  %v1820_v63 = vunpack.c.l.b16 %v1774_v57 }
  0x6a   : > { %v1231_v54 = vsel %vm3306_vm5, %v2568_v61, %v1230_v62  ;;  %v1102_v45 = vpack.c.b16 %v1098_v8, %v1097_v7  ;;  %v2655_v8 = vld [vmem:[%s3236_s12 + $0x30] sm:$0xf] }
  0x6b   : > { %v1268_v15 = vunpack.c.l.b16 %v1231_v54  ;;  %v2700_v54 = vld [vmem:[%s3236_s12 + $0x2c] sm:$0x1]  ;;  %v1562_v6 = vrot.slane %v1560_v58, 4  ;;  %v1565_v7 = vrot.slane %v1563_v46, 5 }
  0x6c   : > { %1716 = vmatpush.bf16.msra.mxu3 %v2961_v12  ;;  %1890 = vmatpush.bf16.msra.mxu0 %v2969_v19  ;;  %v1534_v12 = vrot.slane %v1532_v4, 4  ;;  %v2696_v19 = vld [vmem:[%s3236_s12 + $0x1c] sm:$0x1]  ;;  %v1569_v16 = vshll.u32 %v2700_v54, 16 }
  0x6d   : > { %v1541_v17 = vshll.u32 %v2696_v19, 16  ;;  %v1274_v18 = vpack.c.b16 %v1268_v15, %v1267_v14  ;;  %v1777_v38 = vrot.slane %v2696_v19, 5  ;;  %v1555_v15 = vshll.u32 %v2698_v48, 16 }
  0x6e   : > { %v1538_v22 = vor.u32 %v1537_v13, %v1534_v12  ;;  %v2563_v12 = vld [vmem:[%s3236_s12 + $0x38] sm:$0xe]  ;;  %v2564_v13 = vld [vmem:[%s3236_s12 + $0x40] sm:$0xe] }
  0x6f   : > { %v1543_v33 = vrot.slane %v1541_v17, 5  ;;  %v2572_v17 = vrot.slane %v2564_v13, 9  ;;  %v1557_v30 = vrot.slane %v1555_v15, 5 }
  0x70   : > { %1717 = vmatpush.bf16.msra.mxu3 %v2960_v20  ;;  %1891 = vmatpush.bf16.msra.mxu0 %v2968_v23  ;;  %v1524_v20 = vor.u32 %v1523_v11, %v1520_v10  ;;  %v2652_v23 = vor.u32 %v2949_v56, %v2651_v55  ;;  %v1539_v32 = vrot.slane %v1538_v22, 4  ;;  %v2656_v55 = vor.u32 %v2950_v9, %v2655_v8 }
  0x71   : > { %v1566_v56 = vor.u32 %v1565_v7, %v1562_v6  ;;  %v2571_v22 = vrot.slane %v2563_v12, 9 }
  0x72   : > { %v1525_v29 = vrot.slane %v1524_v20, 4  ;;  %v1544_v51 = vsel %vm3284_vm2, %v1539_v32, %v1543_v33  ;;  %v1246_v20 = vrot.slane %v3604_v25, 5  ;;  %v2768_v32 = vrot.slane %v2760_v21, 9 }
  0x73   : > { %927 = vmatmul.bf16.gmra.mxu3 %v2456_v40  ;;  %1173 = vmatmul.bf16.gmra.mxu0 %v1101_v41  ;;  %v2697_v40 = vld [vmem:[%s3236_s12 + $0x20] sm:$0xf]  ;;  %v2569_v41 = vrot.slane %v2561_v26, 9  ;;  %v1647_v62 = vunpack.c.l.b16 %v1544_v51  ;;  %v1571_v26 = vrot.slane %v1569_v16, 5 }
  0x74   : > { %v1530_v50 = vsel %vm3284_vm2, %v1525_v29, %v1529_v31  ;;  %v1546_v52 = vshrl.u32 %v2697_v40, 16  ;;  %v1549_v53 = vshll.u32 %v2697_v40, 16  ;;  %v1567_v29 = vrot.slane %v1566_v56, 4  ;;  %v2705_v16 = vld [vmem:[%s3236_s12 + $0x40] sm:$0xf] }
  0x75   : > { %1337 = vmatmul.bf16.vlgmr.msrb.gmra.mxu1 %v1273_v42  ;;  %1472 = vmatmul.bf16.vlgmr.msrb.gmra.mxu2 %v2648_v43  ;;  %v1234_v42 = vrot.slane %v3555_v39, 5  ;;  %v2570_v43 = vrot.slane %v2562_v28, 9  ;;  %v1778_v39 = vsel %vm3306_vm5, %v2766_v37, %v1777_v38  ;;  %v1646_v61 = vunpack.c.l.b16 %v1530_v50 }
  0x76   : > { %v1821_v0 = vunpack.c.l.b16 %v1778_v39  ;;  %v1548_v1 = vrot.slane %v1546_v52, 4  ;;  %v1551_v2 = vrot.slane %v1549_v53, 5  ;;  %v1781_v31 = vrot.slane %v2698_v48, 5  ;;  %v2702_v52 = vld [vmem:[%s3236_s12 + $0x34] sm:$0x1] }
  0x77   : > { %v1235_v59 = vsel %vm3306_vm5, %v2569_v41, %v1234_v42  ;;  %v1239_v60 = vsel %vm3306_vm5, %v2570_v43, %v1238_v47  ;;  %v1654_v10 = vpack.c.b16 %v1647_v62, %v1646_v61  ;;  %v1247_v38 = vsel %vm3306_vm5, %v2572_v17, %v1246_v20  ;;  %v2704_v53 = vld [vmem:[%s3236_s12 + $0x3c] sm:$0x1]  ;;  %v2659_v61 = vld [vmem:[%s3236_s12 + $0x40] sm:$0xf]  ;;  %v2951_v62 = vld [vmem:[%s3236_s12 + $0x44] sm:$0xf0] }
  0x78   : > { %v1269_v4 = vunpack.c.l.b16 %v1235_v59  ;;  %v1270_v5 = vunpack.c.l.b16 %v1239_v60  ;;  %v1828_v11 = vpack.c.b16 %v1821_v0, %v1820_v63  ;;  %v1552_v14 = vor.u32 %v1551_v2, %v1548_v1  ;;  %v2761_v48 = vld [vmem:[%s3236_s12 + $0x30] sm:$0xe] }
  0x79   : > { %v1572_v41 = vsel %vm3284_vm2, %v1567_v29, %v1571_v26  ;;  %v1272_v60 = vunpack.c.l.b16 %v1247_v38  ;;  %v1583_v0 = vshll.u32 %v2702_v52, 16  ;;  %v1597_v2 = vshll.u32 %v2704_v53, 16 }
  0x7a   : > { %v1275_v19 = vpack.c.b16 %v1270_v5, %v1269_v4  ;;  %v1553_v27 = vrot.slane %v1552_v14, 4  ;;  %v1649_v39 = vunpack.c.l.b16 %v1572_v41  ;;  %v2660_v7 = vor.u32 %v2951_v62, %v2659_v61 }
  0x7b   : > { %v1585_v9 = vrot.slane %v1583_v0, 5  ;;  %v2769_v12 = vrot.slane %v2761_v48, 9  ;;  %v1789_v13 = vrot.slane %v2702_v52, 5  ;;  %v1793_v15 = vrot.slane %v2704_v53, 5 }
  0x7c   : > { %v1558_v40 = vsel %vm3284_vm2, %v1553_v27, %v1557_v30  ;;  %v1602_v20 = vshrl.u32 %v2705_v16, 16  ;;  %v1605_v21 = vshll.u32 %v2705_v16, 16 }
  0x7d   : > { %v1648_v57 = vunpack.c.l.b16 %v1558_v40 }
  0x7e   : > { %v1604_v26 = vrot.slane %v1602_v20, 4 }
  0x7f   : > { %v1655_v4 = vpack.c.b16 %v1649_v39, %v1648_v57 }
  0x83   : > { %932 = vmatmul.bf16.gmra.mxu3 %v2460_v35  ;;  %1178 = vmatmul.bf16.gmra.mxu0 %v1102_v45  ;;  %v2759_v35 = vld [vmem:[%s3236_s12 + $0x20] sm:$0xe]  ;;  %v1242_v45 = vrot.slane %v3601_v24, 5  ;;  %v1785_v24 = vrot.slane %v2700_v54, 5  ;;  %v2762_v54 = vld [vmem:[%s3236_s12 + $0x38] sm:$0xe] }
  0x84   : > { %v2767_v28 = vrot.slane %v2759_v35, 9  ;;  %v2770_v14 = vrot.slane %v2762_v54, 9  ;;  %v1790_v35 = vsel %vm3306_vm5, %v2769_v12, %v1789_v13 }
  0x85   : > { %1342 = vmatmul.bf16.gmra.mxu1 %v1274_v18  ;;  %1477 = vmatmul.bf16.gmra.mxu2 %v2652_v23  ;;  %v2701_v18 = vld [vmem:[%s3236_s12 + $0x30] sm:$0xf]  ;;  %v2703_v23 = vld [vmem:[%s3236_s12 + $0x38] sm:$0xf]  ;;  %v1243_v37 = vsel %vm3306_vm5, %v2571_v22, %v1242_v45  ;;  %v1786_v43 = vsel %vm3306_vm5, %v2768_v32, %v1785_v24  ;;  %v1824_v27 = vunpack.c.l.b16 %v1790_v35  ;;  %v2706_v32 = vld [vmem:[%s3236_s12 + $0x44] sm:$0x1] }
  0x86   : > { %v1574_v25 = vshrl.u32 %v2701_v18, 16  ;;  %v1577_v33 = vshll.u32 %v2701_v18, 16  ;;  %v1588_v34 = vshrl.u32 %v2703_v23, 16  ;;  %v1591_v36 = vshll.u32 %v2703_v23, 16  ;;  %v2708_v24 = vld [vmem:[%s3236_s12 + $0x4c] sm:$0x1] }
  0x87   : > { %v1782_v42 = vsel %vm3306_vm5, %v2767_v28, %v1781_v31  ;;  %v1823_v46 = vunpack.c.l.b16 %v1786_v43  ;;  %v1271_v59 = vunpack.c.l.b16 %v1243_v37  ;;  %v1794_v45 = vsel %vm3306_vm5, %v2770_v14, %v1793_v15  ;;  %v2764_v43 = vld [vmem:[%s3236_s12 + $0x48] sm:$0xe] }
  0x88   : > { %v1576_v47 = vrot.slane %v1574_v25, 4  ;;  %v1579_v49 = vrot.slane %v1577_v33, 5  ;;  %v1590_v50 = vrot.slane %v1588_v34, 4  ;;  %v1593_v51 = vrot.slane %v1591_v36, 5 }
  0x89   : > { %v1822_v58 = vunpack.c.l.b16 %v1782_v42  ;;  %v1276_v6 = vpack.c.b16 %v1272_v60, %v1271_v59  ;;  %v1825_v30 = vunpack.c.l.b16 %v1794_v45  ;;  %v1607_v28 = vrot.slane %v1605_v21, 5  ;;  %v2763_v42 = vld [vmem:[%s3236_s12 + $0x40] sm:$0xe] }
  0x8a   : > { %v1580_v63 = vor.u32 %v1579_v49, %v1576_v47  ;;  %v1594_v1 = vor.u32 %v1593_v51, %v1590_v50  ;;  %v1611_v36 = vshll.u32 %v2706_v32, 16  ;;  %v1625_v38 = vshll.u32 %v2708_v24, 16 }
  0x8b   : > { %v1829_v5 = vpack.c.b16 %v1823_v46, %v1822_v58  ;;  %v1830_v33 = vpack.c.b16 %v1825_v30, %v1824_v27  ;;  %v1608_v34 = vor.u32 %v1607_v28, %v1604_v26  ;;  %v2771_v53 = vrot.slane %v2763_v42, 9  ;;  %v2990_v27 = vld [vmem:[%s3991_s3 + $0x74] sm:$0xf]  ;;  %v2881_v30 = vld [vmem:[%s3991_s3 + $0x78] sm:$0xf0] }
  0x8c   : > { %v1581_v8 = vrot.slane %v1580_v63, 4  ;;  %v1613_v50 = vrot.slane %v1611_v36, 5  ;;  %v1627_v52 = vrot.slane %v1625_v38, 5  ;;  %v1797_v57 = vrot.slane %v2706_v32, 5  ;;  %v2879_v32 = vld [vmem:[%s3991_s3 + $0x70] sm:$0xf] }
  0x8d   : > { %v1609_v49 = vrot.slane %v1608_v34, 4  ;;  %v2772_v39 = vrot.slane %v2764_v43, 9  ;;  %v1801_v58 = vrot.slane %v2708_v24, 5  ;;  %v2884_v26 = vor.u32 %v2990_v27, %v2881_v30  ;;  %v2991_v24 = vld [vmem:[%s3991_s3 + $0x74] sm:$0xf0] }
  0x8e   : > { %v1798_v0 = vsel %vm3306_vm5, %v2771_v53, %v1797_v57  ;;  %v2988_v36 = vld [vmem:[%s3991_s3 + $0x64] sm:$0xf]  ;;  %v2986_v53 = vld [vmem:[%s3991_s3 + $0x54] sm:$0xf]  ;;  %v2865_v57 = vld [vmem:[%s3991_s3 + $0x58] sm:$0xf0] }
  0x8f   : > { %v1614_v60 = vsel %vm3284_vm2, %v1609_v49, %v1613_v50  ;;  %v1826_v48 = vunpack.c.l.b16 %v1798_v0  ;;  %2076 = vmatpush.bf16.msra.mxu2 %v2884_v26  ;;  %3010 = vmatpush.bf16.msrb.mxu3 %v2884_v26  ;;  %v2871_v49 = vld [vmem:[%s3991_s3 + $0x60] sm:$0xf]  ;;  %v2989_v50 = vld [vmem:[%s3991_s3 + $0x64] sm:$0xf0]  ;;  %v2857_v0 = vld [vmem:[%s3991_s3 + $0x48] sm:$0xf0] }
  0x90   : > { %v2841_v27 = vld [vmem:[%s3991_s3 + $0x28] sm:$0xf0] }
  0x93   : > { %1718 = vmatmul.bf16.vlgmr.msra.gmra.mxu3 %v1654_v10  ;;  %1892 = vmatmul.bf16.vlgmr.msra.gmra.mxu0 %v1828_v11  ;;  %v1595_v10 = vrot.slane %v1594_v1, 4  ;;  %v1599_v11 = vrot.slane %v1597_v2, 5  ;;  %v1802_v1 = vsel %vm3306_vm5, %v2772_v39, %v1801_v58  ;;  %v2868_v39 = vor.u32 %v2986_v53, %v2865_v57 }
  0x94   : > { %v1827_v54 = vunpack.c.l.b16 %v1802_v1 }
  0x95   : > { %1347 = vmatmul.bf16.gmra.mxu1 %v1275_v19  ;;  %1482 = vmatmul.bf16.gmra.mxu2 %v2656_v55  ;;  %v2707_v19 = vld [vmem:[%s3236_s12 + $0x48] sm:$0xf]  ;;  %v1586_v55 = vsel %vm3284_vm2, %v1581_v8, %v1585_v9  ;;  %v1600_v56 = vsel %vm3284_vm2, %v1595_v10, %v1599_v11  ;;  %s3907_s12 = scalar_lea.vmem [#allocation2], %s2264_s16 }
  0x96   : > { %v1616_v22 = vshrl.u32 %v2707_v19, 16  ;;  %v1619_v17 = vshll.u32 %v2707_v19, 16  ;;  %v1650_v18 = vunpack.c.l.b16 %v1586_v55  ;;  %v1651_v23 = vunpack.c.l.b16 %v1600_v56  ;;  %s2183_s26 = sshll.u32 %s3907_s12, 4  ;;  %s2184_s26 = int_to_ptr.vmem [resolvable:$true] %s2183_s26 }
  0x97   : > { %v1831_v9 = vpack.c.b16 %v1827_v54, %v1826_v48 }
  0x98   : > { %v1618_v29 = vrot.slane %v1616_v22, 4  ;;  %v1621_v31 = vrot.slane %v1619_v17, 5  ;;  %v1656_v25 = vpack.c.b16 %v1651_v23, %v1650_v18 }
  0x9a   : > { %v1622_v37 = vor.u32 %v1621_v31, %v1618_v29 }
  0x9c   : > { %v1623_v51 = vrot.slane %v1622_v37, 4  ;;  %v2873_v37 = vld [vmem:[%s3991_s3 + $0x68] sm:$0xf0] }
  0x9d   : > { %v2876_v38 = vor.u32 %v2988_v36, %v2873_v37 }
  0x9e   : > { %v1628_v63 = vsel %vm3284_vm2, %v1623_v51, %v1627_v52  ;;  %v2872_v52 = vor.u32 %v2989_v50, %v2871_v49  ;;  %v2825_v50 = vld [vmem:[%s3991_s3 + $0x8] sm:$0xf0] }
  0x9f   : > { %2077 = vmatpush.bf16.msra.mxu2 %v2876_v38  ;;  %3011 = vmatpush.bf16.msrb.mxu3 %v2876_v38 }
  0xa3   : > { %1723 = vmatmul.bf16.gmra.mxu3 %v1655_v4  ;;  %1897 = vmatmul.bf16.gmra.mxu0 %v1829_v5  ;;  %v1652_v4 = vunpack.c.l.b16 %v1614_v60  ;;  %v1653_v5 = vunpack.c.l.b16 %v1628_v63  ;;  %v2987_v60 = vld [vmem:[%s3991_s3 + $0x54] sm:$0xf0]  ;;  %v2984_v63 = vld [vmem:[%s3991_s3 + $0x44] sm:$0xf] }
  0xa4   : > { %2078 = vmatpush.bf16.msra.mxu2 %v2868_v39  ;;  %3012 = vmatpush.bf16.msrb.mxu3 %v2868_v39  ;;  %v2860_v1 = vor.u32 %v2984_v63, %v2857_v0 }
  0xa5   : > { %1352 = vmatmul.bf16.gmra.mxu1 %v1276_v6  ;;  %1487 = vmatmul.bf16.gmra.mxu2 %v2660_v7  ;;  %v1657_v8 = vpack.c.b16 %v1653_v5, %v1652_v4  ;;  %v2855_v4 = vld [vmem:[%s3991_s3 + $0x40] sm:$0xf]  ;;  %v2985_v5 = vld [vmem:[%s3991_s3 + $0x44] sm:$0xf0] }
  0xa6   : > { %v2856_v48 = vor.u32 %v2985_v5, %v2855_v4 }
  0xa8   : > { %2079 = vmatpush.bf16.msra.mxu2 %v2860_v1  ;;  %3013 = vmatpush.bf16.msrb.mxu3 %v2860_v1 }
  0xb0   : > { %v513_v40 = vpop.f32.mrf.mxu0 }
  0xb2   : > { %v614_v41 = vpop.f32.mrf.mxu1 }
  0xb3   : > { %v615_v47 = vadd.f32 %v614_v41, %v513_v40  ;;  %1728 = vmatmul.bf16.gmra.mxu3 %v1656_v25  ;;  %1902 = vmatmul.bf16.gmra.mxu0 %v1830_v33  ;;  %v2880_v33 = vor.u32 %v2991_v24, %v2879_v32  ;;  %v2831_v32 = vld [vmem:[%s3991_s3 + $0x10] sm:$0xf]  ;;  %v2979_v24 = vld [vmem:[%s3991_s3 + $0x14] sm:$0xf0] }
  0xb5   : > { %3002 = vmatpush.bf16.msra.mxu1 %v2880_v33  ;;  %2047 = vmatpush.bf16.msrb.mxu0 %v2880_v33  ;;  %v2832_v33 = vor.u32 %v2979_v24, %v2831_v32 }
  0xb6   : > { %v523_v46 = vpop.f32.mrf.mxu3 }
  0xb8   : > { %v783_v59 = vpop.f32.mrf.mxu2  ;;  %v3698_v62 = vpop.f32.mrf.mxu0 }
  0xb9   : > { %v803_v61 = vadd.f32 %v783_v59, %v615_v47  ;;  %3003 = vmatpush.bf16.msra.mxu1 %v2872_v52  ;;  %2048 = vmatpush.bf16.msrb.mxu0 %v2872_v52  ;;  %v2863_v59 = vld [vmem:[%s3991_s3 + $0x50] sm:$0xf] }
  0xba   : > { %v3706_v2 = vpop.f32.mrf.mxu1 }
  0xbb   : > { %v617_v0 = vadd.f32 %v3706_v2, %v3698_v62  ;;  %v3860_v62 = vld [vmem:[%s3990_s2] ss:$0 sm:$0xff] }
  0xbe   : > { %v3708_v6 = vpop.f32.mrf.mxu3 }
  0xc0   : > { %v3710_v7 = vpop.f32.mrf.mxu2  ;;  %v518_v44 = vpop.f32.mrf.mxu0 }
  0xc1   : > { %v804_v1 = vadd.f32 %v3710_v7, %v617_v0 }
  0xc2   : > { %v619_v10 = vpop.f32.mrf.mxu1 }
  0xc3   : > { %v620_v11 = vadd.f32 %v619_v10, %v518_v44  ;;  %1733 = vmatmul.bf16.gmra.mxu3 %v1657_v8  ;;  %1907 = vmatmul.bf16.gmra.mxu0 %v1831_v9  ;;  %v2982_v10 = vld [vmem:[%s3991_s3 + $0x34] sm:$0xf] }
  0xc6   : > { %v528_v12 = vpop.f32.mrf.mxu3 }
  0xc8   : > { %v788_v3 = vpop.f32.mrf.mxu2  ;;  %v3712_v14 = vpop.f32.mrf.mxu0 }
  0xc9   : > { %v805_v13 = vadd.f32 %v788_v3, %v620_v11  ;;  %v2849_v11 = vld [vmem:[%s3991_s3 + $0x38] sm:$0xf0] }
  0xca   : > { %v3714_v15 = vpop.f32.mrf.mxu1 }
  0xce   : > { %v3716_v16 = vpop.f32.mrf.mxu3 }
  0xd0   : > { %v3718_v19 = vpop.f32.mrf.mxu2  ;;  %v1164_v55 = vpop.f32.mrf.mxu0 }
  0xd2   : > { %v624_v56 = vpop.f32.mrf.mxu1 }
  0xd3   : > { %v625_v35 = vadd.f32 %v624_v56, %v523_v46 }
  0xd6   : > { %v918_v45 = vpop.f32.mrf.mxu3 }
  0xd7   : > { %v938_v21 = vadd.f32 %v918_v45, %v803_v61  ;;  %v2864_v61 = vor.u32 %v2987_v60, %v2863_v59  ;;  %v2839_v45 = vld [vmem:[%s3991_s3 + $0x20] sm:$0xf] }
  0xd8   : > { %v793_v20 = vpop.f32.mrf.mxu2  ;;  %v3720_v17 = vpop.f32.mrf.mxu0 }
  0xd9   : > { %v807_v22 = vadd.f32 %v793_v20, %v625_v35  ;;  %v3724_v23 = vadd.f32 %v1164_v55, %v938_v21  ;;  %3004 = vmatpush.bf16.msra.mxu1 %v2864_v61  ;;  %2049 = vmatpush.bf16.msrb.mxu0 %v2864_v61  ;;  %v2983_v55 = vld [vmem:[%s3991_s3 + $0x34] sm:$0xf0]  ;;  %v2981_v20 = vld [vmem:[%s3991_s3 + $0x24] sm:$0xf0]  ;;  %v2980_v21 = vld [vmem:[%s3991_s3 + $0x24] sm:$0xf] }
  0xda   : > { %v3722_v18 = vpop.f32.mrf.mxu1  ;;  %v2844_v26 = vor.u32 %v2980_v21, %v2841_v27 }
  0xdd   : > { %2050 = vmatpush.bf16.msrb.mxu0 %v2856_v48  ;;  %3005 = vmatpush.bf16.msra.mxu1 %v2856_v48 }
  0xde   : > { %v3732_v28 = vpop.f32.mrf.mxu3 }
  0xe0   : > { %v3734_v29 = vpop.f32.mrf.mxu2  ;;  %v1169_v31 = vpop.f32.mrf.mxu0 }
  0xe2   : > { %v629_v25 = vpop.f32.mrf.mxu1 }
  0xe3   : > { %v630_v34 = vadd.f32 %v629_v25, %v528_v12  ;;  %v2847_v12 = vld [vmem:[%s3991_s3 + $0x30] sm:$0xf]  ;;  %v2978_v25 = vld [vmem:[%s3991_s3 + $0x14] sm:$0xf] }
  0xe4   : > { %v2848_v35 = vor.u32 %v2983_v55, %v2847_v12 }
  0xe6   : > { %v923_v40 = vpop.f32.mrf.mxu3  ;;  %2051 = vmatpush.bf16.msrb.mxu0 %v2848_v35  ;;  %3006 = vmatpush.bf16.msra.mxu1 %v2848_v35 }
  0xe7   : > { %v940_v42 = vadd.f32 %v923_v40, %v805_v13  ;;  %v2852_v13 = vor.u32 %v2982_v10, %v2849_v11  ;;  %v2823_v40 = vld [vmem:[%s3991_s3] sm:$0xf] }
  0xe8   : > { %v798_v41 = vpop.f32.mrf.mxu2  ;;  %v3750_v47 = vpop.f32.mrf.mxu0 }
  0xe9   : > { %v3748_v43 = vadd.f32 %v798_v41, %v630_v34  ;;  %v3758_v51 = vadd.f32 %v1169_v31, %v940_v42  ;;  %2080 = vmatpush.bf16.msra.mxu2 %v2852_v13  ;;  %3014 = vmatpush.bf16.msrb.mxu3 %v2852_v13  ;;  %v2833_v34 = vld [vmem:[%s3991_s3 + $0x18] sm:$0xf0]  ;;  %v2977_v41 = vld [vmem:[%s3991_s3 + $0x4] sm:$0xf0]  ;;  %v2976_v42 = vld [vmem:[%s3991_s3 + $0x4] sm:$0xf] }
  0xea   : > { %v3786_v9 = vpop.f32.mrf.mxu1  ;;  %v2836_v37 = vor.u32 %v2978_v25, %v2833_v34  ;;  %v2824_v49 = vor.u32 %v2977_v41, %v2823_v40  ;;  %v2828_v53 = vor.u32 %v2976_v42, %v2825_v50 }
  0xed   : > { %2081 = vmatpush.bf16.msra.mxu2 %v2844_v26  ;;  %3015 = vmatpush.bf16.msrb.mxu3 %v2844_v26 }
  0xee   : > { %v3766_v58 = vpop.f32.mrf.mxu3 }
  0xf0   : > { %v1174_v46 = vpop.f32.mrf.mxu0  ;;  %v3804_v56 = vpop.f32.mrf.mxu2 }
  0xf1   : > { %2082 = vmatpush.bf16.msra.mxu2 %v2836_v37  ;;  %3016 = vmatpush.bf16.msrb.mxu3 %v2836_v37 }
  0xf2   : > { %v1338_v36 = vpop.f32.mrf.mxu1 }
  0xf3   : > { %v1358_v4 = vadd.f32 %v1338_v36, %v3724_v23 }
  0xf5   : > { %2083 = vmatpush.bf16.msra.mxu2 %v2828_v53  ;;  %3017 = vmatpush.bf16.msrb.mxu3 %v2828_v53 }
  0xf6   : > { %v928_v54 = vpop.f32.mrf.mxu3 }
  0xf7   : > { %v942_v8 = vadd.f32 %v928_v54, %v807_v22  ;;  %v2840_v22 = vor.u32 %v2981_v20, %v2839_v45  ;;  %v622_v45 = vadd.f32 %v3714_v15, %v3712_v14 }
  0xf8   : > { %v3788_v44 = vpop.f32.mrf.mxu0  ;;  %v1473_v38 = vpop.f32.mrf.mxu2 }
  0xf9   : > { %v3799_v3 = vadd.f32 %v1174_v46, %v942_v8  ;;  %2052 = vmatpush.bf16.msrb.mxu0 %v2840_v22  ;;  %3007 = vmatpush.bf16.msra.mxu1 %v2840_v22  ;;  %v1493_v54 = vadd.f32 %v1473_v38, %v1358_v4  ;;  %v806_v22 = vadd.f32 %v3718_v19, %v622_v45 }
  0xfa   : > { %v1340_v59 = vpop.f32.mrf.mxu1 }
  0xfb   : > { %v941_v26 = vadd.f32 %v3766_v58, %v806_v22 }
  0xfd   : > { %2053 = vmatpush.bf16.msrb.mxu0 %v2832_v33  ;;  %3008 = vmatpush.bf16.msra.mxu1 %v2832_v33  ;;  %v1187_v14 = vadd.f32 %v3750_v47, %v941_v26 }
  0xfe   : > { %v3818_v30 = vpop.f32.mrf.mxu3 }
 0x100   : > { %v1179_v31 = vpop.f32.mrf.mxu0  ;;  %v1475_v60 = vpop.f32.mrf.mxu2 }
 0x101   : > { %2054 = vmatpush.bf16.msrb.mxu0 %v2824_v49  ;;  %3009 = vmatpush.bf16.msra.mxu1 %v2824_v49 }
 0x102   : > { %v1343_v5 = vpop.f32.mrf.mxu1 }
 0x106   : > { %v933_v52 = vpop.f32.mrf.mxu3 }
 0x107   : > { %v944_v57 = vadd.f32 %v933_v52, %v3748_v43  ;;  %v939_v43 = vadd.f32 %v3732_v28, %v804_v1 }
 0x108   : > { %v3845_v39 = vpop.f32.mrf.mxu0  ;;  %v1478_v8 = vpop.f32.mrf.mxu2 }
 0x109   : > { %v3847_v46 = vadd.f32 %v1179_v31, %v944_v57  ;;  %v1185_v11 = vadd.f32 %v3720_v17, %v939_v43  ;;  %v1360_v31 = vadd.f32 %v1343_v5, %v3758_v51  ;;  %v627_v51 = vadd.f32 %v3722_v18, %v3708_v6 }
 0x10a   : > { %v1345_v28 = vpop.f32.mrf.mxu1 }
 0x10b   : > { %v1359_v13 = vadd.f32 %v1340_v59, %v1185_v11  ;;  %v1495_v33 = vadd.f32 %v1478_v8, %v1360_v31  ;;  %v1361_v38 = vadd.f32 %v1345_v28, %v1187_v14  ;;  %v808_v53 = vadd.f32 %v3734_v29, %v627_v51  ;;  %v1961_v14 = vld [vmem:[%s3992_s4] sm:$0x3] }
 0x10d   : > { %v1494_v55 = vadd.f32 %v1475_v60, %v1359_v13  ;;  %v943_v59 = vadd.f32 %v3818_v30, %v808_v53 }
 0x10e   : > { %v3849_v61 = vpop.f32.mrf.mxu3 }
 0x10f   : > { %v1189_v6 = vadd.f32 %v3788_v44, %v943_v59 }
 0x110   : > { %v1893_v63 = vpop.f32.mrf.mxu0  ;;  %v1480_v17 = vpop.f32.mrf.mxu2 }
 0x111   : > { %v1496_v40 = vadd.f32 %v1480_v17, %v1361_v38 }
 0x112   : > { %v1348_v37 = vpop.f32.mrf.mxu1 }
 0x113   : > { %v1362_v60 = vadd.f32 %v1348_v37, %v3799_v3  ;;  %v632_v3 = vadd.f32 %v3786_v9, %v3716_v16  ;;  %v2105_v37 = vld [vmem:[%s3895_s14] sm:$0xff] }
 0x116   : > { %v1719_v48 = vpop.f32.mrf.mxu3 }
 0x117   : > { %v1739_v12 = vadd.f32 %v1719_v48, %v1493_v54 }
 0x118   : > { %v1895_v10 = vpop.f32.mrf.mxu0  ;;  %v1483_v19 = vpop.f32.mrf.mxu2 }
 0x119   : > { %v1913_v35 = vadd.f32 %v1893_v63, %v1739_v12  ;;  %v1497_v4 = vadd.f32 %v1483_v19, %v1362_v60 }
 0x11a   : > { %v1350_v57 = vpop.f32.mrf.mxu1 }
 0x11b   : > { %v1925_v20 = vadd.f32 %v3860_v62, %v1913_v35  ;;  %v1363_v48 = vadd.f32 %v1350_v57, %v1189_v6  ;;  %v810_v35 = vadd.f32 %v3804_v56, %v632_v3 }
 0x11d   : > { %v1933_v32 = vmax.f32 %v1925_v20, 0.0 }
 0x11e   : > { %v1721_v2 = vpop.f32.mrf.mxu3 }
 0x11f   : > { %v1740_v7 = vadd.f32 %v1721_v2, %v1494_v55  ;;  %v945_v2 = vadd.f32 %v3849_v61, %v810_v35 }
 0x120   : > { %v1898_v23 = vpop.f32.mrf.mxu0  ;;  %v1485_v1 = vpop.f32.mrf.mxu2 }
 0x121   : > { %v1914_v21 = vadd.f32 %v1895_v10, %v1740_v7  ;;  %v1498_v54 = vadd.f32 %v1485_v1, %v1363_v48  ;;  %v1191_v16 = vadd.f32 %v3845_v39, %v945_v2 }
 0x122   : > { %v1353_v10 = vpop.f32.mrf.mxu1 }
 0x123   : > { %v1926_v27 = vadd.f32 %v3860_v62, %v1914_v21  ;;  %v1364_v7 = vadd.f32 %v1353_v10, %v3847_v46 }
 0x125   : > { %v1934_v24 = vmax.f32 %v1926_v27, 0.0 }
 0x126   : > { %v1724_v25 = vpop.f32.mrf.mxu3 }
 0x127   : > { %v1941_v34 = vpack.c.bf16 %v1934_v24, %v1933_v32  ;;  %v1741_v15 = vadd.f32 %v1724_v25, %v1495_v33 }
 0x128   : > { %v1900_v36 = vpop.f32.mrf.mxu0  ;;  %v1488_v12 = vpop.f32.mrf.mxu2 }
 0x129   : > { %2055 = vmatmul.bf16.vlgmr.msrb.gmra.mxu0 %v1941_v34  ;;  %2084 = vmatmul.bf16.vlgmr.msra.gmra.mxu2 %v1941_v34  ;;  %v1915_v41 = vadd.f32 %v1898_v23, %v1741_v15  ;;  %v1499_v21 = vadd.f32 %v1488_v12, %v1364_v7 }
 0x12a   : > { %v1355_v22 = vpop.f32.mrf.mxu1 }
 0x12b   : > { %v1927_v49 = vadd.f32 %v3860_v62, %v1915_v41  ;;  %v1365_v27 = vadd.f32 %v1355_v22, %v1191_v16  ;;  %v2114_v16 = vld [vmem:[%s3895_s14 + $0x48] sm:$0xff] }
 0x12d   : > { %v1935_v63 = vmax.f32 %v1927_v49, 0.0 }
 0x12e   : > { %v1726_v42 = vpop.f32.mrf.mxu3 }
 0x12f   : > { %v1742_v58 = vadd.f32 %v1726_v42, %v1496_v40  ;;  %v3904_v40 = vperm.slane %v1961_v14, 1 }
 0x130   : > { %v1903_v52 = vpop.f32.mrf.mxu0  ;;  %v1490_v56 = vpop.f32.mrf.mxu2 }
 0x131   : > { %v1916_v50 = vadd.f32 %v1900_v36, %v1742_v58  ;;  %v1500_v26 = vadd.f32 %v1490_v56, %v1365_v27  ;;  %v2106_v58 = vld [vmem:[%s3895_s14 + $0x8] sm:$0xff]  ;;  %v2115_v27 = vld [vmem:[%s3895_s14 + $0x50] sm:$0xff] }
 0x133   : > { %v1928_v47 = vadd.f32 %v3860_v62, %v1916_v50  ;;  %v2107_v50 = vld [vmem:[%s3895_s14 + $0x10] sm:$0xff] }
 0x135   : > { %v1936_v0 = vmax.f32 %v1928_v47, 0.0 }
 0x136   : > { %v1729_v43 = vpop.f32.mrf.mxu3 }
 0x137   : > { %v1942_v5 = vpack.c.bf16 %v1936_v0, %v1935_v63  ;;  %v1743_v18 = vadd.f32 %v1729_v43, %v1497_v4  ;;  %v2108_v63 = vld [vmem:[%s3895_s14 + $0x18] sm:$0xff]  ;;  %v2109_v43 = vld [vmem:[%s3895_s14 + $0x20] sm:$0xff] }
 0x138   : > { %v1905_v29 = vpop.f32.mrf.mxu0 }
 0x139   : > { %2060 = vmatmul.bf16.vlgmr.msra.gmra.mxu1 %v1942_v5  ;;  %2089 = vmatmul.bf16.gmra.mxu2 %v1942_v5  ;;  %v1917_v8 = vadd.f32 %v1903_v52, %v1743_v18 }
 0x13b   : > { %v1929_v55 = vadd.f32 %v3860_v62, %v1917_v8 }
 0x13d   : > { %v1937_v28 = vmax.f32 %v1929_v55, 0.0 }
 0x13e   : > { %v1731_v11 = vpop.f32.mrf.mxu3 }
 0x13f   : > { %v1744_v30 = vadd.f32 %v1731_v11, %v1498_v54  ;;  %v2110_v54 = vld [vmem:[%s3895_s14 + $0x28] sm:$0xff]  ;;  %v2111_v11 = vld [vmem:[%s3895_s14 + $0x30] sm:$0xff] }
 0x140   : > { %v1908_v45 = vpop.f32.mrf.mxu0 }
 0x141   : > { %v1918_v13 = vadd.f32 %v1905_v29, %v1744_v30 }
 0x143   : > { %v1930_v44 = vadd.f32 %v3860_v62, %v1918_v13 }
 0x145   : > { %v1938_v23 = vmax.f32 %v1930_v44, 0.0  ;;  %v2112_v44 = vld [vmem:[%s3895_s14 + $0x38] sm:$0xff] }
 0x146   : > { %v1734_v20 = vpop.f32.mrf.mxu3 }
 0x147   : > { %v1943_v17 = vpack.c.bf16 %v1938_v23, %v1937_v28  ;;  %v1745_v9 = vadd.f32 %v1734_v20, %v1499_v21  ;;  %v2113_v28 = vld [vmem:[%s3895_s14 + $0x40] sm:$0xff] }
 0x148   : > { %v1910_v46 = vpop.f32.mrf.mxu0 }
 0x149   : > { %2065 = vmatmul.bf16.gmra.mxu1 %v1943_v17  ;;  %2094 = vmatmul.bf16.gmra.mxu2 %v1943_v17  ;;  %v1919_v31 = vadd.f32 %v1908_v45, %v1745_v9 }
 0x14b   : > { %v1931_v25 = vadd.f32 %v3860_v62, %v1919_v31 }
 0x14d   : > { %v1939_v34 = vmax.f32 %v1931_v25, 0.0  ;;  %v2116_v25 = vld [vmem:[%s3895_s14 + $0x58] sm:$0xff] }
 0x14e   : > { %v1736_v61 = vpop.f32.mrf.mxu3 }
 0x14f   : > { %v1746_v32 = vadd.f32 %v1736_v61, %v1500_v26 }
 0x151   : > { %v1920_v24 = vadd.f32 %v1910_v46, %v1746_v32 }
 0x153   : > { %v1932_v33 = vadd.f32 %v3860_v62, %v1920_v24  ;;  %v3897_v62 = vperm.slane %v1961_v14, 0 }
 0x155   : > { %v1940_v39 = vmax.f32 %v1932_v33, 0.0 }
 0x157   : > { %v1944_v36 = vpack.c.bf16 %v1940_v39, %v1939_v34  ;;  %v2117_v39 = vld [vmem:[%s3895_s14 + $0x60] sm:$0xff] }
 0x159   : > { %2070 = vmatmul.bf16.gmra.mxu1 %v1944_v36  ;;  %2099 = vmatmul.bf16.vlgmr.msrb.gmra.mxu3 %v1944_v36 }
 0x1a6   : > { %v2056_v15 = vpop.f32.mrf.mxu0 }
 0x1a7   : > { %v2057_v38 = vadd.f32 %v2056_v15, %v3897_v62 }
 0x1a9   : > { %v2121_v19 = vadd.f32 %v2105_v37, %v2057_v38 }
 0x1ab   : > { %v2137_v41 = vmax.f32 %v2121_v19, 0.0 }
 0x1ac   : > { %v2085_v42 = vpop.f32.mrf.mxu2 }
 0x1ad   : > { %2153 = vst [vmem:[%s3907_s12] sm:$0xff] %v2137_v41  ;;  %v2086_v51 = vadd.f32 %v2085_v42, %v3904_v40  ;;  %v2118_v41 = vld [vmem:[%s3895_s14 + $0x68] sm:$0xff] }
 0x1ae   : > { %v2058_v49 = vpop.f32.mrf.mxu0 }
 0x1af   : > { %v2122_v52 = vadd.f32 %v2106_v58, %v2086_v51  ;;  %v2059_v53 = vadd.f32 %v2058_v49, %v3897_v62  ;;  %v2119_v51 = vld [vmem:[%s3895_s14 + $0x70] sm:$0xff] }
 0x1b1   : > { %v2138_v47 = vmax.f32 %v2122_v52, 0.0  ;;  %v2123_v57 = vadd.f32 %v2107_v50, %v2059_v53 }
 0x1b3   : > { %2154 = vst [vmem:[%s3907_s12 + $0x8] sm:$0xff] %v2138_v47  ;;  %v2139_v59 = vmax.f32 %v2123_v57, 0.0 }
 0x1b4   : > { %v2087_v60 = vpop.f32.mrf.mxu2 }
 0x1b5   : > { %2155 = vst [vmem:[%s3907_s12 + $0x10] sm:$0xff] %v2139_v59  ;;  %v2088_v0 = vadd.f32 %v2087_v60, %v3904_v40  ;;  %v2120_v59 = vld [vmem:[%s3895_s14 + $0x78] sm:$0xff] }
 0x1b6   : > { %v2061_v1 = vpop.f32.mrf.mxu1 }
 0x1b7   : > { %v2124_v4 = vadd.f32 %v2108_v63, %v2088_v0  ;;  %v2062_v5 = vadd.f32 %v2061_v1, %v3897_v62 }
 0x1b9   : > { %v2140_v6 = vmax.f32 %v2124_v4, 0.0  ;;  %v2125_v18 = vadd.f32 %v2109_v43, %v2062_v5 }
 0x1bb   : > { %2156 = vst [vmem:[%s3907_s12 + $0x18] sm:$0xff] %v2140_v6  ;;  %v2141_v48 = vmax.f32 %v2125_v18, 0.0 }
 0x1bc   : > { %v2090_v29 = vpop.f32.mrf.mxu2 }
 0x1bd   : > { %2157 = vst [vmem:[%s3907_s12 + $0x20] sm:$0xff] %v2141_v48  ;;  %v2091_v8 = vadd.f32 %v2090_v29, %v3904_v40 }
 0x1be   : > { %v2063_v10 = vpop.f32.mrf.mxu1 }
 0x1bf   : > { %v2126_v30 = vadd.f32 %v2110_v54, %v2091_v8  ;;  %v2064_v12 = vadd.f32 %v2063_v10, %v3897_v62 }
 0x1c1   : > { %v2142_v3 = vmax.f32 %v2126_v30, 0.0  ;;  %v2127_v13 = vadd.f32 %v2111_v11, %v2064_v12 }
 0x1c3   : > { %2158 = vst [vmem:[%s3907_s12 + $0x28] sm:$0xff] %v2142_v3  ;;  %v2143_v55 = vmax.f32 %v2127_v13, 0.0 }
 0x1c4   : > { %v2092_v35 = vpop.f32.mrf.mxu2 }
 0x1c5   : > { %2159 = vst [vmem:[%s3907_s12 + $0x30] sm:$0xff] %v2143_v55  ;;  %v2093_v2 = vadd.f32 %v2092_v35, %v3904_v40 }
 0x1c6   : > { %v2066_v7 = vpop.f32.mrf.mxu1 }
 0x1c7   : > { %v2128_v23 = vadd.f32 %v2112_v44, %v2093_v2  ;;  %v2067_v45 = vadd.f32 %v2066_v7, %v3897_v62 }
 0x1c9   : > { %v2144_v20 = vmax.f32 %v2128_v23, 0.0  ;;  %v2129_v21 = vadd.f32 %v2113_v28, %v2067_v45 }
 0x1cb   : > { %2160 = vst [vmem:[%s3907_s12 + $0x38] sm:$0xff] %v2144_v20  ;;  %v2145_v17 = vmax.f32 %v2129_v21, 0.0 }
 0x1cc   : > { %v2095_v22 = vpop.f32.mrf.mxu2 }
 0x1cd   : > { %2161 = vst [vmem:[%s3907_s12 + $0x40] sm:$0xff] %v2145_v17  ;;  %v2096_v9 = vadd.f32 %v2095_v22, %v3904_v40 }
 0x1ce   : > { %v2068_v56 = vpop.f32.mrf.mxu1 }
 0x1cf   : > { %v2130_v26 = vadd.f32 %v2114_v16, %v2096_v9  ;;  %v2069_v31 = vadd.f32 %v2068_v56, %v3897_v62 }
 0x1d1   : > { %v2146_v61 = vmax.f32 %v2130_v26, 0.0  ;;  %v2131_v32 = vadd.f32 %v2115_v27, %v2069_v31 }
 0x1d3   : > { %2162 = vst [vmem:[%s3907_s12 + $0x48] sm:$0xff] %v2146_v61  ;;  %v2147_v46 = vmax.f32 %v2131_v32, 0.0 }
 0x1d4   : > { %v2097_v24 = vpop.f32.mrf.mxu2 }
 0x1d5   : > { %2163 = vst [vmem:[%s3907_s12 + $0x50] sm:$0xff] %v2147_v46  ;;  %v2098_v33 = vadd.f32 %v2097_v24, %v3904_v40 }
 0x1d6   : > { %v2071_v34 = vpop.f32.mrf.mxu1 }
 0x1d7   : > { %v2132_v36 = vadd.f32 %v2116_v25, %v2098_v33  ;;  %v2072_v14 = vadd.f32 %v2071_v34, %v3897_v62 }
 0x1d9   : > { %v2148_v15 = vmax.f32 %v2132_v36, 0.0  ;;  %v2133_v37 = vadd.f32 %v2117_v39, %v2072_v14 }
 0x1db   : > { %2164 = vst [vmem:[%s3907_s12 + $0x58] sm:$0xff] %v2148_v15  ;;  %v2149_v38 = vmax.f32 %v2133_v37, 0.0 }
 0x1dc   : > { %v2100_v19 = vpop.f32.mrf.mxu3 }
 0x1dd   : > { %2165 = vst [vmem:[%s3907_s12 + $0x60] sm:$0xff] %v2149_v38  ;;  %v2101_v42 = vadd.f32 %v2100_v19, %v3904_v40 }
 0x1de   : > { %v2073_v58 = vpop.f32.mrf.mxu1 }
 0x1df   : > { %v2134_v49 = vadd.f32 %v2118_v41, %v2101_v42  ;;  %v2074_v50 = vadd.f32 %v2073_v58, %v3897_v62 }
 0x1e1   : > { %v2150_v52 = vmax.f32 %v2134_v49, 0.0  ;;  %v2135_v53 = vadd.f32 %v2119_v51, %v2074_v50 }
 0x1e3   : > { %2166 = vst [vmem:[%s3907_s12 + $0x68] sm:$0xff] %v2150_v52  ;;  %v2151_v47 = vmax.f32 %v2135_v53, 0.0 }
 0x1e4   : > { %v2102_v57 = vpop.f32.mrf.mxu3 }
 0x1e5   : > { %2167 = vst [vmem:[%s3907_s12 + $0x70] sm:$0xff] %v2151_v47  ;;  %v2103_v60 = vadd.f32 %v2102_v57, %v3904_v40 }
 0x1e7   : > { %v2136_v62 = vadd.f32 %v2120_v59, %v2103_v60 }
 0x1e9   : > { %v2152_v63 = vmax.f32 %v2136_v62, 0.0 }
 0x1eb   : > { %2168 = vst [vmem:[%s3907_s12 + $0x78] sm:$0xff] %v2152_v63 }
 0x1ec   : > { %3088 = shalt.err (!%p3085_p4)
}
 0x1ed   : > { %s3125_s15 = smov 256   ;;  %s3126_s12 = smov 16  }
 0x1ee   : > { %3019 = dma.vmem_to_hbm [thread:$0]  (%p3200_p5), %s2184_s26, 2048, %s2186_s28, %s2170_s25, %s3125_s15, %s3125_s15, %s3126_s12  }
 0x1ef PF: > { %p3025_p7 = scmp.ge.s32.totalorder %s3123_s24, 2  ;;  %s2200_s17 = sand.u32 1, %s3111_s21  }
 0x1f0   : > { %s2201_s18 = scalar_lea.sflag [#allocation3], %s2200_s17 }
 0x1f1   : > { %p3022_p8 = pnand %p3025_p7, %p3204_p6 }
 0x1f3   : > { %p3023_p9 = pneg %p3022_p8 }
 0x1f5   : > { %3106 = dma.done.wait (%p3023_p9), %s2201_s18, 2048  }
 0x1f6   : > { %3108 = vsyncadd (%p3023_p9), %s2201_s18, 4294965248  ;;  %p16_p10 = scmp.ge.s32.totalorder %s3187_s27, 4   ;;  %s4001_s21 = smov %s3115_s22 }
 0x1f7   : > { %s4002_s22 = smov %s3119_s23  ;;  %s4003_s23 = smov %s3198_s30 }
 0x1f8   : > { %s4004_s24 = smov %s3187_s27  ;;  %18 = sbr.rel (!%p16_p10) target bundleno = 3 (0x3), region = 92 }
 0x1fd   :  { %2207 = vsyncpa [#allocation3], 1 }
 0x1fe   :  { %2209 = vsyncpa [#allocation3 + $0x1], 1 }

</bundles_post_ra>
